<compile_context>
chip_gen: v7x
topology: tpu7x:2x2x1
jax: 0.10.0
libtpu: 0.0.40
codegen_flags: <defaults>
</compile_context>

<pallas_src>
import functools

import jax
import jax.numpy as jnp
from jax.experimental import pallas as pl
from jax.experimental.pallas import tpu as pltpu

_VMEM = pl.BlockSpec(memory_space=pltpu.MemorySpace.VMEM)
_EPS = 1e-5


def _round_up(x, m):
    return (x + m - 1) // m * m


# ----------------------------- Pallas kernel ------------------------------- #

def _down_fused_kernel(pool_ref, mask_ref, w1_ref, w2_ref, g1_ref, b1_ref,
                       g2_ref, b2_ref, o_ref, buf_ref, *,
                       n, hp, wp, cin, cmid, halo):
    """Fused MaxPool2d(2) -> (Conv3x3 + BN + ReLU) x 2.

    pool_ref : (4, RP, Cin) bf16  four 2x2-strided views, already laid out in
                                  the zero-bordered flat row format
                                  RP = N*(Hp+2)*(Wp+1)
    mask_ref : (RP, 1)   f32      1.0 at real pixels, 0.0 at border/separator
    w1_ref   : (9, Cin,  Cmid) bf16   one (Cin, Cmid) matrix per 3x3 tap
    w2_ref   : (9, Cmid, Cout) bf16
    g*_ref / b*_ref : (1, C) f32  BatchNorm affine params
    o_ref    : (RP, Cout)         output rows (border rows sliced off outside)
    buf_ref  : (RP + 2*halo, max(Cin, Cmid)) f32 scratch row buffer
    """
    rp = pool_ref.shape[1]
    ws = wp + 1                       # padded row stride (1 zero separator col)
    inv_r = 1.0 / float(n * hp * wp)  # BN stats use only the real pixels

    # Fused 2x2 max-pool: pure elementwise max of the four strided slabs.
    x = jnp.maximum(
        jnp.maximum(pool_ref[0].astype(jnp.float32),
                    pool_ref[1].astype(jnp.float32)),
        jnp.maximum(pool_ref[2].astype(jnp.float32),
                    pool_ref[3].astype(jnp.float32)))

    m = mask_ref[...]                 # (RP, 1) multiplicative valid-pixel mask

    # Zero only the halo (no full-scratch fill): the zero ring inside
    # [halo, halo+rp) comes pre-zeroed from the wrapper layout (conv1) and
    # from the masked writeback (conv2).
    buf_ref[0:halo, :] = jnp.zeros((halo, buf_ref.shape[1]), jnp.float32)
    buf_ref[halo + rp:halo + rp + halo, :] = jnp.zeros(
        (halo, buf_ref.shape[1]), jnp.float32)

    def conv3x3(c_in, w_ref):
        # 9 shift-and-accumulate MXU dots over the zero-bordered row buffer:
        # every tap is a contiguous shifted read, no per-tap masks.
        # TODO(synk): once C >= 128, concatenate the 9 taps into one
        # (rows, 9*C) slab and issue a single K=9*C MXU contraction.
        acc = jnp.zeros((rp, w_ref.shape[2]), jnp.float32)
        for ky in range(3):
            for kx in range(3):
                s = (ky - 1) * ws + (kx - 1)
                tap = buf_ref[halo + s:halo + s + rp, :c_in]
                acc = acc + jnp.dot(tap.astype(jnp.bfloat16),
                                    w_ref[ky * 3 + kx],
                                    preferred_element_type=jnp.float32)
        return acc

    def bn_scale_shift(z, g_ref, b_ref):
        # Training-mode BatchNorm2d folded into one scale/shift:
        # single pass for sum / sumsq over the valid pixels.
        zm = z * m
        mean = jnp.sum(zm, axis=0, keepdims=True) * inv_r
        var = jnp.sum(zm * zm, axis=0, keepdims=True) * inv_r - mean * mean
        scale = g_ref[...] * jax.lax.rsqrt(var + _EPS)
        shift = b_ref[...] - mean * scale
        return scale, shift

    # ---- conv1 -> BN -> ReLU ------------------------------------------------
    buf_ref[halo:halo + rp, :cin] = x
    z1 = conv3x3(cin, w1_ref)
    sc1, sh1 = bn_scale_shift(z1, g1_ref, b1_ref)
    h1 = m * jnp.maximum(z1 * sc1 + sh1, 0.0)   # mask keeps the zero ring zero

    # ---- conv2 -> BN -> ReLU ------------------------------------------------
    buf_ref[halo:halo + rp, :cmid] = h1
    z2 = conv3x3(cmid, w2_ref)
    sc2, sh2 = bn_scale_shift(z2, g2_ref, b2_ref)
    # Border rows of the output are sliced off in the wrapper, no mask needed.
    o_ref[...] = jnp.maximum(z2 * sc2 + sh2, 0.0).astype(o_ref.dtype)


# ------------------------------ JAX wrappers -------------------------------- #

def prepare_params(params):
    """One-time weight prep (hoisted out of the forward path): flatten conv
    weights to per-tap (Cin, Cout) bf16 matrices.  No 128-lane zero padding is
    shipped over HBM anymore."""
    w1, g1, b1, w2, g2, b2 = params
    cmid, cin = w1.shape[0], w1.shape[1]
    cout = w2.shape[0]

    def taps(wt):  # (Cout, Cin, 3, 3) -> (9, Cin, Cout); tap index = ky*3 + kx
        return jnp.transpose(wt, (2, 3, 1, 0)).reshape(9, wt.shape[1], wt.shape[0])

    w1_t = taps(w1).astype(jnp.bfloat16)
    w2_t = taps(w2).astype(jnp.bfloat16)

    def vec(v):
        return v.reshape(1, -1).astype(jnp.float32)

    return (w1_t, vec(g1), vec(b1), w2_t, vec(g2), vec(b2)), (cin, cmid, cout)


def down_forward(x_nchw, prep_arrays, dims):
    """Down.forward: MaxPool2d(2) -> Conv/BN/ReLU -> Conv/BN/ReLU (NCHW in/out)."""
    w1_t, g1, b1, w2_t, g2, b2 = prep_arrays
    cin, cmid, cout = dims
    n, _, h, w = x_nchw.shape
    hp, wp = h // 2, w // 2
    rp = n * (hp + 2) * (wp + 1)       # zero-bordered flat row count

    # glue (layout only, ~raw input size in bytes): the four 2x2-strided
    # pooling views in the kernel's zero-bordered flat row format (one zero
    # row above/below each image + one zero separator column per row).
    # TODO(synk): at production sizes form these views inside the kernel with
    # strided pl.ds reads of an NHWC input instead of this XLA transpose/pad.
    v = (x_nchw.reshape(n, cin, hp, 2, wp, 2)
         .transpose(3, 5, 0, 2, 4, 1))                        # (2,2,N,Hp,Wp,C)
    v = jnp.pad(v, ((0, 0), (0, 0), (0, 0), (1, 1), (0, 1), (0, 0)))
    slabs = v.reshape(4, rp, cin).astype(jnp.bfloat16)

    # (RP, 1) multiplicative valid-pixel mask (720 B at this shape).
    mask = (jnp.zeros((n, hp + 2, wp + 1), jnp.float32)
            .at[:, 1:1 + hp, :wp].set(1.0)
            .reshape(rp, 1))

    halo = _round_up(wp + 2, 8)        # sublane-aligned halo for shifted reads
    cbuf = max(cin, cmid)
    kernel = functools.partial(_down_fused_kernel, n=n, hp=hp, wp=wp,
                               cin=cin, cmid=cmid, halo=halo)

    # TODO(synk): for production UNet sizes switch to a row-tiled grid
    # (BlockSpec over rows, two-pass BN via per-channel sum/sumsq scratch,
    # "parallel" row axis for v7x megacore, per-generation vmem_limit_bytes,
    # tap-concatenated K=9*C contractions).  At this shape one fused
    # VMEM-resident call is fastest: single launch, no HBM round trips for the
    # pooled / mid activations.
    out = pl.pallas_call(
        kernel,
        out_shape=jax.ShapeDtypeStruct((rp, cout), x_nchw.dtype),
        in_specs=[_VMEM] * 8,
        out_specs=_VMEM,
        scratch_shapes=[pltpu.VMEM((rp + 2 * halo, cbuf), jnp.float32)],
    )(slabs, mask, w1_t, w2_t, g1, b1, g2, b2)

    # glue: drop the zero-border rows / separator column, back to NCHW.
    out = out.reshape(n, hp + 2, wp + 1, cout)[:, 1:1 + hp, :wp, :]
    return out.transpose(0, 3, 1, 2)


# ------------------------------- reference ---------------------------------- #

def _reference(x, params):
    w1, g1, b1, w2, g2, b2 = params
    n, c, h, w = x.shape
    p = x.reshape(n, c, h // 2, 2, w // 2, 2).max(axis=(3, 5))

    def conv_bn_relu(y, wt, g, b):
        z = jax.lax.conv_general_dilated(
            y, wt, (1, 1), 'SAME',
            dimension_numbers=('NCHW', 'OIHW', 'NCHW'),
            precision=jax.lax.Precision.HIGHEST)
        m = z.mean(axis=(0, 2, 3), keepdims=True)
        v = ((z - m) ** 2).mean(axis=(0, 2, 3), keepdims=True)
        z = (z - m) / jnp.sqrt(v + _EPS)
        z = z * g.reshape(1, -1, 1, 1) + b.reshape(1, -1, 1, 1)
        return jnp.maximum(z, 0.0)

    return conv_bn_relu(conv_bn_relu(p, w1, g1, b1), w2, g2, b2)


# --------------------------------- main -------------------------------------- #

if __name__ == "__main__":
    key = jax.random.PRNGKey(0)
    in_channels, out_channels = 4, 8
    mid_channels = out_channels
    n, h, w = 2, 16, 16
    k_x, k_w1, k_w2 = jax.random.split(key, 3)

    x = jax.random.normal(k_x, (n, in_channels, h, w), jnp.float32)

    def conv_init(k, cout, cin):
        # deterministic stand-in for PyTorch's kaiming-uniform conv init
        bound = 1.0 / (cin * 9) ** 0.5
        return jax.random.uniform(k, (cout, cin, 3, 3), jnp.float32, -bound, bound)

    w1 = conv_init(k_w1, mid_channels, in_channels)
    w2 = conv_init(k_w2, out_channels, mid_channels)
    g1 = jnp.ones((mid_channels,), jnp.float32)    # nn.BatchNorm2d default weight
    b1 = jnp.zeros((mid_channels,), jnp.float32)   # nn.BatchNorm2d default bias
    g2 = jnp.ones((out_channels,), jnp.float32)
    b2 = jnp.zeros((out_channels,), jnp.float32)
    params = (w1, g1, b1, w2, g2, b2)

    prep_arrays, dims = prepare_params(params)     # hoisted out of the fwd path
    fwd = jax.jit(functools.partial(down_forward, dims=dims))
    out = fwd(x, prep_arrays)
    out = jax.block_until_ready(out)

    assert out.shape == (n, out_channels, h // 2, w // 2), out.shape
    ref = _reference(x, params)
    # bf16 MXU operands (per perf review) vs the f32-HIGHEST reference ->
    # slightly wider tolerance than a pure-f32 kernel would need.
    assert jnp.allclose(out, ref, atol=3e-2, rtol=3e-2), float(
        jnp.max(jnp.abs(out - ref)))
    print("KERNEL_OK")
</pallas_src>

<mosaic_0001>
module attributes {stable_mosaic.version = 11 : i64} {
  func.func @_down_fused_kernel(%arg0: memref<4x180x4xbf16, #tpu.memory_space<vmem>>, %arg1: memref<180x1xf32, #tpu.memory_space<vmem>>, %arg2: memref<9x4x8xbf16, #tpu.memory_space<vmem>>, %arg3: memref<9x8x8xbf16, #tpu.memory_space<vmem>>, %arg4: memref<1x8xf32, #tpu.memory_space<vmem>>, %arg5: memref<1x8xf32, #tpu.memory_space<vmem>>, %arg6: memref<1x8xf32, #tpu.memory_space<vmem>>, %arg7: memref<1x8xf32, #tpu.memory_space<vmem>>, %arg8: memref<180x8xf32, #tpu.memory_space<vmem>>, %arg9: memref<212x8xf32, #tpu.memory_space<vmem>>) attributes {dimension_semantics = [], scalar_prefetch = 0 : i64, scratch_operands = 1 : i64, tpu.core_type = #tpu.core_type<tc>} {
    %c0 = arith.constant 0 : index
    %c0_0 = arith.constant 0 : index
    %c0_1 = arith.constant 0 : index
    %0 = vector.load %arg0[%c0, %c0_0, %c0_1] : memref<4x180x4xbf16, #tpu.memory_space<vmem>>, vector<1x180x4xbf16>
    %1 = vector.shape_cast %0 : vector<1x180x4xbf16> to vector<180x4xbf16>
    %2 = arith.extf %1 : vector<180x4xbf16> to vector<180x4xf32>
    %c1 = arith.constant 1 : index
    %c0_2 = arith.constant 0 : index
    %c0_3 = arith.constant 0 : index
    %3 = vector.load %arg0[%c1, %c0_2, %c0_3] : memref<4x180x4xbf16, #tpu.memory_space<vmem>>, vector<1x180x4xbf16>
    %4 = vector.shape_cast %3 : vector<1x180x4xbf16> to vector<180x4xbf16>
    %5 = arith.extf %4 : vector<180x4xbf16> to vector<180x4xf32>
    %6 = arith.maximumf %2, %5 : vector<180x4xf32>
    %c2 = arith.constant 2 : index
    %c0_4 = arith.constant 0 : index
    %c0_5 = arith.constant 0 : index
    %7 = vector.load %arg0[%c2, %c0_4, %c0_5] : memref<4x180x4xbf16, #tpu.memory_space<vmem>>, vector<1x180x4xbf16>
    %8 = vector.shape_cast %7 : vector<1x180x4xbf16> to vector<180x4xbf16>
    %9 = arith.extf %8 : vector<180x4xbf16> to vector<180x4xf32>
    %c3 = arith.constant 3 : index
    %c0_6 = arith.constant 0 : index
    %c0_7 = arith.constant 0 : index
    %10 = vector.load %arg0[%c3, %c0_6, %c0_7] : memref<4x180x4xbf16, #tpu.memory_space<vmem>>, vector<1x180x4xbf16>
    %11 = vector.shape_cast %10 : vector<1x180x4xbf16> to vector<180x4xbf16>
    %12 = arith.extf %11 : vector<180x4xbf16> to vector<180x4xf32>
    %13 = arith.maximumf %9, %12 : vector<180x4xf32>
    %14 = arith.maximumf %6, %13 : vector<180x4xf32>
    %c0_8 = arith.constant 0 : index
    %c0_9 = arith.constant 0 : index
    %15 = vector.load %arg1[%c0_8, %c0_9] : memref<180x1xf32, #tpu.memory_space<vmem>>, vector<180x1xf32>
    %cst = arith.constant 0.000000e+00 : f32
    %16 = vector.broadcast %cst : f32 to vector<16x8xf32>
    %c0_10 = arith.constant 0 : index
    %c0_11 = arith.constant 0 : index
    %17 = vector.load %arg9[%c0_10, %c0_11] : memref<212x8xf32, #tpu.memory_space<vmem>>, vector<16x8xf32>
    tpu.vector_store %arg9[%c0_10, %c0_11], %16 {strides = array<i32>} : memref<212x8xf32, #tpu.memory_space<vmem>>, vector<16x8xf32>,
    %cst_12 = arith.constant 0.000000e+00 : f32
    %18 = vector.broadcast %cst_12 : f32 to vector<16x8xf32>
    %c196 = arith.constant 196 : index
    %c0_13 = arith.constant 0 : index
    %19 = vector.load %arg9[%c196, %c0_13] : memref<212x8xf32, #tpu.memory_space<vmem>>, vector<16x8xf32>
    tpu.vector_store %arg9[%c196, %c0_13], %18 {strides = array<i32>} : memref<212x8xf32, #tpu.memory_space<vmem>>, vector<16x8xf32>,
    %c16 = arith.constant 16 : index
    %c0_14 = arith.constant 0 : index
    %20 = vector.load %arg9[%c16, %c0_14] : memref<212x8xf32, #tpu.memory_space<vmem>>, vector<180x4xf32>
    tpu.vector_store %arg9[%c16, %c0_14], %14 {strides = array<i32>} : memref<212x8xf32, #tpu.memory_space<vmem>>, vector<180x4xf32>,
    %cst_15 = arith.constant 0.000000e+00 : f32
    %21 = vector.broadcast %cst_15 : f32 to vector<180x8xf32>
    %c6 = arith.constant 6 : index
    %c0_16 = arith.constant 0 : index
    %22 = vector.load %arg9[%c6, %c0_16] : memref<212x8xf32, #tpu.memory_space<vmem>>, vector<180x4xf32>
    %23 = arith.truncf %22 : vector<180x4xf32> to vector<180x4xbf16>
    %c0_17 = arith.constant 0 : index
    %c0_18 = arith.constant 0 : index
    %c0_19 = arith.constant 0 : index
    %24 = vector.load %arg2[%c0_17, %c0_18, %c0_19] : memref<9x4x8xbf16, #tpu.memory_space<vmem>>, vector<1x4x8xbf16>
    %25 = vector.shape_cast %24 : vector<1x4x8xbf16> to vector<4x8xbf16>
    %cst_20 = arith.constant dense<0.000000e+00> : vector<180x8xf32>
    %26 = tpu.matmul %23, %25, %cst_20 {dimension_numbers = #tpu.dot_dimension_numbers<[1], [0], [0], [1], [0, 0, 1, 1], [], []>} : vector<180x4xbf16>, vector<4x8xbf16>, vector<180x8xf32> -> vector<180x8xf32>
    %27 = arith.addf %21, %26 : vector<180x8xf32>
    %c7 = arith.constant 7 : index
    %c0_21 = arith.constant 0 : index
    %28 = vector.load %arg9[%c7, %c0_21] : memref<212x8xf32, #tpu.memory_space<vmem>>, vector<180x4xf32>
    %29 = arith.truncf %28 : vector<180x4xf32> to vector<180x4xbf16>
    %c1_22 = arith.constant 1 : index
    %c0_23 = arith.constant 0 : index
    %c0_24 = arith.constant 0 : index
    %30 = vector.load %arg2[%c1_22, %c0_23, %c0_24] : memref<9x4x8xbf16, #tpu.memory_space<vmem>>, vector<1x4x8xbf16>
    %31 = vector.shape_cast %30 : vector<1x4x8xbf16> to vector<4x8xbf16>
    %cst_25 = arith.constant dense<0.000000e+00> : vector<180x8xf32>
    %32 = tpu.matmul %29, %31, %cst_25 {dimension_numbers = #tpu.dot_dimension_numbers<[1], [0], [0], [1], [0, 0, 1, 1], [], []>} : vector<180x4xbf16>, vector<4x8xbf16>, vector<180x8xf32> -> vector<180x8xf32>
    %33 = arith.addf %27, %32 : vector<180x8xf32>
    %c8 = arith.constant 8 : index
    %c0_26 = arith.constant 0 : index
    %34 = vector.load %arg9[%c8, %c0_26] : memref<212x8xf32, #tpu.memory_space<vmem>>, vector<180x4xf32>
    %35 = arith.truncf %34 : vector<180x4xf32> to vector<180x4xbf16>
    %c2_27 = arith.constant 2 : index
    %c0_28 = arith.constant 0 : index
    %c0_29 = arith.constant 0 : index
    %36 = vector.load %arg2[%c2_27, %c0_28, %c0_29] : memref<9x4x8xbf16, #tpu.memory_space<vmem>>, vector<1x4x8xbf16>
    %37 = vector.shape_cast %36 : vector<1x4x8xbf16> to vector<4x8xbf16>
    %cst_30 = arith.constant dense<0.000000e+00> : vector<180x8xf32>
    %38 = tpu.matmul %35, %37, %cst_30 {dimension_numbers = #tpu.dot_dimension_numbers<[1], [0], [0], [1], [0, 0, 1, 1], [], []>} : vector<180x4xbf16>, vector<4x8xbf16>, vector<180x8xf32> -> vector<180x8xf32>
    %39 = arith.addf %33, %38 : vector<180x8xf32>
    %c15 = arith.constant 15 : index
    %c0_31 = arith.constant 0 : index
    %40 = vector.load %arg9[%c15, %c0_31] : memref<212x8xf32, #tpu.memory_space<vmem>>, vector<180x4xf32>
    %41 = arith.truncf %40 : vector<180x4xf32> to vector<180x4xbf16>
    %c3_32 = arith.constant 3 : index
    %c0_33 = arith.constant 0 : index
    %c0_34 = arith.constant 0 : index
    %42 = vector.load %arg2[%c3_32, %c0_33, %c0_34] : memref<9x4x8xbf16, #tpu.memory_space<vmem>>, vector<1x4x8xbf16>
    %43 = vector.shape_cast %42 : vector<1x4x8xbf16> to vector<4x8xbf16>
    %cst_35 = arith.constant dense<0.000000e+00> : vector<180x8xf32>
    %44 = tpu.matmul %41, %43, %cst_35 {dimension_numbers = #tpu.dot_dimension_numbers<[1], [0], [0], [1], [0, 0, 1, 1], [], []>} : vector<180x4xbf16>, vector<4x8xbf16>, vector<180x8xf32> -> vector<180x8xf32>
    %45 = arith.addf %39, %44 : vector<180x8xf32>
    %c16_36 = arith.constant 16 : index
    %c0_37 = arith.constant 0 : index
    %46 = vector.load %arg9[%c16_36, %c0_37] : memref<212x8xf32, #tpu.memory_space<vmem>>, vector<180x4xf32>
    %47 = arith.truncf %46 : vector<180x4xf32> to vector<180x4xbf16>
    %c4 = arith.constant 4 : index
    %c0_38 = arith.constant 0 : index
    %c0_39 = arith.constant 0 : index
    %48 = vector.load %arg2[%c4, %c0_38, %c0_39] : memref<9x4x8xbf16, #tpu.memory_space<vmem>>, vector<1x4x8xbf16>
    %49 = vector.shape_cast %48 : vector<1x4x8xbf16> to vector<4x8xbf16>
    %cst_40 = arith.constant dense<0.000000e+00> : vector<180x8xf32>
    %50 = tpu.matmul %47, %49, %cst_40 {dimension_numbers = #tpu.dot_dimension_numbers<[1], [0], [0], [1], [0, 0, 1, 1], [], []>} : vector<180x4xbf16>, vector<4x8xbf16>, vector<180x8xf32> -> vector<180x8xf32>
    %51 = arith.addf %45, %50 : vector<180x8xf32>
    %c17 = arith.constant 17 : index
    %c0_41 = arith.constant 0 : index
    %52 = vector.load %arg9[%c17, %c0_41] : memref<212x8xf32, #tpu.memory_space<vmem>>, vector<180x4xf32>
    %53 = arith.truncf %52 : vector<180x4xf32> to vector<180x4xbf16>
    %c5 = arith.constant 5 : index
    %c0_42 = arith.constant 0 : index
    %c0_43 = arith.constant 0 : index
    %54 = vector.load %arg2[%c5, %c0_42, %c0_43] : memref<9x4x8xbf16, #tpu.memory_space<vmem>>, vector<1x4x8xbf16>
    %55 = vector.shape_cast %54 : vector<1x4x8xbf16> to vector<4x8xbf16>
    %cst_44 = arith.constant dense<0.000000e+00> : vector<180x8xf32>
    %56 = tpu.matmul %53, %55, %cst_44 {dimension_numbers = #tpu.dot_dimension_numbers<[1], [0], [0], [1], [0, 0, 1, 1], [], []>} : vector<180x4xbf16>, vector<4x8xbf16>, vector<180x8xf32> -> vector<180x8xf32>
    %57 = arith.addf %51, %56 : vector<180x8xf32>
    %c24 = arith.constant 24 : index
    %c0_45 = arith.constant 0 : index
    %58 = vector.load %arg9[%c24, %c0_45] : memref<212x8xf32, #tpu.memory_space<vmem>>, vector<180x4xf32>
    %59 = arith.truncf %58 : vector<180x4xf32> to vector<180x4xbf16>
    %c6_46 = arith.constant 6 : index
    %c0_47 = arith.constant 0 : index
    %c0_48 = arith.constant 0 : index
    %60 = vector.load %arg2[%c6_46, %c0_47, %c0_48] : memref<9x4x8xbf16, #tpu.memory_space<vmem>>, vector<1x4x8xbf16>
    %61 = vector.shape_cast %60 : vector<1x4x8xbf16> to vector<4x8xbf16>
    %cst_49 = arith.constant dense<0.000000e+00> : vector<180x8xf32>
    %62 = tpu.matmul %59, %61, %cst_49 {dimension_numbers = #tpu.dot_dimension_numbers<[1], [0], [0], [1], [0, 0, 1, 1], [], []>} : vector<180x4xbf16>, vector<4x8xbf16>, vector<180x8xf32> -> vector<180x8xf32>
    %63 = arith.addf %57, %62 : vector<180x8xf32>
    %c25 = arith.constant 25 : index
    %c0_50 = arith.constant 0 : index
    %64 = vector.load %arg9[%c25, %c0_50] : memref<212x8xf32, #tpu.memory_space<vmem>>, vector<180x4xf32>
    %65 = arith.truncf %64 : vector<180x4xf32> to vector<180x4xbf16>
    %c7_51 = arith.constant 7 : index
    %c0_52 = arith.constant 0 : index
    %c0_53 = arith.constant 0 : index
    %66 = vector.load %arg2[%c7_51, %c0_52, %c0_53] : memref<9x4x8xbf16, #tpu.memory_space<vmem>>, vector<1x4x8xbf16>
    %67 = vector.shape_cast %66 : vector<1x4x8xbf16> to vector<4x8xbf16>
    %cst_54 = arith.constant dense<0.000000e+00> : vector<180x8xf32>
    %68 = tpu.matmul %65, %67, %cst_54 {dimension_numbers = #tpu.dot_dimension_numbers<[1], [0], [0], [1], [0, 0, 1, 1], [], []>} : vector<180x4xbf16>, vector<4x8xbf16>, vector<180x8xf32> -> vector<180x8xf32>
    %69 = arith.addf %63, %68 : vector<180x8xf32>
    %c26 = arith.constant 26 : index
    %c0_55 = arith.constant 0 : index
    %70 = vector.load %arg9[%c26, %c0_55] : memref<212x8xf32, #tpu.memory_space<vmem>>, vector<180x4xf32>
    %71 = arith.truncf %70 : vector<180x4xf32> to vector<180x4xbf16>
    %c8_56 = arith.constant 8 : index
    %c0_57 = arith.constant 0 : index
    %c0_58 = arith.constant 0 : index
    %72 = vector.load %arg2[%c8_56, %c0_57, %c0_58] : memref<9x4x8xbf16, #tpu.memory_space<vmem>>, vector<1x4x8xbf16>
    %73 = vector.shape_cast %72 : vector<1x4x8xbf16> to vector<4x8xbf16>
    %cst_59 = arith.constant dense<0.000000e+00> : vector<180x8xf32>
    %74 = tpu.matmul %71, %73, %cst_59 {dimension_numbers = #tpu.dot_dimension_numbers<[1], [0], [0], [1], [0, 0, 1, 1], [], []>} : vector<180x4xbf16>, vector<4x8xbf16>, vector<180x8xf32> -> vector<180x8xf32>
    %75 = arith.addf %69, %74 : vector<180x8xf32>
    %76 = vector.broadcast %15 : vector<180x1xf32> to vector<180x8xf32>
    %77 = arith.mulf %75, %76 : vector<180x8xf32>
    %cst_60 = arith.constant dense<0.000000e+00> : vector<8xf32>
    %78 = vector.multi_reduction <add>, %77, %cst_60 [0] : vector<180x8xf32> to vector<8xf32>
    %79 = vector.shape_cast %78 : vector<8xf32> to vector<1x8xf32>
    %cst_61 = arith.constant 7.812500e-03 : f32
    %80 = vector.broadcast %cst_61 : f32 to vector<1x8xf32>
    %81 = arith.mulf %79, %80 : vector<1x8xf32>
    %82 = arith.mulf %77, %77 : vector<180x8xf32>
    %cst_62 = arith.constant dense<0.000000e+00> : vector<8xf32>
    %83 = vector.multi_reduction <add>, %82, %cst_62 [0] : vector<180x8xf32> to vector<8xf32>
    %84 = vector.shape_cast %83 : vector<8xf32> to vector<1x8xf32>
    %cst_63 = arith.constant 7.812500e-03 : f32
    %85 = vector.broadcast %cst_63 : f32 to vector<1x8xf32>
    %86 = arith.mulf %84, %85 : vector<1x8xf32>
    %87 = arith.mulf %81, %81 : vector<1x8xf32>
    %88 = arith.subf %86, %87 : vector<1x8xf32>
    %c0_64 = arith.constant 0 : index
    %c0_65 = arith.constant 0 : index
    %89 = vector.load %arg4[%c0_64, %c0_65] : memref<1x8xf32, #tpu.memory_space<vmem>>, vector<1x8xf32>
    %cst_66 = arith.constant 9.99999974E-6 : f32
    %90 = vector.broadcast %cst_66 : f32 to vector<1x8xf32>
    %91 = arith.addf %88, %90 : vector<1x8xf32>
    %92 = math.rsqrt %91 : vector<1x8xf32>
    %93 = arith.mulf %89, %92 : vector<1x8xf32>
    %c0_67 = arith.constant 0 : index
    %c0_68 = arith.constant 0 : index
    %94 = vector.load %arg5[%c0_67, %c0_68] : memref<1x8xf32, #tpu.memory_space<vmem>>, vector<1x8xf32>
    %95 = arith.mulf %81, %93 : vector<1x8xf32>
    %96 = arith.subf %94, %95 : vector<1x8xf32>
    %97 = vector.broadcast %93 : vector<1x8xf32> to vector<180x8xf32>
    %98 = arith.mulf %75, %97 : vector<180x8xf32>
    %99 = vector.broadcast %96 : vector<1x8xf32> to vector<180x8xf32>
    %100 = arith.addf %98, %99 : vector<180x8xf32>
    %cst_69 = arith.constant 0.000000e+00 : f32
    %101 = vector.broadcast %cst_69 : f32 to vector<180x8xf32>
    %102 = arith.maximumf %100, %101 : vector<180x8xf32>
    %103 = vector.broadcast %15 : vector<180x1xf32> to vector<180x8xf32>
    %104 = arith.mulf %103, %102 : vector<180x8xf32>
    %c16_70 = arith.constant 16 : index
    %c0_71 = arith.constant 0 : index
    %105 = vector.load %arg9[%c16_70, %c0_71] : memref<212x8xf32, #tpu.memory_space<vmem>>, vector<180x8xf32>
    tpu.vector_store %arg9[%c16_70, %c0_71], %104 {strides = array<i32>} : memref<212x8xf32, #tpu.memory_space<vmem>>, vector<180x8xf32>,
    %cst_72 = arith.constant 0.000000e+00 : f32
    %106 = vector.broadcast %cst_72 : f32 to vector<180x8xf32>
    %c6_73 = arith.constant 6 : index
    %c0_74 = arith.constant 0 : index
    %107 = vector.load %arg9[%c6_73, %c0_74] : memref<212x8xf32, #tpu.memory_space<vmem>>, vector<180x8xf32>
    %108 = arith.truncf %107 : vector<180x8xf32> to vector<180x8xbf16>
    %c0_75 = arith.constant 0 : index
    %c0_76 = arith.constant 0 : index
    %c0_77 = arith.constant 0 : index
    %109 = vector.load %arg3[%c0_75, %c0_76, %c0_77] : memref<9x8x8xbf16, #tpu.memory_space<vmem>>, vector<1x8x8xbf16>
    %110 = vector.shape_cast %109 : vector<1x8x8xbf16> to vector<8x8xbf16>
    %cst_78 = arith.constant dense<0.000000e+00> : vector<180x8xf32>
    %111 = tpu.matmul %108, %110, %cst_78 {dimension_numbers = #tpu.dot_dimension_numbers<[1], [0], [0], [1], [0, 0, 1, 1], [], []>} : vector<180x8xbf16>, vector<8x8xbf16>, vector<180x8xf32> -> vector<180x8xf32>
    %112 = arith.addf %106, %111 : vector<180x8xf32>
    %c7_79 = arith.constant 7 : index
    %c0_80 = arith.constant 0 : index
    %113 = vector.load %arg9[%c7_79, %c0_80] : memref<212x8xf32, #tpu.memory_space<vmem>>, vector<180x8xf32>
    %114 = arith.truncf %113 : vector<180x8xf32> to vector<180x8xbf16>
    %c1_81 = arith.constant 1 : index
    %c0_82 = arith.constant 0 : index
    %c0_83 = arith.constant 0 : index
    %115 = vector.load %arg3[%c1_81, %c0_82, %c0_83] : memref<9x8x8xbf16, #tpu.memory_space<vmem>>, vector<1x8x8xbf16>
    %116 = vector.shape_cast %115 : vector<1x8x8xbf16> to vector<8x8xbf16>
    %cst_84 = arith.constant dense<0.000000e+00> : vector<180x8xf32>
    %117 = tpu.matmul %114, %116, %cst_84 {dimension_numbers = #tpu.dot_dimension_numbers<[1], [0], [0], [1], [0, 0, 1, 1], [], []>} : vector<180x8xbf16>, vector<8x8xbf16>, vector<180x8xf32> -> vector<180x8xf32>
    %118 = arith.addf %112, %117 : vector<180x8xf32>
    %c8_85 = arith.constant 8 : index
    %c0_86 = arith.constant 0 : index
    %119 = vector.load %arg9[%c8_85, %c0_86] : memref<212x8xf32, #tpu.memory_space<vmem>>, vector<180x8xf32>
    %120 = arith.truncf %119 : vector<180x8xf32> to vector<180x8xbf16>
    %c2_87 = arith.constant 2 : index
    %c0_88 = arith.constant 0 : index
    %c0_89 = arith.constant 0 : index
    %121 = vector.load %arg3[%c2_87, %c0_88, %c0_89] : memref<9x8x8xbf16, #tpu.memory_space<vmem>>, vector<1x8x8xbf16>
    %122 = vector.shape_cast %121 : vector<1x8x8xbf16> to vector<8x8xbf16>
    %cst_90 = arith.constant dense<0.000000e+00> : vector<180x8xf32>
    %123 = tpu.matmul %120, %122, %cst_90 {dimension_numbers = #tpu.dot_dimension_numbers<[1], [0], [0], [1], [0, 0, 1, 1], [], []>} : vector<180x8xbf16>, vector<8x8xbf16>, vector<180x8xf32> -> vector<180x8xf32>
    %124 = arith.addf %118, %123 : vector<180x8xf32>
    %c15_91 = arith.constant 15 : index
    %c0_92 = arith.constant 0 : index
    %125 = vector.load %arg9[%c15_91, %c0_92] : memref<212x8xf32, #tpu.memory_space<vmem>>, vector<180x8xf32>
    %126 = arith.truncf %125 : vector<180x8xf32> to vector<180x8xbf16>
    %c3_93 = arith.constant 3 : index
    %c0_94 = arith.constant 0 : index
    %c0_95 = arith.constant 0 : index
    %127 = vector.load %arg3[%c3_93, %c0_94, %c0_95] : memref<9x8x8xbf16, #tpu.memory_space<vmem>>, vector<1x8x8xbf16>
    %128 = vector.shape_cast %127 : vector<1x8x8xbf16> to vector<8x8xbf16>
    %cst_96 = arith.constant dense<0.000000e+00> : vector<180x8xf32>
    %129 = tpu.matmul %126, %128, %cst_96 {dimension_numbers = #tpu.dot_dimension_numbers<[1], [0], [0], [1], [0, 0, 1, 1], [], []>} : vector<180x8xbf16>, vector<8x8xbf16>, vector<180x8xf32> -> vector<180x8xf32>
    %130 = arith.addf %124, %129 : vector<180x8xf32>
    %c16_97 = arith.constant 16 : index
    %c0_98 = arith.constant 0 : index
    %131 = vector.load %arg9[%c16_97, %c0_98] : memref<212x8xf32, #tpu.memory_space<vmem>>, vector<180x8xf32>
    %132 = arith.truncf %131 : vector<180x8xf32> to vector<180x8xbf16>
    %c4_99 = arith.constant 4 : index
    %c0_100 = arith.constant 0 : index
    %c0_101 = arith.constant 0 : index
    %133 = vector.load %arg3[%c4_99, %c0_100, %c0_101] : memref<9x8x8xbf16, #tpu.memory_space<vmem>>, vector<1x8x8xbf16>
    %134 = vector.shape_cast %133 : vector<1x8x8xbf16> to vector<8x8xbf16>
    %cst_102 = arith.constant dense<0.000000e+00> : vector<180x8xf32>
    %135 = tpu.matmul %132, %134, %cst_102 {dimension_numbers = #tpu.dot_dimension_numbers<[1], [0], [0], [1], [0, 0, 1, 1], [], []>} : vector<180x8xbf16>, vector<8x8xbf16>, vector<180x8xf32> -> vector<180x8xf32>
    %136 = arith.addf %130, %135 : vector<180x8xf32>
    %c17_103 = arith.constant 17 : index
    %c0_104 = arith.constant 0 : index
    %137 = vector.load %arg9[%c17_103, %c0_104] : memref<212x8xf32, #tpu.memory_space<vmem>>, vector<180x8xf32>
    %138 = arith.truncf %137 : vector<180x8xf32> to vector<180x8xbf16>
    %c5_105 = arith.constant 5 : index
    %c0_106 = arith.constant 0 : index
    %c0_107 = arith.constant 0 : index
    %139 = vector.load %arg3[%c5_105, %c0_106, %c0_107] : memref<9x8x8xbf16, #tpu.memory_space<vmem>>, vector<1x8x8xbf16>
    %140 = vector.shape_cast %139 : vector<1x8x8xbf16> to vector<8x8xbf16>
    %cst_108 = arith.constant dense<0.000000e+00> : vector<180x8xf32>
    %141 = tpu.matmul %138, %140, %cst_108 {dimension_numbers = #tpu.dot_dimension_numbers<[1], [0], [0], [1], [0, 0, 1, 1], [], []>} : vector<180x8xbf16>, vector<8x8xbf16>, vector<180x8xf32> -> vector<180x8xf32>
    %142 = arith.addf %136, %141 : vector<180x8xf32>
    %c24_109 = arith.constant 24 : index
    %c0_110 = arith.constant 0 : index
    %143 = vector.load %arg9[%c24_109, %c0_110] : memref<212x8xf32, #tpu.memory_space<vmem>>, vector<180x8xf32>
    %144 = arith.truncf %143 : vector<180x8xf32> to vector<180x8xbf16>
    %c6_111 = arith.constant 6 : index
    %c0_112 = arith.constant 0 : index
    %c0_113 = arith.constant 0 : index
    %145 = vector.load %arg3[%c6_111, %c0_112, %c0_113] : memref<9x8x8xbf16, #tpu.memory_space<vmem>>, vector<1x8x8xbf16>
    %146 = vector.shape_cast %145 : vector<1x8x8xbf16> to vector<8x8xbf16>
    %cst_114 = arith.constant dense<0.000000e+00> : vector<180x8xf32>
    %147 = tpu.matmul %144, %146, %cst_114 {dimension_numbers = #tpu.dot_dimension_numbers<[1], [0], [0], [1], [0, 0, 1, 1], [], []>} : vector<180x8xbf16>, vector<8x8xbf16>, vector<180x8xf32> -> vector<180x8xf32>
    %148 = arith.addf %142, %147 : vector<180x8xf32>
    %c25_115 = arith.constant 25 : index
    %c0_116 = arith.constant 0 : index
    %149 = vector.load %arg9[%c25_115, %c0_116] : memref<212x8xf32, #tpu.memory_space<vmem>>, vector<180x8xf32>
    %150 = arith.truncf %149 : vector<180x8xf32> to vector<180x8xbf16>
    %c7_117 = arith.constant 7 : index
    %c0_118 = arith.constant 0 : index
    %c0_119 = arith.constant 0 : index
    %151 = vector.load %arg3[%c7_117, %c0_118, %c0_119] : memref<9x8x8xbf16, #tpu.memory_space<vmem>>, vector<1x8x8xbf16>
    %152 = vector.shape_cast %151 : vector<1x8x8xbf16> to vector<8x8xbf16>
    %cst_120 = arith.constant dense<0.000000e+00> : vector<180x8xf32>
    %153 = tpu.matmul %150, %152, %cst_120 {dimension_numbers = #tpu.dot_dimension_numbers<[1], [0], [0], [1], [0, 0, 1, 1], [], []>} : vector<180x8xbf16>, vector<8x8xbf16>, vector<180x8xf32> -> vector<180x8xf32>
    %154 = arith.addf %148, %153 : vector<180x8xf32>
    %c26_121 = arith.constant 26 : index
    %c0_122 = arith.constant 0 : index
    %155 = vector.load %arg9[%c26_121, %c0_122] : memref<212x8xf32, #tpu.memory_space<vmem>>, vector<180x8xf32>
    %156 = arith.truncf %155 : vector<180x8xf32> to vector<180x8xbf16>
    %c8_123 = arith.constant 8 : index
    %c0_124 = arith.constant 0 : index
    %c0_125 = arith.constant 0 : index
    %157 = vector.load %arg3[%c8_123, %c0_124, %c0_125] : memref<9x8x8xbf16, #tpu.memory_space<vmem>>, vector<1x8x8xbf16>
    %158 = vector.shape_cast %157 : vector<1x8x8xbf16> to vector<8x8xbf16>
    %cst_126 = arith.constant dense<0.000000e+00> : vector<180x8xf32>
    %159 = tpu.matmul %156, %158, %cst_126 {dimension_numbers = #tpu.dot_dimension_numbers<[1], [0], [0], [1], [0, 0, 1, 1], [], []>} : vector<180x8xbf16>, vector<8x8xbf16>, vector<180x8xf32> -> vector<180x8xf32>
    %160 = arith.addf %154, %159 : vector<180x8xf32>
    %161 = vector.broadcast %15 : vector<180x1xf32> to vector<180x8xf32>
    %162 = arith.mulf %160, %161 : vector<180x8xf32>
    %cst_127 = arith.constant dense<0.000000e+00> : vector<8xf32>
    %163 = vector.multi_reduction <add>, %162, %cst_127 [0] : vector<180x8xf32> to vector<8xf32>
    %164 = vector.shape_cast %163 : vector<8xf32> to vector<1x8xf32>
    %cst_128 = arith.constant 7.812500e-03 : f32
    %165 = vector.broadcast %cst_128 : f32 to vector<1x8xf32>
    %166 = arith.mulf %164, %165 : vector<1x8xf32>
    %167 = arith.mulf %162, %162 : vector<180x8xf32>
    %cst_129 = arith.constant dense<0.000000e+00> : vector<8xf32>
    %168 = vector.multi_reduction <add>, %167, %cst_129 [0] : vector<180x8xf32> to vector<8xf32>
    %169 = vector.shape_cast %168 : vector<8xf32> to vector<1x8xf32>
    %cst_130 = arith.constant 7.812500e-03 : f32
    %170 = vector.broadcast %cst_130 : f32 to vector<1x8xf32>
    %171 = arith.mulf %169, %170 : vector<1x8xf32>
    %172 = arith.mulf %166, %166 : vector<1x8xf32>
    %173 = arith.subf %171, %172 : vector<1x8xf32>
    %c0_131 = arith.constant 0 : index
    %c0_132 = arith.constant 0 : index
    %174 = vector.load %arg6[%c0_131, %c0_132] : memref<1x8xf32, #tpu.memory_space<vmem>>, vector<1x8xf32>
    %cst_133 = arith.constant 9.99999974E-6 : f32
    %175 = vector.broadcast %cst_133 : f32 to vector<1x8xf32>
    %176 = arith.addf %173, %175 : vector<1x8xf32>
    %177 = math.rsqrt %176 : vector<1x8xf32>
    %178 = arith.mulf %174, %177 : vector<1x8xf32>
    %c0_134 = arith.constant 0 : index
    %c0_135 = arith.constant 0 : index
    %179 = vector.load %arg7[%c0_134, %c0_135] : memref<1x8xf32, #tpu.memory_space<vmem>>, vector<1x8xf32>
    %180 = arith.mulf %166, %178 : vector<1x8xf32>
    %181 = arith.subf %179, %180 : vector<1x8xf32>
    %182 = vector.broadcast %178 : vector<1x8xf32> to vector<180x8xf32>
    %183 = arith.mulf %160, %182 : vector<180x8xf32>
    %184 = vector.broadcast %181 : vector<1x8xf32> to vector<180x8xf32>
    %185 = arith.addf %183, %184 : vector<180x8xf32>
    %cst_136 = arith.constant 0.000000e+00 : f32
    %186 = vector.broadcast %cst_136 : f32 to vector<180x8xf32>
    %187 = arith.maximumf %185, %186 : vector<180x8xf32>
    %c0_137 = arith.constant 0 : index
    %c0_138 = arith.constant 0 : index
    %188 = vector.load %arg8[%c0_137, %c0_138] : memref<180x8xf32, #tpu.memory_space<vmem>>, vector<180x8xf32>
    tpu.vector_store %arg8[%c0_137, %c0_138], %187 {strides = array<i32>} : memref<180x8xf32, #tpu.memory_space<vmem>>, vector<180x8xf32>,
    return
  }
}

</mosaic_0001>

<bundles_post_ra>
// kernel: down_forward.1
= control target key start
LH: loop header
LB: loop body
LE: loop exit
PB: predicated region body
PF: predicated region fallthrough
CT: control target
= control target key end

     0   :  { %vm448_vm0 = vcmask 1041408   ;;  %vm309_vm1 = vcmask 64512   ;;  %v6624_v3 = vmov 0.0   ;;  %vm314_vm2 = vcmask 31744   ;;  %s8487_s2 = inlined_call_operand.vmem [shape: bf16[9,4,8], index: 2, kind: input, shape index: {}]   ;;  %s8488_s0 = inlined_call_operand.vmem [shape: bf16[4,180,4], index: 0, kind: input, shape index: {}]   ;;  %s8489_s1 = inlined_call_operand.vmem [shape: f32[180,1], index: 1, kind: input, shape index: {}]   ;;  %s8490_s3 = inlined_call_operand.vmem [shape: bf16[9,8,8], index: 3, kind: input, shape index: {}]   ;;  %s8491_s4 = inlined_call_operand.vmem [shape: f32[1,8], index: 4, kind: input, shape index: {}]   ;;  %s8492_s5 = inlined_call_operand.vmem [shape: f32[1,8], index: 5, kind: input, shape index: {}]   ;;  %s8493_s6 = inlined_call_operand.vmem [shape: f32[1,8], index: 6, kind: input, shape index: {}]   ;;  %s8494_s7 = inlined_call_operand.vmem [shape: f32[1,8], index: 7, kind: input, shape index: {}]   ;;  %s8495_s8 = inlined_call_operand.vmem [shape: f32[180,8], index: 8, kind: output, shape index: {}]  }
   0x1   :  { %v5071_v0 = vld [vmem:[%s8487_s2 + $0x2] sm:$0x3]  ;;  %v5002_v2 = vld [vmem:[%s8488_s0 + $0x5c] ss:$184 sps:$4 sm:$0xff]   ;;  %310 = vst.msk [vmem:[#allocation2] sm:$0xff] %vm309_vm1, %v6624_v3  ;;  %311 = vst.msk [vmem:[#allocation2 + $0x8] sm:$0xff] %vm309_vm1, %v6624_v3 }
   0x2   :  { %v5304_v1 = vld [vmem:[%s8488_s0] sm:$0xff]   ;;  %312 = vst.msk [vmem:[#allocation2 + $0xc4] sm:$0xff] %vm309_vm1, %v6624_v3  ;;  %313 = vst.msk [vmem:[#allocation2 + $0xcc] sm:$0xff] %vm309_vm1, %v6624_v3  ;;  %6598 = vmatprep.subr.msk.bf16.mxu0 %vm448_vm0, %v5071_v0  ;;  %v450_v4 = vsel %vm448_vm0, %v5071_v0, 0  ;;  %v100_v8 = vunpack.c.l.bf16 %v5002_v2  ;;  %v5491_v9 = vld [vmem:[%s8488_s0 + $0xb8] sm:$0xff]   ;;  %v217_v19 = vunpack.c.h.bf16 %v5002_v2  ;;  %vm337_vm3 = vcmask 27648  }
   0x3   :  { %v5305_v5 = vunpack.c.l.bf16 %v5304_v1  ;;  %v5306_v6 = vunpack.c.h.bf16 %v5304_v1  ;;  %v5481_v7 = vld [vmem:[%s8488_s0 + $0x60] sm:$0xff]   ;;  %v5502_v10 = vld [vmem:[%s8488_s0 + $0x118] sm:$0xff]   ;;  %5747 = vmatpush3.bf16.msra.mxu0 %v450_v4  ;;  %v5389_v12 = vunpack.c.l.bf16 %v5491_v9  ;;  %v5390_v13 = vunpack.c.h.bf16 %v5491_v9  ;;  %v5471_v16 = vld [vmem:[%s8488_s0 + $0x8] sm:$0xff]  }
   0x4   :  { %v5349_v11 = vunpack.c.l.bf16 %v5481_v7  ;;  %v5433_v14 = vunpack.c.l.bf16 %v5502_v10  ;;  %v374_v15 = vld [vmem:[%s8487_s2] sm:$0x3]  ;;  %v5309_v20 = vunpack.c.l.bf16 %v5471_v16  ;;  %v5350_v21 = vunpack.c.h.bf16 %v5481_v7  ;;  %v5472_v22 = vld [vmem:[%s8488_s0 + $0x10] sm:$0xff]   ;;  %v5482_v23 = vld [vmem:[%s8488_s0 + $0x68] sm:$0xff]  }
   0x5   :  { %v5492_v17 = vld [vmem:[%s8488_s0 + $0xc0] sm:$0xff]   ;;  %v123_v18 = vmax.f32 %v5305_v5, %v100_v8  ;;  %6599 = vmatprep.subr.msk.bf16.mxu0 %vm448_vm0, %v374_v15  ;;  %v5434_v27 = vunpack.c.h.bf16 %v5502_v10  ;;  %v5493_v28 = vld [vmem:[%s8488_s0 + $0xc8] sm:$0xff]   ;;  %v240_v29 = vmax.f32 %v5389_v12, %v217_v19  ;;  %v6715_v31 = vsel %vm448_vm0, %v374_v15, 0  ;;  %v5473_v38 = vld [vmem:[%s8488_s0 + $0x18] sm:$0xff]  }
   0x6   :  { %v124_v24 = vmax.f32 %v5306_v6, %v5349_v11  ;;  %v241_v25 = vmax.f32 %v5390_v13, %v5433_v14  ;;  %v5393_v26 = vunpack.c.l.bf16 %v5492_v17  ;;  %v125_v30 = vmax.f32 %v5309_v20, %v5350_v21  ;;  %v5503_v33 = vld [vmem:[%s8488_s0 + $0x120] sm:$0xff]   ;;  %v5483_v39 = vld [vmem:[%s8488_s0 + $0x70] sm:$0xff]   ;;  %v5504_v49 = vld [vmem:[%s8488_s0 + $0x128] sm:$0xff]  }
   0x7   :  { %v5310_v32 = vunpack.c.h.bf16 %v5471_v16  ;;  %v5313_v36 = vunpack.c.l.bf16 %v5472_v22  ;;  %v5353_v37 = vunpack.c.l.bf16 %v5482_v23  ;;  %v263_v40 = vmax.f32 %v123_v18, %v240_v29  ;;  %v5494_v48 = vld [vmem:[%s8488_s0 + $0xd0] sm:$0xff]   ;;  %v5474_v58 = vld [vmem:[%s8488_s0 + $0x20] sm:$0xff]   ;;  %v5484_v59 = vld [vmem:[%s8488_s0 + $0x78] sm:$0xff]  }
   0x8   :  { %v242_v34 = vmax.f32 %v5393_v26, %v5434_v27  ;;  %v264_v35 = vmax.f32 %v124_v24, %v241_v25  ;;  %v5354_v41 = vunpack.c.h.bf16 %v5482_v23  ;;  %v5394_v42 = vunpack.c.h.bf16 %v5492_v17  ;;  %v6744_v0 = vld [vmem:[%s8488_s0 + $0xd8] sm:$0xff]   ;;  %v5505_v1 = vld [vmem:[%s8488_s0 + $0x130] sm:$0xff]   ;;  %v5475_v10 = vld [vmem:[%s8488_s0 + $0x28] sm:$0xff]  }
   0x9   :  { %v5397_v43 = vunpack.c.l.bf16 %v5493_v28  ;;  %v126_v45 = vmax.f32 %v5310_v32, %v5353_v37  ;;  %v5437_v46 = vunpack.c.l.bf16 %v5503_v33  ;;  %v5438_v47 = vunpack.c.h.bf16 %v5503_v33  ;;  %315 = vst.msk [vmem:[#allocation2 + $0x10] sm:$0xff] %vm314_vm2, %v263_v40  ;;  %v375_v11 = vld [vmem:[#allocation2 + $0x7] sm:$0xff] }
   0xa   :  { %v265_v44 = vmax.f32 %v125_v30, %v242_v34  ;;  %316 = vst.msk [vmem:[#allocation2 + $0x18] sm:$0xff] %vm314_vm2, %v264_v35  ;;  %v127_v50 = vmax.f32 %v5313_v36, %v5354_v41  ;;  %v5314_v51 = vunpack.c.h.bf16 %v5472_v22  ;;  %v5317_v52 = vunpack.c.l.bf16 %v5473_v38  ;;  %v5485_v16 = vld [vmem:[%s8488_s0 + $0x80] sm:$0xff]   ;;  %v5476_v35 = vld [vmem:[%s8488_s0 + $0x30] sm:$0xff]   ;;  %v5486_v36 = vld [vmem:[%s8488_s0 + $0x88] sm:$0xff]  }
   0xb   :  { %v5357_v53 = vunpack.c.l.bf16 %v5483_v39  ;;  %v243_v54 = vmax.f32 %v5394_v42, %v5437_v46  ;;  %v244_v55 = vmax.f32 %v5397_v43, %v5438_v47  ;;  %v5358_v56 = vunpack.c.h.bf16 %v5483_v39  ;;  %v5496_v21 = vld [vmem:[%s8488_s0 + $0xe0] sm:$0xff]   ;;  %v6785_v41 = vld [vmem:[%s8488_s0 + $0xe8] sm:$0xff]  }
   0xc   :  { %317 = vst.msk [vmem:[#allocation2 + $0x20] sm:$0xff] %vm314_vm2, %v265_v44  ;;  %v5398_v57 = vunpack.c.h.bf16 %v5493_v28  ;;  %v5401_v61 = vunpack.c.l.bf16 %v5494_v48  ;;  %v5441_v62 = vunpack.c.l.bf16 %v5504_v49  ;;  %v5442_v63 = vunpack.c.h.bf16 %v5504_v49  ;;  %v5506_v28 = vld [vmem:[%s8488_s0 + $0x138] sm:$0xff]   ;;  %v5507_v46 = vld [vmem:[%s8488_s0 + $0x140] sm:$0xff]  }
   0xd   :  { %v128_v60 = vmax.f32 %v5314_v51, %v5357_v53  ;;  %v266_v2 = vmax.f32 %v126_v45, %v243_v54  ;;  %v267_v3 = vmax.f32 %v127_v50, %v244_v55  ;;  %v129_v4 = vmax.f32 %v5317_v52, %v5358_v56  ;;  %v6794_v47 = vld [vmem:[%s8487_s2 + $0x4] sm:$0x3]  ;;  %v6801_v52 = vld [vmem:[%s8488_s0 + $0x38] sm:$0xff]  }
   0xe   :  { %v5318_v5 = vunpack.c.h.bf16 %v5473_v38  ;;  %v245_v6 = vmax.f32 %v5398_v57, %v5441_v62  ;;  %v246_v7 = vmax.f32 %v5401_v61, %v5442_v63  ;;  %v5321_v8 = vunpack.c.l.bf16 %v5474_v58 }
   0xf   :  { %v5361_v9 = vunpack.c.l.bf16 %v5484_v59  ;;  %318 = vst.msk [vmem:[#allocation2 + $0x28] sm:$0xff] %vm314_vm2, %v266_v2  ;;  %319 = vst.msk [vmem:[#allocation2 + $0x30] sm:$0xff] %vm314_vm2, %v267_v3  ;;  %v5362_v12 = vunpack.c.h.bf16 %v5484_v59  ;;  %v5402_v13 = vunpack.c.h.bf16 %v5494_v48  ;;  %v5405_v14 = vunpack.c.l.bf16 %v6744_v0  ;;  %v5487_v59 = vld [vmem:[%s8488_s0 + $0x90] sm:$0xff]  }
  0x10   :  { %v5445_v15 = vunpack.c.l.bf16 %v5505_v1  ;;  %v268_v17 = vmax.f32 %v128_v60, %v245_v6  ;;  %v269_v18 = vmax.f32 %v129_v4, %v246_v7  ;;  %v5446_v20 = vunpack.c.h.bf16 %v5505_v1  ;;  %v6761_v22 = vld [vmem:[#allocation2 + $0xf] sm:$0xff] }
  0x11   :  { %v130_v19 = vmax.f32 %v5318_v5, %v5361_v9  ;;  %v6763_v23 = vld [vmem:[#allocation2 + $0x17] sm:$0xff]  ;;  %v131_v24 = vmax.f32 %v5321_v8, %v5362_v12  ;;  %v5322_v26 = vunpack.c.h.bf16 %v5474_v58  ;;  %v5325_v27 = vunpack.c.l.bf16 %v5475_v10  ;;  %v5508_v4 = vld [vmem:[%s8488_s0 + $0x148] sm:$0xff]  }
  0x12   :  { %v247_v25 = vmax.f32 %v5402_v13, %v5445_v15  ;;  %v398_v29 = vpack.c.bf16 %v6761_v22, %v375_v11  ;;  %320 = vst.msk [vmem:[#allocation2 + $0x38] sm:$0xff] %vm314_vm2, %v268_v17  ;;  %321 = vst.msk [vmem:[#allocation2 + $0x40] sm:$0xff] %vm314_vm2, %v269_v18  ;;  %v248_v32 = vmax.f32 %v5405_v14, %v5446_v20  ;;  %v5365_v33 = vunpack.c.l.bf16 %v5485_v16  ;;  %v5498_v3 = vld [vmem:[%s8488_s0 + $0xf0] sm:$0xff]   ;;  %v5478_v15 = vld [vmem:[%s8488_s0 + $0x40] sm:$0xff]  }
  0x13   :  { %v6769_v30 = vld [vmem:[#allocation2 + $0x1f] sm:$0xff]  ;;  %v5366_v34 = vunpack.c.h.bf16 %v5485_v16  ;;  %v5406_v39 = vunpack.c.h.bf16 %v6744_v0  ;;  %v5409_v40 = vunpack.c.l.bf16 %v5496_v21  ;;  %v5449_v45 = vunpack.c.l.bf16 %v5506_v28 }
  0x14   :  { %v399_v37 = vpack.c.bf16 %v6769_v30, %v6763_v23  ;;  %v270_v38 = vmax.f32 %v130_v19, %v247_v25  ;;  %5748 = vmatprep.mubr.msk.bf16.mxu0 %vm314_vm2, %v398_v29  ;;  %v271_v42 = vmax.f32 %v131_v24, %v248_v32  ;;  %v132_v43 = vmax.f32 %v5322_v26, %v5365_v33  ;;  %v5488_v16 = vld [vmem:[%s8488_s0 + $0x98] sm:$0xff]   ;;  %v5509_v29 = vld [vmem:[%s8488_s0 + $0x150] sm:$0xff]  }
  0x15   :  { %v133_v44 = vmax.f32 %v5325_v27, %v5366_v34  ;;  %v5450_v48 = vunpack.c.h.bf16 %v5506_v28  ;;  %v5326_v49 = vunpack.c.h.bf16 %v5475_v10  ;;  %v5329_v50 = vunpack.c.l.bf16 %v5476_v35 }
  0x16   :  { %5749 = vmatmul.mubr.msk.bf16.vlgmr.msra.gmra.mrb[0].mxu0 %vm314_vm2, %v399_v37  ;;  %322 = vst.msk [vmem:[#allocation2 + $0x48] sm:$0xff] %vm314_vm2, %v270_v38  ;;  %v5369_v51 = vunpack.c.l.bf16 %v5486_v36  ;;  %v6804_v53 = vld [vmem:[#allocation2 + $0x27] sm:$0xff]  ;;  %v6806_v54 = vld [vmem:[#allocation2 + $0x2f] sm:$0xff]  ;;  %323 = vst.msk [vmem:[#allocation2 + $0x50] sm:$0xff] %vm314_vm2, %v271_v42  ;;  %v249_v55 = vmax.f32 %v5406_v39, %v5449_v45  ;;  %v5370_v56 = vunpack.c.h.bf16 %v5486_v36  ;;  %v5410_v57 = vunpack.c.h.bf16 %v5496_v21 }
  0x17   :  { %5773 = vmatpush3.bf16.msra.mxu0 %v6715_v31  ;;  %v5413_v58 = vunpack.c.l.bf16 %v6785_v41  ;;  %v400_v60 = vpack.c.bf16 %v6806_v54, %v6804_v53  ;;  %v250_v61 = vmax.f32 %v5409_v40, %v5450_v48  ;;  %v5453_v62 = vunpack.c.l.bf16 %v5507_v46  ;;  %v5499_v21 = vld [vmem:[%s8488_s0 + $0xf8] sm:$0xff]   ;;  %v5479_v37 = vld [vmem:[%s8488_s0 + $0x48] sm:$0xff]   ;;  %v5489_v42 = vld [vmem:[%s8488_s0 + $0xa0] sm:$0xff]  }
  0x18   :  { %v134_v31 = vmax.f32 %v5326_v49, %v5369_v51  ;;  %6600 = vmatprep.subr.msk.bf16.mxu0 %vm448_vm0, %v6794_v47  ;;  %v272_v63 = vmax.f32 %v132_v43, %v249_v55  ;;  %v135_v0 = vmax.f32 %v5329_v50, %v5370_v56  ;;  %v5454_v1 = vunpack.c.h.bf16 %v5507_v46  ;;  %v5500_v48 = vld [vmem:[%s8488_s0 + $0x100] sm:$0xff]   ;;  %v5510_v49 = vld [vmem:[%s8488_s0 + $0x158] sm:$0xff]  }
  0x19   :  { %v5330_v2 = vunpack.c.h.bf16 %v5476_v35  ;;  %5752 = vmatprep.mubr.msk.bf16.mxu0 %vm314_vm2, %v400_v60  ;;  %v6824_v5 = vld [vmem:[#allocation2 + $0x37] sm:$0xff]  ;;  %v6826_v6 = vld [vmem:[#allocation2 + $0x3f] sm:$0xff]  ;;  %v273_v7 = vmax.f32 %v133_v44, %v250_v61  ;;  %v251_v8 = vmax.f32 %v5410_v57, %v5453_v62  ;;  %v5333_v9 = vunpack.c.l.bf16 %v6801_v52 }
  0x1a   :  { %v5373_v10 = vunpack.c.l.bf16 %v5487_v59  ;;  %v401_v11 = vpack.c.bf16 %v6826_v6, %v6824_v5  ;;  %324 = vst.msk [vmem:[#allocation2 + $0x58] sm:$0xff] %vm314_vm2, %v272_v63  ;;  %v252_v12 = vmax.f32 %v5413_v58, %v5454_v1  ;;  %v5374_v13 = vunpack.c.h.bf16 %v5487_v59  ;;  %v5480_v1 = vld [vmem:[%s8488_s0 + $0x50] sm:$0xff]  }
  0x1b   :  { %v5414_v14 = vunpack.c.h.bf16 %v6785_v41  ;;  %325 = vst.msk [vmem:[#allocation2 + $0x60] sm:$0xff] %vm314_vm2, %v273_v7  ;;  %v274_v17 = vmax.f32 %v134_v31, %v251_v8  ;;  %v5417_v19 = vunpack.c.l.bf16 %v5498_v3  ;;  %v5457_v20 = vunpack.c.l.bf16 %v5508_v4 }
  0x1c   :  { %v136_v18 = vmax.f32 %v5330_v2, %v5373_v10  ;;  %v275_v25 = vmax.f32 %v135_v0, %v252_v12  ;;  %v137_v26 = vmax.f32 %v5333_v9, %v5374_v13  ;;  %v5458_v27 = vunpack.c.h.bf16 %v5508_v4  ;;  %v5490_v2 = vld [vmem:[%s8488_s0 + $0xa8] sm:$0xff]  }
  0x1d   :  { %v6843_v24 = vld [vmem:[#allocation2 + $0x47] sm:$0xff]  ;;  %v5334_v28 = vunpack.c.h.bf16 %v6801_v52  ;;  %v6850_v32 = vld [vmem:[#allocation2 + $0x4f] sm:$0xff]  ;;  %326 = vst.msk [vmem:[#allocation2 + $0x68] sm:$0xff] %vm314_vm2, %v274_v17  ;;  %v253_v33 = vmax.f32 %v5414_v14, %v5457_v20  ;;  %v5337_v34 = vunpack.c.l.bf16 %v5478_v15  ;;  %v5377_v35 = vunpack.c.l.bf16 %v5488_v16 }
  0x1e   :  { %5753 = vmatmul.mubr.msk.bf16.gmra.mrb[4].mxu0 %vm314_vm2, %v401_v11  ;;  %v5378_v36 = vunpack.c.h.bf16 %v5488_v16  ;;  %v402_v38 = vpack.c.bf16 %v6850_v32, %v6843_v24  ;;  %327 = vst.msk [vmem:[#allocation2 + $0x70] sm:$0xff] %vm314_vm2, %v275_v25  ;;  %v254_v39 = vmax.f32 %v5417_v19, %v5458_v27  ;;  %v5418_v40 = vunpack.c.h.bf16 %v5498_v3  ;;  %v5501_v9 = vld [vmem:[%s8488_s0 + $0x108] sm:$0xff]  }
  0x1f   :  { %v5421_v41 = vunpack.c.l.bf16 %v5499_v21  ;;  %v276_v43 = vmax.f32 %v136_v18, %v253_v33  ;;  %v138_v44 = vmax.f32 %v5334_v28, %v5377_v35  ;;  %v5461_v46 = vunpack.c.l.bf16 %v5509_v29 }
  0x20   :  { %v139_v45 = vmax.f32 %v5337_v34, %v5378_v36  ;;  %5756 = vmatprep.mubr.msk.bf16.mxu0 %vm314_vm2, %v402_v38  ;;  %v277_v50 = vmax.f32 %v137_v26, %v254_v39  ;;  %v5462_v51 = vunpack.c.h.bf16 %v5509_v29  ;;  %v5338_v52 = vunpack.c.h.bf16 %v5478_v15  ;;  %v5511_v15 = vld [vmem:[%s8488_s0 + $0x160] sm:$0xff]  }
  0x21   :  { %v5341_v55 = vunpack.c.l.bf16 %v5479_v37  ;;  %v6869_v56 = vld [vmem:[#allocation2 + $0x57] sm:$0xff]  ;;  %328 = vst.msk [vmem:[#allocation2 + $0x78] sm:$0xff] %vm314_vm2, %v276_v43  ;;  %v255_v57 = vmax.f32 %v5418_v40, %v5461_v46  ;;  %v5381_v58 = vunpack.c.l.bf16 %v5489_v42  ;;  %v5382_v59 = vunpack.c.h.bf16 %v5489_v42 }
  0x22   :  { %v5422_v60 = vunpack.c.h.bf16 %v5499_v21  ;;  %v6872_v61 = vld [vmem:[#allocation2 + $0x5f] sm:$0xff]  ;;  %329 = vst.msk [vmem:[#allocation2 + $0x80] sm:$0xff] %vm314_vm2, %v277_v50  ;;  %v256_v31 = vmax.f32 %v5421_v41, %v5462_v51  ;;  %v5425_v62 = vunpack.c.l.bf16 %v5500_v48  ;;  %v5465_v63 = vunpack.c.l.bf16 %v5510_v49  ;;  %v5023_v21 = vld [vmem:[%s8488_s0 + $0xb0] ss:$184 sps:$4 sm:$0xff]  }
  0x23   :  { %v5466_v0 = vunpack.c.h.bf16 %v5510_v49  ;;  %v403_v3 = vpack.c.bf16 %v6872_v61, %v6869_v56  ;;  %v278_v4 = vmax.f32 %v138_v44, %v255_v57  ;;  %v140_v7 = vmax.f32 %v5338_v52, %v5381_v58 }
  0x24   :  { %v141_v8 = vmax.f32 %v5341_v55, %v5382_v59  ;;  %v6886_v10 = vld [vmem:[#allocation2 + $0x67] sm:$0xff]  ;;  %v279_v11 = vmax.f32 %v139_v45, %v256_v31  ;;  %v257_v12 = vmax.f32 %v5422_v60, %v5465_v63  ;;  %v5342_v14 = vunpack.c.h.bf16 %v5479_v37 }
  0x25   :  { %v258_v13 = vmax.f32 %v5425_v62, %v5466_v0  ;;  %v6892_v16 = vld [vmem:[#allocation2 + $0x6f] sm:$0xff]  ;;  %330 = vst.msk [vmem:[#allocation2 + $0x88] sm:$0xff] %vm314_vm2, %v278_v4  ;;  %v5345_v17 = vunpack.c.l.bf16 %v5480_v1  ;;  %v5385_v18 = vunpack.c.l.bf16 %v5490_v2  ;;  %v5386_v19 = vunpack.c.h.bf16 %v5490_v2  ;;  %v339_v0 = vld [vmem:[#allocation2 + $0x6] sm:$0xff]  ;;  %v52_v4 = vld [vmem:[%s8488_s0 + $0x58] sm:$0x3] }
  0x26   :  { %5757 = vmatmul.mubr.msk.bf16.gmra.mrb[8].mxu0 %vm314_vm2, %v403_v3  ;;  %v5426_v20 = vunpack.c.h.bf16 %v5500_v48  ;;  %v404_v25 = vpack.c.bf16 %v6892_v16, %v6886_v10  ;;  %331 = vst.msk [vmem:[#allocation2 + $0x90] sm:$0xff] %vm314_vm2, %v279_v11  ;;  %v280_v26 = vmax.f32 %v140_v7, %v257_v12  ;;  %v5429_v28 = vunpack.c.l.bf16 %v5501_v9  ;;  %v5024_v7 = vld [vmem:[%s8488_s0 + $0xb4] sm:$0x3] }
  0x27   :  { %v281_v27 = vmax.f32 %v141_v8, %v258_v13  ;;  %v142_v29 = vmax.f32 %v5342_v14, %v5385_v18  ;;  %v143_v33 = vmax.f32 %v5345_v17, %v5386_v19  ;;  %v5469_v34 = vunpack.c.l.bf16 %v5511_v15  ;;  %v5047_v8 = vld [vmem:[%s8488_s0 + $0x110] sm:$0x3]  ;;  %v5070_v13 = vld [vmem:[%s8488_s0 + $0x16c] sm:$0x3]  ;;  %v341_v14 = vld [vmem:[#allocation2 + $0x16] sm:$0xff] }
  0x28   :  { %v5470_v35 = vunpack.c.h.bf16 %v5511_v15  ;;  %5760 = vmatprep.mubr.msk.bf16.mxu0 %vm314_vm2, %v404_v25  ;;  %v6902_v36 = vld [vmem:[#allocation2 + $0x77] sm:$0xff]  ;;  %332 = vst.msk [vmem:[#allocation2 + $0x98] sm:$0xff] %vm314_vm2, %v280_v26  ;;  %v5346_v37 = vunpack.c.h.bf16 %v5480_v1  ;;  %v121_v38 = vunpack.c.l.bf16 %v5023_v21  ;;  %v5430_v39 = vunpack.c.h.bf16 %v5501_v9  ;;  %v340_v1 = vld [vmem:[#allocation2 + $0xe] sm:$0xff]  ;;  %v343_v18 = vld [vmem:[#allocation2 + $0x26] sm:$0xff] }
  0x29   :  { %333 = vst.msk [vmem:[#allocation2 + $0xa0] sm:$0xff] %vm314_vm2, %v281_v27  ;;  %v238_v40 = vunpack.c.h.bf16 %v5023_v21  ;;  %v6906_v41 = vld [vmem:[#allocation2 + $0x7f] sm:$0xff]  ;;  %v259_v42 = vmax.f32 %v5426_v20, %v5469_v34  ;;  %v362_v3 = vpack.c.bf16 %v340_v1, %v339_v0  ;;  %v75_v9 = vunpack.c.l.bf16 %v52_v4  ;;  %v344_v19 = vld [vmem:[#allocation2 + $0x2e] sm:$0xff] }
  0x2a   :  { %v260_v43 = vmax.f32 %v5429_v28, %v5470_v35  ;;  %v405_v44 = vpack.c.bf16 %v6906_v41, %v6902_v36  ;;  %v144_v45 = vmax.f32 %v5346_v37, %v121_v38  ;;  %v122_v11 = vunpack.c.l.bf16 %v5024_v7  ;;  %v342_v15 = vld [vmem:[#allocation2 + $0x1e] sm:$0xff]  ;;  %v347_v35 = vld [vmem:[#allocation2 + $0x46] sm:$0xff]  ;;  %v348_v37 = vld [vmem:[#allocation2 + $0x4e] sm:$0xff] }
  0x2b   :  { %v261_v46 = vmax.f32 %v5430_v39, %v238_v40  ;;  %v282_v48 = vmax.f32 %v142_v29, %v259_v42  ;;  %v192_v12 = vunpack.c.l.bf16 %v5047_v8  ;;  %v239_v17 = vunpack.c.l.bf16 %v5070_v13  ;;  %v5109_v29 = vld [vmem:[%s8487_s2 + $0x6] sm:$0x3]  ;;  %v346_v34 = vld [vmem:[#allocation2 + $0x3e] sm:$0xff]  ;;  %v747_v7 = vld [vmem:[#allocation2 + $0x8] sm:$0xff] }
  0x2c   :  { %v283_v49 = vmax.f32 %v143_v33, %v260_v43  ;;  %v6910_v50 = vld [vmem:[#allocation2 + $0x87] sm:$0xff]  ;;  %v145_v20 = vmax.f32 %v75_v9, %v122_v11  ;;  %v363_v25 = vpack.c.bf16 %v342_v15, %v341_v14  ;;  %v364_v26 = vpack.c.bf16 %v344_v19, %v343_v18  ;;  %v345_v33 = vld [vmem:[#allocation2 + $0x36] sm:$0xff]  ;;  %v350_v40 = vld [vmem:[#allocation2 + $0x5e] sm:$0xff] }
  0x2d   :  { %v284_v51 = vmax.f32 %v144_v45, %v261_v46  ;;  %v6913_v52 = vld [vmem:[#allocation2 + $0x8f] sm:$0xff]  ;;  %334 = vst.msk [vmem:[#allocation2 + $0xa8] sm:$0xff] %vm314_vm2, %v282_v48  ;;  %v262_v21 = vmax.f32 %v192_v12, %v239_v17  ;;  %v821_v28 = vsel %vm448_vm0, %v6794_v47, 0  ;;  %v365_v38 = vpack.c.bf16 %v346_v34, %v345_v33  ;;  %v351_v42 = vld [vmem:[#allocation2 + $0x66] sm:$0xff]  ;;  %v354_v48 = vld [vmem:[#allocation2 + $0x7e] sm:$0xff] }
  0x2e   :  { %5761 = vmatmul.mubr.msk.bf16.gmra.mrb[12].mxu0 %vm314_vm2, %v405_v44  ;;  %335 = vst.msk [vmem:[#allocation2 + $0xb0] sm:$0xff] %vm314_vm2, %v283_v49  ;;  %v406_v55 = vpack.c.bf16 %v6913_v52, %v6910_v50  ;;  %v366_v39 = vpack.c.bf16 %v348_v37, %v347_v35  ;;  %v349_v47 = vld [vmem:[#allocation2 + $0x56] sm:$0xff]  ;;  %v352_v43 = vld [vmem:[#allocation2 + $0x6e] sm:$0xff]  ;;  %v355_v49 = vld [vmem:[#allocation2 + $0x86] sm:$0xff]  ;;  %v1048_v19 = vsel %vm448_vm0, %v5109_v29, 0  ;;  %vm2847_vm4 = vcmask 1043456  }
  0x2f   :  { %336 = vst.msk [vmem:[#allocation2 + $0xb8] sm:$0xff] %vm314_vm2, %v284_v51  ;;  %v6920_v57 = vld [vmem:[#allocation2 + $0x97] sm:$0xff]  ;;  %v285_v27 = vmax.f32 %v145_v20, %v262_v21  ;;  %v367_v44 = vpack.c.bf16 %v350_v40, %v349_v47  ;;  %v368_v45 = vpack.c.bf16 %v352_v43, %v351_v42  ;;  %v356_v51 = vld [vmem:[#allocation2 + $0x8e] sm:$0xff]  ;;  %v6972_v13 = vld [vmem:[#allocation2 + $0x20] sm:$0xff]  ;;  %vm2517_vm5 = vcmask 60416  }
  0x30   :  { %v6922_v58 = vld [vmem:[#allocation2 + $0x9f] sm:$0xff]  ;;  %5764 = vmatprep.mubr.msk.bf16.mxu0 %vm314_vm2, %v406_v55  ;;  %v353_v46 = vld [vmem:[#allocation2 + $0x76] sm:$0xff]  ;;  %v6974_v14 = vld [vmem:[#allocation2 + $0x28] sm:$0xff] }
  0x31   :  { %v407_v59 = vpack.c.bf16 %v6922_v58, %v6920_v57  ;;  %338 = vst.msk [vmem:[#allocation2 + $0xc0] sm:$0xf] %vm337_vm3, %v285_v27  ;;  %v369_v55 = vpack.c.bf16 %v354_v48, %v353_v46  ;;  %v6965_v8 = vld [vmem:[#allocation2 + $0x10] sm:$0xff]  ;;  %v6970_v12 = vld [vmem:[#allocation2 + $0x18] sm:$0xff]  ;;  %v5122_v20 = vld [vmem:[%s8487_s2 + $0x8] sm:$0x3] }
  0x32   :  { %v770_v11 = vpack.c.bf16 %v6965_v8, %v747_v7  ;;  %v6976_v15 = vld [vmem:[#allocation2 + $0x30] sm:$0xff]  ;;  %v6980_v17 = vpack.c.bf16 %v6972_v13, %v6970_v12  ;;  %v6994_v21 = vld [vmem:[#allocation2 + $0x38] sm:$0xff]  ;;  %v7017_v34 = vld [vmem:[#allocation2 + $0x60] sm:$0xff] }
  0x33   :  { %v6984_v18 = vpack.c.bf16 %v6976_v15, %v6974_v14  ;;  %v7000_v27 = vld [vmem:[#allocation2 + $0x50] sm:$0xff]  ;;  %v7015_v33 = vld [vmem:[#allocation2 + $0x58] sm:$0xff]  ;;  %v7019_v35 = vld [vmem:[#allocation2 + $0x68] sm:$0xff] }
  0x34   :  { %v6927_v60 = vld [vmem:[#allocation2 + $0xa7] sm:$0xff]  ;;  %v7021_v37 = vld [vmem:[#allocation2 + $0x70] sm:$0xff]  ;;  %v7035_v47 = vld [vmem:[#allocation2 + $0x78] sm:$0xff] }
  0x35   :  { %v6929_v31 = vld [vmem:[#allocation2 + $0xaf] sm:$0xff]  ;;  %v359_v0 = vld [vmem:[#allocation2 + $0xa6] sm:$0xff]  ;;  %v7055_v46 = vld [vmem:[#allocation2 + $0x98] sm:$0xff] }
  0x36   :  { %5765 = vmatmul.mubr.msk.bf16.gmra.mrb[16].mxu0 %vm314_vm2, %v407_v59  ;;  %v408_v62 = vpack.c.bf16 %v6929_v31, %v6927_v60  ;;  %v397_v63 = vld [vmem:[#allocation2 + $0xb7] sm:$0xf]  ;;  %v370_v59 = vpack.c.bf16 %v356_v51, %v355_v49  ;;  %v360_v1 = vld [vmem:[#allocation2 + $0xae] sm:$0xff]  ;;  %v7037_v40 = vld [vmem:[#allocation2 + $0x80] sm:$0xff] }
  0x37   :  { %v409_v2 = vpack.c.bf16 %v397_v63, %v397_v63  ;;  %v358_v63 = vld [vmem:[#allocation2 + $0x9e] sm:$0xff]  ;;  %v361_v4 = vld [vmem:[#allocation2 + $0xb6] sm:$0xf]  ;;  %v7039_v42 = vld [vmem:[#allocation2 + $0x88] sm:$0xff] }
  0x38   :  { %5768 = vmatprep.mubr.msk.bf16.mxu0 %vm314_vm2, %v408_v62  ;;  %v357_v62 = vld [vmem:[#allocation2 + $0x96] sm:$0xff]  ;;  %v373_v9 = vpack.c.bf16 %v361_v4, %v361_v4  ;;  %v7057_v48 = vld [vmem:[#allocation2 + $0xa0] sm:$0xff]  ;;  %v7059_v49 = vld [vmem:[#allocation2 + $0xa8] sm:$0xff] }
  0x39   :  { %v7041_v43 = vld [vmem:[#allocation2 + $0x90] sm:$0xff]  ;;  %v5135_v4 = vld [vmem:[%s8487_s2 + $0xa] sm:$0x3] }
  0x3a   :  { %v7061_v51 = vld [vmem:[#allocation2 + $0xb0] sm:$0xff]  ;;  %v1232_v7 = vpack.c.bf16 %v7055_v46, %v7041_v43 }
  0x3e   :  { %5769 = vmatmul.mubr.msk.bf16.gmra.mrb[20].mxu0 %vm314_vm2, %v409_v2  ;;  %v371_v2 = vpack.c.bf16 %v358_v63, %v357_v62  ;;  %v769_v62 = vld [vmem:[#allocation2 + $0xb8] sm:$0xf] }
  0x3f   :  { %5774 = vmatprep.mubr.msk.bf16.mxu0 %vm314_vm2, %v362_v3  ;;  %v372_v3 = vpack.c.bf16 %v360_v1, %v359_v0  ;;  %v781_v63 = vpack.c.bf16 %v769_v62, %v769_v62  ;;  %v997_v0 = vpack.c.bf16 %v6763_v23, %v6761_v22  ;;  %v998_v1 = vpack.c.bf16 %v6804_v53, %v6769_v30  ;;  %v7198_v62 = vld [vmem:[#allocation2 + $0x79] sm:$0xff] }
  0x40   :  { %v1000_v22 = vpack.c.bf16 %v6843_v24, %v6826_v6  ;;  %v1001_v23 = vpack.c.bf16 %v6869_v56, %v6850_v32  ;;  %v1002_v30 = vpack.c.bf16 %v6886_v10, %v6872_v61  ;;  %v1003_v53 = vpack.c.bf16 %v6902_v36, %v6892_v16  ;;  %v995_v6 = vld [vmem:[#allocation2 + $0xb7] sm:$0xff]  ;;  %v996_v56 = vld [vmem:[#allocation2 + $0xbf] sm:$0xf] }
  0x41   :  { %v1006_v24 = vpack.c.bf16 %v6927_v60, %v6922_v58  ;;  %v1007_v32 = vpack.c.bf16 %v995_v6, %v6929_v31  ;;  %v1008_v61 = vpack.c.bf16 %v996_v56, %v996_v56  ;;  %v1224_v10 = vpack.c.bf16 %v6970_v12, %v6965_v8  ;;  %v7146_v8 = vld [vmem:[#allocation2 + $0xb8] sm:$0xff]  ;;  %v1223_v12 = vld [vmem:[#allocation2 + $0xc0] sm:$0xf] }
  0x42   :  { %v1225_v16 = vpack.c.bf16 %v6974_v14, %v6972_v13  ;;  %v1226_v36 = vpack.c.bf16 %v6994_v21, %v6976_v15  ;;  %v1229_v58 = vpack.c.bf16 %v7019_v35, %v7017_v34  ;;  %v1230_v60 = vpack.c.bf16 %v7035_v47, %v7021_v37  ;;  %v1428_v13 = vld [vmem:[#allocation2 + $0x11] sm:$0xff]  ;;  %v7154_v14 = vld [vmem:[#allocation2 + $0x19] sm:$0xff] }
  0x43   :  { %v1231_v31 = vpack.c.bf16 %v7039_v42, %v7037_v40  ;;  %v1235_v15 = vpack.c.bf16 %v1223_v12, %v1223_v12 }
  0x46   :  { %5775 = vmatmul.mubr.msk.bf16.vlgmr.msra.gmra.mrb[0].mxu0 %vm314_vm2, %v363_v25  ;;  %v6996_v25 = vld [vmem:[#allocation2 + $0x40] sm:$0xff] }
  0x47   :  { %5799 = vmatpush3.bf16.msra.mxu0 %v821_v28  ;;  %5778 = vmatprep.mubr.msk.bf16.mxu0 %vm314_vm2, %v364_v26  ;;  %v6998_v26 = vld [vmem:[#allocation2 + $0x48] sm:$0xff]  ;;  %v7005_v28 = vpack.c.bf16 %v6996_v25, %v6994_v21 }
  0x48   :  { %6601 = vmatprep.subr.msk.bf16.mxu0 %vm448_vm0, %v5109_v29  ;;  %v7009_v29 = vpack.c.bf16 %v7000_v27, %v6998_v26  ;;  %v7161_v21 = vld [vmem:[#allocation2 + $0x29] sm:$0xff] }
  0x4e   :  { %5779 = vmatmul.mubr.msk.bf16.gmra.mrb[4].mxu0 %vm314_vm2, %v365_v38  ;;  %v7025_v38 = vpack.c.bf16 %v7017_v34, %v7015_v33 }
  0x4f   :  { %5782 = vmatprep.mubr.msk.bf16.mxu0 %vm314_vm2, %v366_v39  ;;  %v7029_v39 = vpack.c.bf16 %v7021_v37, %v7019_v35  ;;  %v5161_v35 = vld [vmem:[%s8487_s2 + $0xe] sm:$0x3]  ;;  %v7177_v37 = vld [vmem:[#allocation2 + $0x41] sm:$0xff] }
  0x56   :  { %5783 = vmatmul.mubr.msk.bf16.gmra.mrb[8].mxu0 %vm314_vm2, %v367_v44  ;;  %v7045_v44 = vpack.c.bf16 %v7037_v40, %v7035_v47  ;;  %v7179_v47 = vld [vmem:[#allocation2 + $0x49] sm:$0xff]  ;;  %v7181_v40 = vld [vmem:[#allocation2 + $0x51] sm:$0xff] }
  0x57   :  { %5786 = vmatprep.mubr.msk.bf16.mxu0 %vm314_vm2, %v368_v45  ;;  %v7049_v45 = vpack.c.bf16 %v7041_v43, %v7039_v42  ;;  %v7183_v42 = vld [vmem:[#allocation2 + $0x59] sm:$0xff]  ;;  %v1454_v43 = vpack.c.bf16 %v7179_v47, %v7177_v37 }
  0x5e   :  { %5787 = vmatmul.mubr.msk.bf16.gmra.mrb[12].mxu0 %vm314_vm2, %v369_v55  ;;  %v7065_v55 = vpack.c.bf16 %v7057_v48, %v7055_v46  ;;  %v1455_v46 = vpack.c.bf16 %v7183_v42, %v7181_v40 }
  0x5f   :  { %5790 = vmatprep.mubr.msk.bf16.mxu0 %vm314_vm2, %v370_v59  ;;  %v7069_v59 = vpack.c.bf16 %v7061_v51, %v7059_v49 }
  0x66   :  { %5791 = vmatmul.mubr.msk.bf16.gmra.mrb[16].mxu0 %vm314_vm2, %v371_v2  ;;  %v999_v2 = vpack.c.bf16 %v6824_v5, %v6806_v54  ;;  %v1004_v54 = vpack.c.bf16 %v6910_v50, %v6906_v41  ;;  %v1005_v5 = vpack.c.bf16 %v6920_v57, %v6913_v52  ;;  %v1502_v41 = vsel %vm448_vm0, %v5135_v4, 0  ;;  %v5148_v50 = vld [vmem:[%s8487_s2 + $0xc] sm:$0x3] }
  0x67   :  { %5794 = vmatprep.mubr.msk.bf16.mxu0 %vm314_vm2, %v372_v3  ;;  %v1275_v3 = vsel %vm448_vm0, %v5122_v20, 0  ;;  %v1227_v52 = vpack.c.bf16 %v6998_v26, %v6996_v25  ;;  %v1228_v57 = vpack.c.bf16 %v7015_v33, %v7000_v27  ;;  %v7163_v25 = vld [vmem:[#allocation2 + $0x31] sm:$0xff]  ;;  %v7165_v26 = vld [vmem:[#allocation2 + $0x39] sm:$0xff]  ;;  %v1729_v34 = vsel %vm448_vm0, %v5148_v50, 0 }
  0x68   :  { %v1453_v33 = vpack.c.bf16 %v7165_v26, %v7163_v25 }
  0x6e   :  { %5795 = vmatmul.mubr.msk.bf16.gmra.mrb[20].mxu0 %vm314_vm2, %v373_v9  ;;  %v1233_v9 = vpack.c.bf16 %v7059_v49, %v7057_v48  ;;  %v7192_v48 = vld [vmem:[#allocation2 + $0x61] sm:$0xff]  ;;  %v7194_v49 = vld [vmem:[#allocation2 + $0x69] sm:$0xff] }
  0x6f   :  { %5800 = vmatprep.mubr.msk.bf16.mxu0 %vm314_vm2, %v770_v11  ;;  %v1234_v11 = vpack.c.bf16 %v7146_v8, %v7061_v51  ;;  %v7196_v51 = vld [vmem:[#allocation2 + $0x71] sm:$0xff] }
  0x76   :  { %5801 = vmatmul.mubr.msk.bf16.vlgmr.msra.gmra.mrb[0].mxu0 %vm314_vm2, %v6980_v17 }
  0x77   :  { %5825 = vmatpush3.bf16.msra.mxu0 %v1048_v19  ;;  %5804 = vmatprep.mubr.msk.bf16.mxu0 %vm314_vm2, %v6984_v18  ;;  %v1451_v19 = vpack.c.bf16 %v7154_v14, %v1428_v13  ;;  %v303_v13 = vld [vmem:[%s8489_s1 + $0x88] sm:$0xff] }
  0x78   :  { %6602 = vmatprep.subr.msk.bf16.mxu0 %vm448_vm0, %v5122_v20  ;;  %v7159_v20 = vld [vmem:[#allocation2 + $0x21] sm:$0xff] }
  0x79   :  { %v1452_v27 = vpack.c.bf16 %v7161_v21, %v7159_v20  ;;  %v1905_v12 = vpack.c.bf16 %v7159_v20, %v7154_v14  ;;  %v306_v14 = vld [vmem:[%s8489_s1 + $0xa0] sm:$0xff]  ;;  %v1907_v20 = vpack.c.bf16 %v7177_v37, %v7165_v26  ;;  %v1910_v26 = vpack.c.bf16 %v7196_v51, %v7194_v49 }
  0x7e   :  { %5805 = vmatmul.mubr.msk.bf16.gmra.mrb[4].mxu0 %vm314_vm2, %v7005_v28 }
  0x7f   :  { %5808 = vmatprep.mubr.msk.bf16.mxu0 %vm314_vm2, %v7009_v29 }
  0x86   :  { %5809 = vmatmul.mubr.msk.bf16.gmra.mrb[8].mxu0 %vm314_vm2, %v7025_v38 }
  0x87   :  { %5812 = vmatprep.mubr.msk.bf16.mxu0 %vm314_vm2, %v7029_v39 }
  0x8e   :  { %5813 = vmatmul.mubr.msk.bf16.gmra.mrb[12].mxu0 %vm314_vm2, %v7045_v44 }
  0x8f   :  { %5816 = vmatprep.mubr.msk.bf16.mxu0 %vm314_vm2, %v7049_v45 }
  0x96   :  { %5817 = vmatmul.mubr.msk.bf16.gmra.mrb[16].mxu0 %vm314_vm2, %v7065_v55 }
  0x97   :  { %5820 = vmatprep.mubr.msk.bf16.mxu0 %vm314_vm2, %v7069_v59 }
  0x9e   :  { %5821 = vmatmul.mubr.msk.bf16.gmra.mrb[20].mxu0 %vm314_vm2, %v781_v63  ;;  %v1456_v63 = vpack.c.bf16 %v7194_v49, %v7192_v48  ;;  %v2110_v49 = vld [vmem:[#allocation2 + $0x22] sm:$0xff] }
  0x9f   :  { %5826 = vmatprep.mubr.msk.bf16.mxu0 %vm314_vm2, %v997_v0  ;;  %v1457_v0 = vpack.c.bf16 %v7198_v62, %v7196_v51 }
  0xa6   :  { %5827 = vmatmul.mubr.msk.bf16.vlgmr.msra.gmra.mrb[0].mxu0 %vm314_vm2, %v998_v1  ;;  %v7206_v1 = vld [vmem:[#allocation2 + $0x81] sm:$0xff] }
  0xa7   :  { %5851 = vmatpush3.bf16.msra.mxu0 %v1275_v3  ;;  %5830 = vmatprep.mubr.msk.bf16.mxu0 %vm314_vm2, %v999_v2  ;;  %v7208_v2 = vld [vmem:[#allocation2 + $0x89] sm:$0xff]  ;;  %v7210_v3 = vld [vmem:[#allocation2 + $0x91] sm:$0xff] }
  0xa8   :  { %6603 = vmatprep.subr.msk.bf16.mxu0 %vm448_vm0, %v5135_v4  ;;  %v7212_v4 = vld [vmem:[#allocation2 + $0x99] sm:$0xff]  ;;  %v1912_v37 = vpack.c.bf16 %v7210_v3, %v7208_v2 }
  0xae   :  { %5831 = vmatmul.mubr.msk.bf16.gmra.mrb[4].mxu0 %vm314_vm2, %v1000_v22  ;;  %v1458_v22 = vpack.c.bf16 %v7208_v2, %v7206_v1  ;;  %v2114_v2 = vld [vmem:[#allocation2 + $0x42] sm:$0xff] }
  0xaf   :  { %5834 = vmatprep.mubr.msk.bf16.mxu0 %vm314_vm2, %v1001_v23  ;;  %v1459_v23 = vpack.c.bf16 %v7212_v4, %v7210_v3 }
  0xb6   :  { %5835 = vmatmul.mubr.msk.bf16.gmra.mrb[8].mxu0 %vm314_vm2, %v1002_v30  ;;  %v7220_v30 = vld [vmem:[#allocation2 + $0xa1] sm:$0xff] }
  0xb7   :  { %5838 = vmatprep.mubr.msk.bf16.mxu0 %vm314_vm2, %v1003_v53  ;;  %v7222_v53 = vld [vmem:[#allocation2 + $0xa9] sm:$0xff] }
  0xb8   :  { %v1460_v6 = vpack.c.bf16 %v7222_v53, %v7220_v30 }
  0xbe   :  { %5839 = vmatmul.mubr.msk.bf16.gmra.mrb[12].mxu0 %vm314_vm2, %v1004_v54  ;;  %v7224_v54 = vld [vmem:[#allocation2 + $0xb1] sm:$0xff] }
  0xbf   :  { %5842 = vmatprep.mubr.msk.bf16.mxu0 %vm314_vm2, %v1005_v5  ;;  %v7226_v5 = vld [vmem:[#allocation2 + $0xb9] sm:$0xff] }
  0xc6   :  { %5843 = vmatmul.mubr.msk.bf16.gmra.mrb[16].mxu0 %vm314_vm2, %v1006_v24  ;;  %v1461_v24 = vpack.c.bf16 %v7226_v5, %v7224_v54 }
  0xc7   :  { %5846 = vmatprep.mubr.msk.bf16.mxu0 %vm314_vm2, %v1007_v32  ;;  %v1450_v32 = vld [vmem:[#allocation2 + $0xc1] sm:$0xf] }
  0xc8   :  { %v1462_v56 = vpack.c.bf16 %v1450_v32, %v1450_v32  ;;  %v2121_v32 = vld [vmem:[#allocation2 + $0x7a] sm:$0xff] }
  0xce   :  { %5847 = vmatmul.mubr.msk.bf16.gmra.mrb[20].mxu0 %vm314_vm2, %v1008_v61  ;;  %v1956_v61 = vsel %vm448_vm0, %v5161_v35, 0 }
  0xcf   :  { %5852 = vmatprep.mubr.msk.bf16.mxu0 %vm314_vm2, %v1224_v10  ;;  %v7241_v10 = vld [vmem:[%s8487_s2 + $0x10] sm:$0x3] }
  0xd6   :  { %5853 = vmatmul.mubr.msk.bf16.vlgmr.msra.gmra.mrb[0].mxu0 %vm314_vm2, %v1225_v16  ;;  %v286_v16 = vld [vmem:[%s8489_s1] sm:$0xff] }
  0xd7   :  { %5877 = vmatpush3.bf16.msra.mxu0 %v1502_v41  ;;  %5856 = vmatprep.mubr.msk.bf16.mxu0 %vm314_vm2, %v1226_v36  ;;  %v290_v36 = vld [vmem:[%s8489_s1 + $0x20] sm:$0xff]  ;;  %v292_v41 = vld [vmem:[%s8489_s1 + $0x30] sm:$0xff] }
  0xd8   :  { %6604 = vmatprep.subr.msk.bf16.mxu0 %vm448_vm0, %v5148_v50  ;;  %v294_v50 = vld [vmem:[%s8489_s1 + $0x40] sm:$0xff] }
  0xde   :  { %5857 = vmatmul.mubr.msk.bf16.gmra.mrb[4].mxu0 %vm314_vm2, %v1227_v52  ;;  %v293_v52 = vld [vmem:[%s8489_s1 + $0x38] sm:$0xff] }
  0xdf   :  { %5860 = vmatprep.mubr.msk.bf16.mxu0 %vm314_vm2, %v1228_v57  ;;  %v296_v57 = vld [vmem:[%s8489_s1 + $0x50] sm:$0xff] }
  0xe6   :  { %5861 = vmatmul.mubr.msk.bf16.gmra.mrb[8].mxu0 %vm314_vm2, %v1229_v58  ;;  %v298_v58 = vld [vmem:[%s8489_s1 + $0x60] sm:$0xff] }
  0xe7   :  { %5864 = vmatprep.mubr.msk.bf16.mxu0 %vm314_vm2, %v1230_v60  ;;  %v297_v60 = vld [vmem:[%s8489_s1 + $0x58] sm:$0xff] }
  0xee   :  { %5865 = vmatmul.mubr.msk.bf16.gmra.mrb[12].mxu0 %vm314_vm2, %v1231_v31 }
  0xef   :  { %5868 = vmatprep.mubr.msk.bf16.mxu0 %vm314_vm2, %v1232_v7  ;;  %v1677_v7 = vld [vmem:[#allocation2 + $0xc8] sm:$0xf] }
  0xf6   :  { %5869 = vmatmul.mubr.msk.bf16.gmra.mrb[16].mxu0 %vm314_vm2, %v1233_v9  ;;  %v301_v9 = vld [vmem:[%s8489_s1 + $0x78] sm:$0xff] }
  0xf7   :  { %5872 = vmatprep.mubr.msk.bf16.mxu0 %vm314_vm2, %v1234_v11  ;;  %v1689_v11 = vpack.c.bf16 %v1677_v7, %v1677_v7 }
  0xfe   :  { %5873 = vmatmul.mubr.msk.bf16.gmra.mrb[20].mxu0 %vm314_vm2, %v1235_v15  ;;  %v305_v15 = vld [vmem:[%s8489_s1 + $0x98] sm:$0xff] }
  0xff   :  { %5878 = vmatprep.mubr.msk.bf16.mxu0 %vm314_vm2, %v1451_v19  ;;  %v1906_v19 = vpack.c.bf16 %v7163_v25, %v7161_v21  ;;  %v1908_v21 = vpack.c.bf16 %v7181_v40, %v7179_v47  ;;  %v1909_v25 = vpack.c.bf16 %v7192_v48, %v7183_v42  ;;  %v1913_v47 = vpack.c.bf16 %v7220_v30, %v7212_v4  ;;  %v1903_v40 = vld [vmem:[#allocation2 + $0xc1] sm:$0xff] }
 0x100   :  { %v1914_v42 = vpack.c.bf16 %v7224_v54, %v7222_v53  ;;  %v2109_v48 = vld [vmem:[#allocation2 + $0x1a] sm:$0xff]  ;;  %v2118_v53 = vld [vmem:[#allocation2 + $0x62] sm:$0xff] }
 0x101   :  { %v2117_v30 = vld [vmem:[#allocation2 + $0x5a] sm:$0xff] }
 0x106   :  { %5879 = vmatmul.mubr.msk.bf16.vlgmr.msra.gmra.mrb[0].mxu0 %vm314_vm2, %v1452_v27  ;;  %v2183_v27 = vsel %vm448_vm0, %v7241_v10, 0 }
 0x107   :  { %5903 = vmatpush3.bf16.msra.mxu0 %v1729_v34  ;;  %5882 = vmatprep.mubr.msk.bf16.mxu0 %vm314_vm2, %v1453_v33  ;;  %v308_v33 = vld [vmem:[%s8489_s1 + $0xb0] sm:$0xf]  ;;  %v307_v34 = vld [vmem:[%s8489_s1 + $0xa8] sm:$0xff] }
 0x108   :  { %6605 = vmatprep.subr.msk.bf16.mxu0 %vm448_vm0, %v5161_v35  ;;  %v1911_v35 = vpack.c.bf16 %v7206_v1, %v7198_v62  ;;  %v2132_v62 = vpack.c.bf16 %v2110_v49, %v2109_v48  ;;  %v2113_v1 = vld [vmem:[#allocation2 + $0x3a] sm:$0xff] }
 0x109   :  { %v2134_v4 = vpack.c.bf16 %v2114_v2, %v2113_v1 }
 0x10e   :  { %5883 = vmatmul.mubr.msk.bf16.gmra.mrb[4].mxu0 %vm314_vm2, %v1454_v43  ;;  %v1915_v43 = vpack.c.bf16 %v1903_v40, %v7226_v5  ;;  %v2136_v5 = vpack.c.bf16 %v2118_v53, %v2117_v30 }
 0x10f   :  { %5886 = vmatprep.mubr.msk.bf16.mxu0 %vm314_vm2, %v1455_v46  ;;  %v1904_v46 = vld [vmem:[#allocation2 + $0xc9] sm:$0xf] }
 0x110   :  { %v1916_v51 = vpack.c.bf16 %v1904_v46, %v1904_v46 }
 0x116   :  { %5887 = vmatmul.mubr.msk.bf16.gmra.mrb[8].mxu0 %vm314_vm2, %v1456_v63  ;;  %v2111_v63 = vld [vmem:[#allocation2 + $0x2a] sm:$0xff] }
 0x117   :  { %5890 = vmatprep.mubr.msk.bf16.mxu0 %vm314_vm2, %v1457_v0  ;;  %v2112_v0 = vld [vmem:[#allocation2 + $0x32] sm:$0xff] }
 0x118   :  { %v2133_v3 = vpack.c.bf16 %v2112_v0, %v2111_v63 }
 0x11e   :  { %5891 = vmatmul.mubr.msk.bf16.gmra.mrb[12].mxu0 %vm314_vm2, %v1458_v22  ;;  %v2115_v22 = vld [vmem:[#allocation2 + $0x4a] sm:$0xff] }
 0x11f   :  { %5894 = vmatprep.mubr.msk.bf16.mxu0 %vm314_vm2, %v1459_v23  ;;  %v2116_v23 = vld [vmem:[#allocation2 + $0x52] sm:$0xff] }
 0x120   :  { %v2135_v54 = vpack.c.bf16 %v2116_v23, %v2115_v22 }
 0x126   :  { %5895 = vmatmul.mubr.msk.bf16.gmra.mrb[16].mxu0 %vm314_vm2, %v1460_v6  ;;  %v2119_v6 = vld [vmem:[#allocation2 + $0x6a] sm:$0xff] }
 0x127   :  { %5898 = vmatprep.mubr.msk.bf16.mxu0 %vm314_vm2, %v1461_v24  ;;  %v2120_v24 = vld [vmem:[#allocation2 + $0x72] sm:$0xff] }
 0x12e   :  { %5899 = vmatmul.mubr.msk.bf16.gmra.mrb[20].mxu0 %vm314_vm2, %v1462_v56  ;;  %v2122_v56 = vld [vmem:[#allocation2 + $0x82] sm:$0xff] }
 0x12f   :  { %5904 = vmatprep.mubr.msk.bf16.mxu0 %vm314_vm2, %v6980_v17  ;;  %v6625_v17 = vmov 0  }
 0x130   :  { %6618 = vset.pattern.permute.xlu0 %v6625_v17  ;;  %6619 = vset.pattern.permute.xlu1 %v6625_v17  ;;  %v2124_v17 = vld [vmem:[#allocation2 + $0x92] sm:$0xff] }
 0x131   :  { %2338 = vperm.xlu0 %6618, %v286_v16   ;;  %v2123_v16 = vld [vmem:[#allocation2 + $0x8a] sm:$0xff] }
 0x136   :  { %5905 = vmatmul.mubr.msk.bf16.vlgmr.msra.gmra.mrb[0].mxu0 %vm314_vm2, %v6984_v18  ;;  %v287_v18 = vld [vmem:[%s8489_s1 + $0x8] sm:$0xff] }
 0x137   :  { %5929 = vmatpush3.bf16.msra.mxu0 %v1956_v61  ;;  %5908 = vmatprep.mubr.msk.bf16.mxu0 %vm314_vm2, %v7005_v28  ;;  %v288_v28 = vld [vmem:[%s8489_s1 + $0x10] sm:$0xff]  ;;  %v2137_v61 = vpack.c.bf16 %v2120_v24, %v2119_v6 }
 0x138   :  { %6606 = vmatprep.subr.msk.bf16.mxu0 %vm448_vm0, %v7241_v10  ;;  %2343 = vperm.xlu0 %6618, %v287_v18   ;;  %v2138_v10 = vpack.c.bf16 %v2122_v56, %v2121_v32  ;;  %v2125_v18 = vld [vmem:[#allocation2 + $0x9a] sm:$0xff] }
 0x139   :  { %2348 = vperm.xlu1 %6619, %v288_v28   ;;  %v2126_v28 = vld [vmem:[#allocation2 + $0xa2] sm:$0xff] }
 0x13c   :  { %2358 = vperm.xlu0 %6618, %v290_v36   ;;  %v2139_v36 = vpack.c.bf16 %v2124_v17, %v2123_v16 }
 0x13e   :  { %5909 = vmatmul.mubr.msk.bf16.gmra.mrb[4].mxu0 %vm314_vm2, %v7009_v29  ;;  %v289_v29 = vld [vmem:[%s8489_s1 + $0x18] sm:$0xff] }
 0x13f   :  { %5912 = vmatprep.mubr.msk.bf16.mxu0 %vm314_vm2, %v7025_v38  ;;  %2353 = vperm.xlu1 %6619, %v289_v29   ;;  %v291_v38 = vld [vmem:[%s8489_s1 + $0x28] sm:$0xff]  ;;  %v2140_v29 = vpack.c.bf16 %v2126_v28, %v2125_v18 }
 0x140   :  { %2368 = vperm.xlu0 %6618, %v292_v41   ;;  %v2127_v41 = vld [vmem:[#allocation2 + $0xaa] sm:$0xff] }
 0x143   :  { %2363 = vperm.xlu1 %6619, %v291_v38   ;;  %v2128_v38 = vld [vmem:[#allocation2 + $0xb2] sm:$0xff] }
 0x144   :  { %2378 = vperm.xlu0 %6618, %v294_v50   ;;  %v2129_v50 = vld [vmem:[#allocation2 + $0xba] sm:$0xff] }
 0x146   :  { %5913 = vmatmul.mubr.msk.bf16.gmra.mrb[8].mxu0 %vm314_vm2, %v7029_v39  ;;  %v295_v39 = vld [vmem:[%s8489_s1 + $0x48] sm:$0xff] }
 0x147   :  { %5916 = vmatprep.mubr.msk.bf16.mxu0 %vm314_vm2, %v7045_v44  ;;  %2373 = vperm.xlu1 %6619, %v293_v52   ;;  %v1676_v44 = vld [vmem:[#allocation2 + $0xc0] sm:$0xff] }
 0x148   :  { %2388 = vperm.xlu0 %6618, %v296_v57   ;;  %v1688_v31 = vpack.c.bf16 %v1676_v44, %v7146_v8  ;;  %v302_v8 = vld [vmem:[%s8489_s1 + $0x80] sm:$0xff]  ;;  %v2141_v57 = vpack.c.bf16 %v2128_v38, %v2127_v41  ;;  %v2131_v44 = vld [vmem:[#allocation2 + $0xca] sm:$0xf] }
 0x149   :  { %v2130_v52 = vld [vmem:[#allocation2 + $0xc2] sm:$0xff] }
 0x14b   :  { %2383 = vperm.xlu1 %6619, %v295_v39   ;;  %v2142_v39 = vpack.c.bf16 %v2130_v52, %v2129_v50 }
 0x14c   :  { %2398 = vperm.xlu0 %6618, %v298_v58   ;;  %v2143_v58 = vpack.c.bf16 %v2131_v44, %v2131_v44 }
 0x14e   :  { %5917 = vmatmul.mubr.msk.bf16.gmra.mrb[12].mxu0 %vm314_vm2, %v7049_v45  ;;  %v300_v45 = vld [vmem:[%s8489_s1 + $0x70] sm:$0xff] }
 0x14f   :  { %5920 = vmatprep.mubr.msk.bf16.mxu0 %vm314_vm2, %v7065_v55  ;;  %2393 = vperm.xlu1 %6619, %v297_v60   ;;  %v299_v55 = vld [vmem:[%s8489_s1 + $0x68] sm:$0xff]  ;;  %v5187_v60 = vld [vmem:[%s8490_s3 + $0x4] sm:$0xf] }
 0x150   :  { %2408 = vperm.xlu0 %6618, %v300_v45   ;;  %6607 = vmatprep.subr.msk.bf16.mxu1 %vm2847_vm4, %v5187_v60 }
 0x153   :  { %2403 = vperm.xlu1 %6619, %v299_v55   ;;  %v7392_v55 = vld [vmem:[%s8490_s3] sm:$0xf] }
 0x154   :  { %2418 = vperm.xlu0 %6618, %v302_v8  }
 0x156   :  { %5921 = vmatmul.mubr.msk.bf16.gmra.mrb[16].mxu0 %vm314_vm2, %v7069_v59  ;;  %v304_v59 = vld [vmem:[%s8489_s1 + $0x90] sm:$0xff] }
 0x157   :  { %5924 = vmatprep.mubr.msk.bf16.mxu0 %vm314_vm2, %v1688_v31  ;;  %2413 = vperm.xlu1 %6619, %v301_v9   ;;  %v2849_v31 = vsel %vm2847_vm4, %v5187_v60, 0 }
 0x158   :  { %2428 = vperm.xlu0 %6618, %v304_v59   ;;  %5981 = vmatpush3.bf16.msra.mxu1 %v2849_v31 }
 0x159   :  { %6608 = vmatprep.subr.msk.bf16.mxu1 %vm2847_vm4, %v7392_v55 }
 0x15b   :  { %2423 = vperm.xlu1 %6619, %v303_v13  }
 0x15c   :  { %2438 = vperm.xlu0 %6618, %v306_v14  }
 0x15e   :  { %5925 = vmatmul.mubr.msk.bf16.gmra.mrb[20].mxu0 %vm314_vm2, %v1689_v11 }
 0x15f   :  { %5930 = vmatprep.mubr.msk.bf16.mxu0 %vm314_vm2, %v1905_v12  ;;  %2433 = vperm.xlu1 %6619, %v305_v15  }
 0x160   :  { %2448 = vperm.xlu0 %6618, %v308_v33  }
 0x163   :  { %2443 = vperm.xlu1 %6619, %v307_v34  }
 0x166   :  { %5931 = vmatmul.mubr.msk.bf16.vlgmr.msra.gmra.mrb[0].mxu0 %vm314_vm2, %v1906_v19 }
 0x167   :  { %5955 = vmatpush3.bf16.msra.mxu0 %v2183_v27  ;;  %5934 = vmatprep.mubr.msk.bf16.mxu0 %vm314_vm2, %v1907_v20 }
 0x16e   :  { %5935 = vmatmul.mubr.msk.bf16.gmra.mrb[4].mxu0 %vm314_vm2, %v1908_v21 }
 0x16f   :  { %5938 = vmatprep.mubr.msk.bf16.mxu0 %vm314_vm2, %v1909_v25 }
 0x176   :  { %5939 = vmatmul.mubr.msk.bf16.gmra.mrb[8].mxu0 %vm314_vm2, %v1910_v26 }
 0x177   :  { %5942 = vmatprep.mubr.msk.bf16.mxu0 %vm314_vm2, %v1911_v35 }
 0x17e   :  { %5943 = vmatmul.mubr.msk.bf16.gmra.mrb[12].mxu0 %vm314_vm2, %v1912_v37 }
 0x17f   :  { %5946 = vmatprep.mubr.msk.bf16.mxu0 %vm314_vm2, %v1913_v47 }
 0x186   :  { %5947 = vmatmul.mubr.msk.bf16.gmra.mrb[16].mxu0 %vm314_vm2, %v1914_v42 }
 0x187   :  { %5950 = vmatprep.mubr.msk.bf16.mxu0 %vm314_vm2, %v1915_v43 }
 0x18e   :  { %5951 = vmatmul.mubr.msk.bf16.gmra.mrb[20].mxu0 %vm314_vm2, %v1916_v51 }
 0x18f   :  { %5956 = vmatprep.mubr.msk.bf16.mxu0 %vm314_vm2, %v2132_v62 }
 0x196   :  { %5957 = vmatmul.mubr.msk.bf16.vlgmr.msra.gmra.mrb[0].mxu0 %vm314_vm2, %v2133_v3 }
 0x197   :  { %5960 = vmatprep.mubr.msk.bf16.mxu0 %vm314_vm2, %v2134_v4 }
 0x19e   :  { %5961 = vmatmul.mubr.msk.bf16.gmra.mrb[4].mxu0 %vm314_vm2, %v2135_v54 }
 0x19f   :  { %5964 = vmatprep.mubr.msk.bf16.mxu0 %vm314_vm2, %v2136_v5 }
 0x1a6   :  { %5965 = vmatmul.mubr.msk.bf16.gmra.mrb[8].mxu0 %vm314_vm2, %v2137_v61 }
 0x1a7   :  { %5968 = vmatprep.mubr.msk.bf16.mxu0 %vm314_vm2, %v2138_v10 }
 0x1ae   :  { %5969 = vmatmul.mubr.msk.bf16.gmra.mrb[12].mxu0 %vm314_vm2, %v2139_v36 }
 0x1af   :  { %5972 = vmatprep.mubr.msk.bf16.mxu0 %vm314_vm2, %v2140_v29 }
 0x1b0   :  { %v7387_v45 = vpop.permute.xlu0 %2338 }
 0x1b1   :  { %8557 = vst [vmem:[#allocation3_spill] sm:$0xff] %v7387_v45 }
 0x1b6   :  { %5973 = vmatmul.mubr.msk.bf16.gmra.mrb[16].mxu0 %vm314_vm2, %v2141_v57 }
 0x1b7   :  { %5976 = vmatprep.mubr.msk.bf16.mxu0 %vm314_vm2, %v2142_v39  ;;  %v7396_v7 = vpop.permute.xlu0 %2343 }
 0x1b8   :  { %8558 = vst [vmem:[#allocation4_spill] sm:$0xff] %v7396_v7  ;;  %v7398_v8 = vpop.permute.xlu1 %2348 }
 0x1b9   :  { %8559 = vst [vmem:[#allocation5_spill] sm:$0xff] %v7398_v8 }
 0x1bb   :  { %v7400_v9 = vpop.permute.xlu0 %2358 }
 0x1bc   :  { %8560 = vst [vmem:[#allocation6_spill] sm:$0xff] %v7400_v9 }
 0x1be   :  { %5977 = vmatmul.mubr.msk.bf16.gmra.mrb[20].mxu0 %vm314_vm2, %v2143_v58  ;;  %v7402_v11 = vpop.permute.xlu1 %2353 }
 0x1bf   :  { %8561 = vst [vmem:[#allocation7_spill] sm:$0xff] %v7402_v11  ;;  %v7404_v12 = vpop.permute.xlu0 %2368 }
 0x1c0   :  { %8562 = vst [vmem:[#allocation8_spill] sm:$0xff] %v7404_v12 }
 0x1c2   :  { %v7406_v59 = vpop.permute.xlu1 %2363 }
 0x1c3   :  { %8563 = vst [vmem:[#allocation9_spill] sm:$0xff] %v7406_v59  ;;  %v7408_v13 = vpop.permute.xlu0 %2378 }
 0x1c4   :  { %8564 = vst [vmem:[#allocation10_spill] sm:$0xff] %v7408_v13 }
 0x1c6   :  { %v7410_v14 = vpop.permute.xlu1 %2373 }
 0x1c7   :  { %8565 = vst [vmem:[#allocation11_spill] sm:$0xff] %v7410_v14  ;;  %v7428_v35 = vpop.permute.xlu0 %2388 }
 0x1c8   :  { %8566 = vst [vmem:[#allocation12_spill] sm:$0xff] %v7428_v35 }
 0x1ca   :  { %v7430_v37 = vpop.permute.xlu1 %2383 }
 0x1cb   :  { %8567 = vst [vmem:[#allocation13_spill] sm:$0xff] %v7430_v37  ;;  %v7447_v30 = vpop.permute.xlu0 %2398 }
 0x1cc   :  { %8568 = vst [vmem:[#allocation14_spill] sm:$0xff] %v7447_v30 }
 0x1ce   :  { %v7453_v24 = vpop.permute.xlu1 %2393 }
 0x1cf   :  { %8569 = vst [vmem:[#allocation15_spill] sm:$0xff] %v7453_v24  ;;  %v7466_v39 = vpop.permute.xlu0 %2408 }
 0x1d0   :  { %8570 = vst [vmem:[#allocation16_spill] sm:$0xff] %v7466_v39 }
 0x269   :  { %v7412_v15 = vpop.f32.mrb[0].mxu0 }
 0x26a   :  { %v7414_v19 = vpop.f32.mrb[1].mxu0  ;;  %v2453_v20 = vmul.f32 %v7412_v15, %v7398_v8 }
 0x26b   :  { %v2451_v27 = vmul.f32 %v7387_v45, %v7414_v19  ;;  %v7420_v33 = vpop.f32.mrb[2].mxu0 }
 0x26c   :  { %v7422_v34 = vpop.f32.mrb[3].mxu0  ;;  %v2454_v25 = vmul.f32 %v7420_v33, %v7402_v11  ;;  %v2529_v47 = vmul.f32 %v2453_v20, %v2453_v20  ;;  %v2477_v48 = vsel %vm309_vm1, %v2453_v20, 0.0  ;;  %v7471_v20 = vpop.permute.xlu1 %2403 }
 0x26d   :  { %v2527_v21 = vmul.f32 %v2451_v27, %v2451_v27  ;;  %v2452_v26 = vmul.f32 %v7396_v7, %v7422_v34  ;;  %v2474_v40 = vsel %vm309_vm1, %v2451_v27, 0.0  ;;  %8571 = vst [vmem:[#allocation17_spill] sm:$0xff] %v7471_v20 }
 0x26e   :  { %v2530_v51 = vmul.f32 %v2454_v25, %v2454_v25  ;;  %v2553_v3 = vsel %vm309_vm1, %v2529_v47, 0.0  ;;  %v2479_v4 = vsel %vm309_vm1, %v2454_v25, 0.0 }
 0x26f   :  { %v2475_v42 = vsel %vm309_vm1, %v2452_v26, 0.0  ;;  %v2528_v43 = vmul.f32 %v2452_v26, %v2452_v26  ;;  %v2550_v49 = vsel %vm309_vm1, %v2527_v21, 0.0 }
 0x270   :  { %v2476_v46 = vadd.f32 %v2475_v42, %v2474_v40  ;;  %v2555_v32 = vsel %vm309_vm1, %v2530_v51, 0.0 }
 0x271   :  { %v2551_v62 = vsel %vm309_vm1, %v2528_v43, 0.0  ;;  %v7437_v63 = vpop.f32.mrb[4].mxu0 }
 0x272   :  { %v2478_v0 = vadd.f32 %v2477_v48, %v2476_v46  ;;  %v2552_v1 = vadd.f32 %v2551_v62, %v2550_v49  ;;  %v7439_v2 = vpop.f32.mrb[5].mxu0  ;;  %v2457_v54 = vmul.f32 %v7437_v63, %v7404_v12 }
 0x273   :  { %v2455_v22 = vmul.f32 %v7400_v9, %v7439_v2  ;;  %v7445_v23 = vpop.f32.mrb[6].mxu0 }
 0x274   :  { %v2554_v53 = vadd.f32 %v2553_v3, %v2552_v1  ;;  %v2480_v5 = vadd.f32 %v2479_v4, %v2478_v0  ;;  %v7451_v6 = vpop.f32.mrb[7].mxu0  ;;  %v2458_v18 = vmul.f32 %v7445_v23, %v7410_v14  ;;  %v2533_v29 = vmul.f32 %v2457_v54, %v2457_v54 }
 0x275   :  { %v2481_v56 = vsel %vm309_vm1, %v2455_v22, 0.0  ;;  %v2531_v61 = vmul.f32 %v2455_v22, %v2455_v22  ;;  %v2456_v10 = vmul.f32 %v7406_v59, %v7451_v6  ;;  %v2485_v52 = vsel %vm309_vm1, %v2457_v54, 0.0  ;;  %v7491_v54 = vpop.permute.xlu0 %2418 }
 0x276   :  { %v2482_v16 = vadd.f32 %v2481_v56, %v2480_v5  ;;  %v2556_v17 = vadd.f32 %v2555_v32, %v2554_v53  ;;  %v2534_v44 = vmul.f32 %v2458_v18, %v2458_v18  ;;  %v2487_v27 = vsel %vm309_vm1, %v2458_v18, 0.0  ;;  %8572 = vst [vmem:[#allocation18_spill] sm:$0xff] %v7491_v54  ;;  %v7493_v56 = vpop.permute.xlu1 %2413 }
 0x277   :  { %v2557_v28 = vsel %vm309_vm1, %v2531_v61, 0.0  ;;  %v2483_v36 = vsel %vm309_vm1, %v2456_v10, 0.0  ;;  %v2532_v50 = vmul.f32 %v2456_v10, %v2456_v10  ;;  %v2561_v47 = vsel %vm309_vm1, %v2533_v29, 0.0  ;;  %8573 = vst [vmem:[#allocation19_spill] sm:$0xff] %v7493_v56 }
 0x278   :  { %v2558_v41 = vadd.f32 %v2557_v28, %v2556_v17  ;;  %v2484_v38 = vadd.f32 %v2483_v36, %v2482_v16  ;;  %v2563_v62 = vsel %vm309_vm1, %v2534_v44, 0.0 }
 0x279   :  { %v7464_v57 = vpop.f32.mrb[8].mxu0  ;;  %v2559_v60 = vsel %vm309_vm1, %v2532_v50, 0.0 }
 0x27a   :  { %v2486_v58 = vadd.f32 %v2485_v52, %v2484_v38  ;;  %v7469_v31 = vpop.f32.mrb[9].mxu0  ;;  %v2560_v21 = vadd.f32 %v2559_v60, %v2558_v41  ;;  %v2461_v40 = vmul.f32 %v7464_v57, %v7428_v35 }
 0x27b   :  { %v2459_v25 = vmul.f32 %v7408_v13, %v7469_v31  ;;  %v7476_v26 = vpop.f32.mrb[10].mxu0 }
 0x27c   :  { %v2488_v42 = vadd.f32 %v2487_v27, %v2486_v58  ;;  %v7481_v43 = vpop.f32.mrb[11].mxu0  ;;  %v2562_v46 = vadd.f32 %v2561_v47, %v2560_v21  ;;  %v2462_v1 = vmul.f32 %v7476_v26, %v7453_v24  ;;  %v2537_v5 = vmul.f32 %v2461_v40, %v2461_v40 }
 0x27d   :  { %v2489_v48 = vsel %vm309_vm1, %v2459_v25, 0.0  ;;  %v2535_v49 = vmul.f32 %v2459_v25, %v2459_v25  ;;  %v2460_v51 = vmul.f32 %v7430_v37, %v7481_v43  ;;  %v2493_v61 = vsel %vm309_vm1, %v2461_v40, 0.0 }
 0x27e   :  { %v2490_v0 = vadd.f32 %v2489_v48, %v2488_v42  ;;  %v2564_v3 = vadd.f32 %v2563_v62, %v2562_v46  ;;  %v2538_v18 = vmul.f32 %v2462_v1, %v2462_v1  ;;  %v2495_v29 = vsel %vm309_vm1, %v2462_v1, 0.0  ;;  %v7517_v48 = vpop.permute.xlu0 %2428 }
 0x27f   :  { %v2565_v4 = vsel %vm309_vm1, %v2535_v49, 0.0  ;;  %v2491_v22 = vsel %vm309_vm1, %v2460_v51, 0.0  ;;  %v2536_v53 = vmul.f32 %v2460_v51, %v2460_v51  ;;  %v2569_v52 = vsel %vm309_vm1, %v2537_v5, 0.0  ;;  %8574 = vst [vmem:[#allocation20_spill] sm:$0xff] %v7517_v48  ;;  %v7519_v49 = vpop.permute.xlu1 %2423 }
 0x280   :  { %v2492_v32 = vadd.f32 %v2491_v22, %v2490_v0  ;;  %v2566_v10 = vadd.f32 %v2565_v4, %v2564_v3  ;;  %v2571_v40 = vsel %vm309_vm1, %v2538_v18, 0.0  ;;  %8575 = vst [vmem:[#allocation21_spill] sm:$0xff] %v7519_v49 }
 0x281   :  { %v2567_v16 = vsel %vm309_vm1, %v2536_v53, 0.0  ;;  %v7497_v17 = vpop.f32.mrb[12].mxu0 }
 0x282   :  { %v2494_v28 = vadd.f32 %v2493_v61, %v2492_v32  ;;  %v7499_v36 = vpop.f32.mrb[13].mxu0  ;;  %v2568_v41 = vadd.f32 %v2567_v16, %v2566_v10  ;;  %v2465_v44 = vmul.f32 %v7497_v17, %v7466_v39 }
 0x283   :  { %v2463_v38 = vmul.f32 %v7447_v30, %v7499_v36  ;;  %v7504_v50 = vpop.f32.mrb[14].mxu0 }
 0x284   :  { %v2496_v58 = vadd.f32 %v2495_v29, %v2494_v28  ;;  %v7509_v60 = vpop.f32.mrb[15].mxu0  ;;  %v2570_v27 = vadd.f32 %v2569_v52, %v2568_v41  ;;  %v2466_v46 = vmul.f32 %v7504_v50, %v7493_v56  ;;  %v2541_v3 = vmul.f32 %v2465_v44, %v2465_v44 }
 0x285   :  { %v2497_v21 = vsel %vm309_vm1, %v2463_v38, 0.0  ;;  %v2539_v25 = vmul.f32 %v2463_v38, %v2463_v38  ;;  %v2464_v47 = vmul.f32 %v7471_v20, %v7509_v60  ;;  %v2501_v22 = vsel %vm309_vm1, %v2465_v44, 0.0 }
 0x286   :  { %v2498_v42 = vadd.f32 %v2497_v21, %v2496_v58  ;;  %v2572_v51 = vadd.f32 %v2571_v40, %v2570_v27  ;;  %v2542_v61 = vmul.f32 %v2466_v46, %v2466_v46  ;;  %v2503_v18 = vsel %vm309_vm1, %v2466_v46, 0.0  ;;  %v7539_v27 = vpop.permute.xlu0 %2438  ;;  %v7541_v21 = vpop.permute.xlu1 %2433 }
 0x287   :  { %v2573_v62 = vsel %vm309_vm1, %v2539_v25, 0.0  ;;  %v2499_v0 = vsel %vm309_vm1, %v2464_v47, 0.0  ;;  %v2540_v1 = vmul.f32 %v2464_v47, %v2464_v47  ;;  %v2577_v38 = vsel %vm309_vm1, %v2541_v3, 0.0  ;;  %8576 = vst [vmem:[#allocation22_spill] sm:$0xff] %v7539_v27  ;;  %8577 = vst [vmem:[#allocation23_spill] sm:$0xff] %v7541_v21 }
 0x288   :  { %v2500_v4 = vadd.f32 %v2499_v0, %v2498_v42  ;;  %v2574_v53 = vadd.f32 %v2573_v62, %v2572_v51  ;;  %v2579_v46 = vsel %vm309_vm1, %v2542_v61, 0.0 }
 0x289   :  { %v2575_v5 = vsel %vm309_vm1, %v2540_v1, 0.0  ;;  %v7525_v32 = vpop.f32.mrb[16].mxu0 }
 0x28a   :  { %v2502_v10 = vadd.f32 %v2501_v22, %v2500_v4  ;;  %v7527_v16 = vpop.f32.mrb[17].mxu0  ;;  %v2576_v28 = vadd.f32 %v2575_v5, %v2574_v53  ;;  %v2469_v52 = vmul.f32 %v7525_v32, %v7517_v48 }
 0x28b   :  { %v2467_v29 = vmul.f32 %v7491_v54, %v7527_v16  ;;  %v7532_v41 = vpop.f32.mrb[18].mxu0 }
 0x28c   :  { %v2504_v44 = vadd.f32 %v2503_v18, %v2502_v10  ;;  %v7537_v58 = vpop.f32.mrb[19].mxu0  ;;  %v2578_v25 = vadd.f32 %v2577_v38, %v2576_v28  ;;  %v2470_v62 = vmul.f32 %v7532_v41, %v7541_v21  ;;  %v2545_v22 = vmul.f32 %v2469_v52, %v2469_v52 }
 0x28d   :  { %v2505_v47 = vsel %vm309_vm1, %v2467_v29, 0.0  ;;  %v2543_v40 = vmul.f32 %v2467_v29, %v2467_v29  ;;  %v2468_v42 = vmul.f32 %v7519_v49, %v7537_v58  ;;  %v2509_v5 = vsel %vm309_vm1, %v2469_v52, 0.0 }
 0x28e   :  { %v2506_v51 = vadd.f32 %v2505_v47, %v2504_v44  ;;  %v2580_v0 = vadd.f32 %v2579_v46, %v2578_v25  ;;  %v2546_v61 = vmul.f32 %v2470_v62, %v2470_v62  ;;  %v7557_v44 = vpop.permute.xlu0 %2448  ;;  %v2511_v25 = vsel %vm309_vm1, %v2470_v62, 0.0  ;;  %v7562_v46 = vpop.permute.xlu1 %2443 }
 0x28f   :  { %v2581_v1 = vsel %vm309_vm1, %v2543_v40, 0.0  ;;  %v2507_v3 = vsel %vm309_vm1, %v2468_v42, 0.0  ;;  %v2544_v4 = vmul.f32 %v2468_v42, %v2468_v42  ;;  %8579 = vst [vmem:[#allocation25_spill] sm:$0xff] %v7557_v44  ;;  %8580 = vst [vmem:[#allocation26_spill] sm:$0xff] %v7562_v46  ;;  %v2585_v52 = vsel %vm309_vm1, %v2545_v22, 0.0 }
 0x290   :  { %v2508_v53 = vadd.f32 %v2507_v3, %v2506_v51  ;;  %v2582_v10 = vadd.f32 %v2581_v1, %v2580_v0 }
 0x291   :  { %v2583_v18 = vsel %vm309_vm1, %v2544_v4, 0.0  ;;  %v7553_v28 = vpop.f32.mrb[20].mxu0 }
 0x292   :  { %8578 = vst [vmem:[#allocation24_spill] sm:$0xff] %v7553_v28  ;;  %v2510_v29 = vadd.f32 %v2509_v5, %v2508_v53  ;;  %v7555_v38 = vpop.f32.mrb[21].mxu0  ;;  %v2584_v47 = vadd.f32 %v2583_v18, %v2582_v10  ;;  %v2473_v51 = vmul.f32 %v7553_v28, %v7557_v44  ;;  %v2587_v5 = vsel %vm309_vm1, %v2546_v61, 0.0 }
 0x293   :  { %v2471_v40 = vmul.f32 %v7539_v27, %v7555_v38  ;;  %v5979_v42 = vpop.f32.mrb[22].mxu0 }
 0x294   :  { %v2512_v0 = vadd.f32 %v2511_v25, %v2510_v29  ;;  %v2302_v1 = vpop.f32.mrb[23].mxu0  ;;  %v2586_v3 = vadd.f32 %v2585_v52, %v2584_v47  ;;  %v2549_v21 = vmul.f32 %v2473_v51, %v2473_v51  ;;  %v2518_v29 = vsel %vm2517_vm5, %v2473_v51, 0.0 }
 0x295   :  { %v2513_v4 = vsel %vm309_vm1, %v2471_v40, 0.0  ;;  %v2547_v53 = vmul.f32 %v2471_v40, %v2471_v40  ;;  %v2472_v62 = vmul.f32 %v7562_v46, %v2302_v1 }
 0x296   :  { %v2514_v10 = vadd.f32 %v2513_v4, %v2512_v0  ;;  %v2588_v18 = vadd.f32 %v2587_v5, %v2586_v3  ;;  %v2593_v28 = vsel %vm2517_vm5, %v2549_v21, 0.0  ;;  %v2612_v21 = vlaneseq }
 0x297   :  { %v2589_v42 = vsel %vm309_vm1, %v2547_v53, 0.0  ;;  %v2515_v22 = vsel %vm309_vm1, %v2472_v62, 0.0  ;;  %v2548_v27 = vmul.f32 %v2472_v62, %v2472_v62 }
 0x298   :  { %v2516_v44 = vadd.f32 %v2515_v22, %v2514_v10  ;;  %v2590_v25 = vadd.f32 %v2589_v42, %v2588_v18 }
 0x299   :  { %v2591_v47 = vsel %vm309_vm1, %v2548_v27, 0.0 }
 0x29a   :  { %v2519_v40 = vadd.f32 %v2518_v29, %v2516_v44  ;;  %v2592_v52 = vadd.f32 %v2591_v47, %v2590_v25  ;;  %v2613_v25 = vshrl.u32 %v2612_v21, 7 }
 0x29c   :  { %v2520_v61 = vrot.slane %v2519_v40, 4  ;;  %v2594_v48 = vadd.f32 %v2593_v28, %v2592_v52  ;;  %v2604_v28 = vld [vmem:[%s8491_s4] sm:$0x1] }
 0x29e   :  { %v2521_v0 = vadd.f32 %v2520_v61, %v2519_v40  ;;  %v2595_v3 = vrot.slane %v2594_v48, 4 }
 0x2a0   :  { %v2522_v4 = vrot.slane %v2521_v0, 2  ;;  %v2596_v53 = vadd.f32 %v2595_v3, %v2594_v48  ;;  %v7578_v48 = vsub.s32 0, %v2613_v25 }
 0x2a2   :  { %v2523_v5 = vadd.f32 %v2522_v4, %v2521_v0  ;;  %v2597_v49 = vrot.slane %v2596_v53, 2  ;;  %8581 = vst [vmem:[#allocation27_spill] sm:$0xff] %v7578_v48 }
 0x2a4   :  { %v2524_v62 = vrot.slane %v2523_v5, 1  ;;  %v2598_v54 = vadd.f32 %v2597_v49, %v2596_v53  ;;  %v2608_v49 = vld [vmem:[%s8492_s5] sm:$0x1] }
 0x2a6   :  { %v2525_v10 = vadd.f32 %v2524_v62, %v2523_v5  ;;  %v2599_v22 = vrot.slane %v2598_v54, 1 }
 0x2a8   :  { %v2526_v51 = vmul.f32 0.0078125, %v2525_v10  ;;  %v2600_v18 = vadd.f32 %v2599_v22, %v2598_v54 }
 0x2aa   :  { %v2602_v42 = vmul.f32 %v2526_v51, %v2526_v51  ;;  %v2601_v27 = vmul.f32 0.0078125, %v2600_v18 }
 0x2ac   :  { %v2603_v44 = vsub.f32 %v2601_v27, %v2602_v42 }
 0x2ae   :  { %v2605_v29 = vadd.f32 1e-05, %v2603_v44 }
 0x2b0   :  { %6620 = vrsqrt.f32 %v2605_v29 }
 0x2ba   :  { %v6621_v47 = vpop.eup %6620 }
 0x2bb   :  { %v2607_v40 = vmul.f32 %v6621_v47, %v2604_v28 }
 0x2bd   :  { %v2609_v54 = vmul.f32 %v2607_v40, %v2526_v51  ;;  %v7584_v52 = vrot.slane %v2607_v40, %v7578_v48 }
 0x2bf   :  { %v2610_v61 = vsub.f32 %v2608_v49, %v2609_v54  ;;  %v2638_v0 = vmul.f32 %v7584_v52, %v2302_v1  ;;  %v2617_v3 = vmul.f32 %v7584_v52, %v7414_v19  ;;  %v2618_v4 = vmul.f32 %v7584_v52, %v7422_v34 }
 0x2c0   :  { %v2619_v53 = vmul.f32 %v7412_v15, %v7584_v52  ;;  %v2620_v5 = vmul.f32 %v7420_v33, %v7584_v52  ;;  %v2621_v62 = vmul.f32 %v7584_v52, %v7439_v2  ;;  %v2622_v10 = vmul.f32 %v7584_v52, %v7451_v6 }
 0x2c1   :  { %v7600_v1 = vrot.slane %v2610_v61, %v7578_v48  ;;  %v2623_v19 = vmul.f32 %v7437_v63, %v7584_v52  ;;  %v2624_v34 = vmul.f32 %v7445_v23, %v7584_v52  ;;  %v2625_v15 = vmul.f32 %v7584_v52, %v7469_v31 }
 0x2c2   :  { %v2626_v33 = vmul.f32 %v7584_v52, %v7481_v43  ;;  %v2627_v2 = vmul.f32 %v7464_v57, %v7584_v52  ;;  %v2628_v6 = vmul.f32 %v7476_v26, %v7584_v52  ;;  %v2629_v22 = vmul.f32 %v7584_v52, %v7499_v36 }
 0x2c3   :  { %v2667_v63 = vadd.f32 %v7600_v1, %v2638_v0  ;;  %v2646_v51 = vadd.f32 %v7600_v1, %v2617_v3  ;;  %v2647_v23 = vadd.f32 %v7600_v1, %v2618_v4  ;;  %v2648_v31 = vadd.f32 %v7600_v1, %v2619_v53 }
 0x2c4   :  { %v2649_v18 = vadd.f32 %v7600_v1, %v2620_v5  ;;  %v2650_v43 = vadd.f32 %v7600_v1, %v2621_v62  ;;  %v2651_v57 = vadd.f32 %v7600_v1, %v2622_v10  ;;  %v2652_v42 = vadd.f32 %v7600_v1, %v2623_v19 }
 0x2c5   :  { %v2690_v26 = vmax.f32 %v2667_v63, 0.0  ;;  %v2669_v27 = vmax.f32 %v2646_v51, 0.0  ;;  %v2670_v44 = vmax.f32 %v2647_v23, 0.0  ;;  %v2671_v36 = vmax.f32 %v2648_v31, 0.0 }
 0x2c6   :  { %v2672_v29 = vmax.f32 %v2649_v18, 0.0  ;;  %v2673_v21 = vmax.f32 %v2650_v43, 0.0  ;;  %v2674_v25 = vmax.f32 %v2651_v57, 0.0  ;;  %v2675_v28 = vmax.f32 %v2652_v42, 0.0 }
 0x2c7   :  { %v2713_v47 = vmul.f32 %v2690_v26, %v7562_v46  ;;  %v2692_v40 = vmul.f32 %v2669_v27, %v7387_v45  ;;  %v2693_v49 = vmul.f32 %v2670_v44, %v7396_v7  ;;  %v2694_v54 = vmul.f32 %v2671_v36, %v7398_v8  ;;  %v2774_v26 = vld [vmem:[#allocation2 + $0x7] sm:$0xff] }
 0x2c8   :  { %v2695_v61 = vmul.f32 %v2672_v29, %v7402_v11  ;;  %v2696_v0 = vmul.f32 %v2673_v21, %v7400_v9  ;;  %v2697_v3 = vmul.f32 %v2674_v25, %v7406_v59  ;;  %v2698_v4 = vmul.f32 %v2675_v28, %v7404_v12 }
 0x2c9   :  { %2736 = vst.msk [vmem:[#allocation2 + $0xb8] sm:$0xff] %vm309_vm1, %v2713_v47  ;;  %2715 = vst.msk [vmem:[#allocation2 + $0x10] sm:$0xff] %vm309_vm1, %v2692_v40  ;;  %v2653_v53 = vadd.f32 %v7600_v1, %v2624_v34  ;;  %v2654_v5 = vadd.f32 %v7600_v1, %v2625_v15  ;;  %v2655_v62 = vadd.f32 %v7600_v1, %v2626_v33 }
 0x2ca   :  { %2716 = vst.msk [vmem:[#allocation2 + $0x18] sm:$0xff] %vm309_vm1, %v2693_v49  ;;  %2717 = vst.msk [vmem:[#allocation2 + $0x20] sm:$0xff] %vm309_vm1, %v2694_v54  ;;  %v2656_v10 = vadd.f32 %v7600_v1, %v2627_v2  ;;  %v2657_v19 = vadd.f32 %v7600_v1, %v2628_v6  ;;  %v2658_v63 = vadd.f32 %v7600_v1, %v2629_v22 }
 0x2cb   :  { %2718 = vst.msk [vmem:[#allocation2 + $0x28] sm:$0xff] %vm309_vm1, %v2695_v61  ;;  %2719 = vst.msk [vmem:[#allocation2 + $0x30] sm:$0xff] %vm309_vm1, %v2696_v0  ;;  %v2630_v34 = vmul.f32 %v7584_v52, %v7509_v60  ;;  %v2631_v15 = vmul.f32 %v7497_v17, %v7584_v52  ;;  %v2676_v33 = vmax.f32 %v2653_v53, 0.0  ;;  %v2677_v2 = vmax.f32 %v2654_v5, 0.0 }
 0x2cc   :  { %2720 = vst.msk [vmem:[#allocation2 + $0x38] sm:$0xff] %vm309_vm1, %v2697_v3  ;;  %2721 = vst.msk [vmem:[#allocation2 + $0x40] sm:$0xff] %vm309_vm1, %v2698_v4  ;;  %v2678_v51 = vmax.f32 %v2655_v62, 0.0  ;;  %v2679_v23 = vmax.f32 %v2656_v10, 0.0  ;;  %v2680_v31 = vmax.f32 %v2657_v19, 0.0  ;;  %v2681_v18 = vmax.f32 %v2658_v63, 0.0 }
 0x2cd   :  { %v2659_v43 = vadd.f32 %v7600_v1, %v2630_v34  ;;  %v2660_v57 = vadd.f32 %v7600_v1, %v2631_v15  ;;  %v2699_v6 = vmul.f32 %v2676_v33, %v7410_v14  ;;  %v2700_v22 = vmul.f32 %v2677_v2, %v7408_v13 }
 0x2ce   :  { %v2701_v42 = vmul.f32 %v2678_v51, %v7430_v37  ;;  %v2702_v60 = vmul.f32 %v2679_v23, %v7428_v35  ;;  %v2703_v17 = vmul.f32 %v2680_v31, %v7453_v24  ;;  %v2704_v27 = vmul.f32 %v2681_v18, %v7447_v30  ;;  %v8582_v31 = vld [vmem:[#allocation18_spill] sm:$0xff] }
 0x2cf   :  { %v2682_v44 = vmax.f32 %v2659_v43, 0.0  ;;  %v2683_v36 = vmax.f32 %v2660_v57, 0.0  ;;  %2722 = vst.msk [vmem:[#allocation2 + $0x48] sm:$0xff] %vm309_vm1, %v2699_v6  ;;  %2723 = vst.msk [vmem:[#allocation2 + $0x50] sm:$0xff] %vm309_vm1, %v2700_v22  ;;  %v2632_v29 = vmul.f32 %v7504_v50, %v7584_v52  ;;  %v2633_v21 = vmul.f32 %v7584_v52, %v7527_v16 }
 0x2d0   :  { %2724 = vst.msk [vmem:[#allocation2 + $0x58] sm:$0xff] %vm309_vm1, %v2701_v42  ;;  %2725 = vst.msk [vmem:[#allocation2 + $0x60] sm:$0xff] %vm309_vm1, %v2702_v60  ;;  %v2634_v25 = vmul.f32 %v7584_v52, %v7537_v58  ;;  %v2635_v28 = vmul.f32 %v7525_v32, %v7584_v52  ;;  %v7670_v47 = vld [vmem:[#allocation2 + $0xf] sm:$0xff]  ;;  %v2636_v58 = vmul.f32 %v7532_v41, %v7584_v52  ;;  %v3016_v5 = vsel %vm2847_vm4, %v7392_v55, 0  ;;  %v7707_v55 = vld [vmem:[%s8490_s3 + $0x8] sm:$0xf] }
 0x2d1   :  { %v7672_v40 = vld [vmem:[#allocation2 + $0x17] sm:$0xff]  ;;  %v7674_v49 = vld [vmem:[#allocation2 + $0x1f] sm:$0xff]  ;;  %2726 = vst.msk [vmem:[#allocation2 + $0x68] sm:$0xff] %vm309_vm1, %v2703_v17  ;;  %2727 = vst.msk [vmem:[#allocation2 + $0x70] sm:$0xff] %vm309_vm1, %v2704_v27  ;;  %v2705_v50 = vmul.f32 %v2682_v44, %v7471_v20  ;;  %v2706_v16 = vmul.f32 %v2683_v36, %v7466_v39  ;;  %v2637_v32 = vmul.f32 %v7584_v52, %v7555_v38 }
 0x2d2   :  { %v2797_v54 = vpack.c.bf16 %v7670_v47, %v2774_v26  ;;  %v2798_v61 = vpack.c.bf16 %v7674_v49, %v7672_v40  ;;  %v7687_v0 = vld [vmem:[#allocation2 + $0x27] sm:$0xff]  ;;  %v7689_v3 = vld [vmem:[#allocation2 + $0x2f] sm:$0xff]  ;;  %v2661_v4 = vadd.f32 %v7600_v1, %v2632_v29  ;;  %v2662_v53 = vadd.f32 %v7600_v1, %v2633_v21  ;;  %v8585_v27 = vld [vmem:[#allocation23_spill] sm:$0xff] }
 0x2d3   :  { %2728 = vst.msk [vmem:[#allocation2 + $0x78] sm:$0xff] %vm309_vm1, %v2705_v50  ;;  %2729 = vst.msk [vmem:[#allocation2 + $0x80] sm:$0xff] %vm309_vm1, %v2706_v16  ;;  %v2663_v41 = vadd.f32 %v7600_v1, %v2634_v25  ;;  %v2664_v38 = vadd.f32 %v7600_v1, %v2635_v28  ;;  %v2665_v62 = vadd.f32 %v7600_v1, %v2636_v58  ;;  %v7711_v51 = vld [vmem:[#allocation2 + $0x37] sm:$0xff]  ;;  %v7715_v57 = vld [vmem:[#allocation2 + $0x3f] sm:$0xff] }
 0x2d4   :  { %5982 = vmatprep.mubr.msk.bf16.mxu1 %vm309_vm1, %v2797_v54  ;;  %v2799_v10 = vpack.c.bf16 %v7689_v3, %v7687_v0  ;;  %v2684_v19 = vmax.f32 %v2661_v4, 0.0  ;;  %v2685_v63 = vmax.f32 %v2662_v53, 0.0  ;;  %v2666_v34 = vadd.f32 %v7600_v1, %v2637_v32  ;;  %v8583_v42 = vld [vmem:[#allocation21_spill] sm:$0xff]  ;;  %v8584_v26 = vld [vmem:[#allocation20_spill] sm:$0xff]  ;;  %v8586_v25 = vld [vmem:[#allocation22_spill] sm:$0xff] }
 0x2d5   :  { %5983 = vmatmul.mubr.msk.bf16.vlgmr.msra.gmra.mrb[0].mxu1 %vm309_vm1, %v2798_v61  ;;  %v2686_v15 = vmax.f32 %v2663_v41, 0.0  ;;  %v2687_v33 = vmax.f32 %v2664_v38, 0.0  ;;  %v2688_v2 = vmax.f32 %v2665_v62, 0.0  ;;  %v7740_v16 = vld [vmem:[#allocation2 + $0x10] sm:$0xff]  ;;  %v7742_v58 = vld [vmem:[#allocation2 + $0x18] sm:$0xff]  ;;  %v7749_v61 = vld [vmem:[#allocation2 + $0x20] sm:$0xff]  ;;  %v2800_v38 = vpack.c.bf16 %v7715_v57, %v7711_v51 }
 0x2d6   :  { %6007 = vmatpush3.bf16.msra.mxu1 %v3016_v5  ;;  %5986 = vmatprep.mubr.msk.bf16.mxu1 %vm309_vm1, %v2799_v10  ;;  %v2707_v23 = vmul.f32 %v2684_v19, %v7493_v56  ;;  %v2708_v18 = vmul.f32 %v2685_v63, %v8582_v31  ;;  %v2689_v43 = vmax.f32 %v2666_v34, 0.0  ;;  %v7717_v6 = vld [vmem:[#allocation2 + $0x47] sm:$0xff]  ;;  %v7719_v22 = vld [vmem:[#allocation2 + $0x4f] sm:$0xff]  ;;  %v7860_v20 = vld [vmem:[#allocation2 + $0x39] sm:$0xff] }
 0x2d7   :  { %v2709_v60 = vmul.f32 %v2686_v15, %v8583_v42  ;;  %v2710_v17 = vmul.f32 %v2687_v33, %v8584_v26  ;;  %v2711_v44 = vmul.f32 %v2688_v2, %v8585_v27  ;;  %6609 = vmatprep.subr.msk.bf16.mxu1 %vm2847_vm4, %v7707_v55  ;;  %v7726_v36 = vld [vmem:[#allocation2 + $0x57] sm:$0xff]  ;;  %v7728_v29 = vld [vmem:[#allocation2 + $0x5f] sm:$0xff]  ;;  %v7751_v4 = vld [vmem:[#allocation2 + $0x28] sm:$0xff]  ;;  %v2801_v19 = vpack.c.bf16 %v7719_v22, %v7717_v6 }
 0x2d8   :  { %v7730_v21 = vld [vmem:[#allocation2 + $0x67] sm:$0xff]  ;;  %2730 = vst.msk [vmem:[#allocation2 + $0x88] sm:$0xff] %vm309_vm1, %v2707_v23  ;;  %2731 = vst.msk [vmem:[#allocation2 + $0x90] sm:$0xff] %vm309_vm1, %v2708_v18  ;;  %v2712_v28 = vmul.f32 %v2689_v43, %v8586_v25  ;;  %v7735_v50 = vld [vmem:[#allocation2 + $0x6f] sm:$0xff] }
 0x2d9   :  { %2732 = vst.msk [vmem:[#allocation2 + $0x98] sm:$0xff] %vm309_vm1, %v2709_v60  ;;  %2733 = vst.msk [vmem:[#allocation2 + $0xa0] sm:$0xff] %vm309_vm1, %v2710_v17  ;;  %v7769_v34 = vld [vmem:[#allocation2 + $0x30] sm:$0xff]  ;;  %v7771_v15 = vld [vmem:[#allocation2 + $0x38] sm:$0xff]  ;;  %v2803_v46 = vpack.c.bf16 %v7735_v50, %v7730_v21 }
 0x2da   :  { %2734 = vst.msk [vmem:[#allocation2 + $0xa8] sm:$0xff] %vm309_vm1, %v2711_v44  ;;  %v7746_v54 = vld [vmem:[#allocation2 + $0x77] sm:$0xff]  ;;  %2735 = vst.msk [vmem:[#allocation2 + $0xb0] sm:$0xff] %vm309_vm1, %v2712_v28  ;;  %v7767_v63 = vld [vmem:[#allocation2 + $0x7f] sm:$0xff] }
 0x2db   :  { %v8587_v2 = vld [vmem:[#allocation24_spill] sm:$0xff]  ;;  %v7782_v60 = vld [vmem:[#allocation2 + $0x48] sm:$0xff]  ;;  %v7784_v17 = vld [vmem:[#allocation2 + $0x50] sm:$0xff]  ;;  %v2804_v30 = vpack.c.bf16 %v7767_v63, %v7746_v54 }
 0x2dc   :  { %v2639_v23 = vmul.f32 %v8587_v2, %v7584_v52  ;;  %v7780_v43 = vld [vmem:[#allocation2 + $0x40] sm:$0xff]  ;;  %v7791_v52 = vld [vmem:[#allocation2 + $0x58] sm:$0xff]  ;;  %v7795_v18 = vld [vmem:[#allocation2 + $0x68] sm:$0xff] }
 0x2dd   :  { %5987 = vmatmul.mubr.msk.bf16.gmra.mrb[4].mxu1 %vm309_vm1, %v2800_v38  ;;  %v7793_v2 = vld [vmem:[#allocation2 + $0x60] sm:$0xff]  ;;  %v8588_v28 = vld [vmem:[#allocation25_spill] sm:$0xff]  ;;  %v7823_v48 = vld [vmem:[#allocation2 + $0x70] sm:$0xff] }
 0x2de   :  { %5990 = vmatprep.mubr.msk.bf16.mxu1 %vm309_vm1, %v2801_v19  ;;  %v2668_v38 = vadd.f32 %v7600_v1, %v2639_v23  ;;  %v2802_v19 = vpack.c.bf16 %v7728_v29, %v7726_v36  ;;  %v7827_v25 = vld [vmem:[#allocation2 + $0x78] sm:$0xff]  ;;  %v7829_v1 = vld [vmem:[#allocation2 + $0x80] sm:$0xff]  ;;  %v7856_v56 = vld [vmem:[#allocation2 + $0x29] sm:$0xff] }
 0x2df   :  { %v7800_v10 = vld [vmem:[#allocation2 + $0x87] sm:$0xff]  ;;  %v7802_v62 = vld [vmem:[#allocation2 + $0x8f] sm:$0xff]  ;;  %v7852_v26 = vld [vmem:[#allocation2 + $0x19] sm:$0xff] }
 0x2e0   :  { %v7808_v44 = vld [vmem:[#allocation2 + $0x97] sm:$0xff]  ;;  %v7810_v41 = vld [vmem:[#allocation2 + $0x9f] sm:$0xff]  ;;  %v2691_v23 = vmax.f32 %v2668_v38, 0.0  ;;  %v7831_v38 = vld [vmem:[#allocation2 + $0x88] sm:$0xff]  ;;  %v2805_v35 = vpack.c.bf16 %v7802_v62, %v7800_v10 }
 0x2e1   :  { %v7812_v5 = vld [vmem:[#allocation2 + $0xa7] sm:$0xff]  ;;  %v7835_v53 = vld [vmem:[#allocation2 + $0x90] sm:$0xff]  ;;  %v7874_v24 = vld [vmem:[#allocation2 + $0x59] sm:$0xff] }
 0x2e2   :  { %v2714_v32 = vmul.f32 %v2691_v23, %v8588_v28  ;;  %v7837_v23 = vld [vmem:[#allocation2 + $0x98] sm:$0xff]  ;;  %v7839_v33 = vld [vmem:[#allocation2 + $0xa0] sm:$0xff]  ;;  %v7846_v42 = vld [vmem:[#allocation2 + $0xa8] sm:$0xff]  ;;  %8591 = vst [vmem:[#allocation29_spill] sm:$0xff] %v7874_v24 }
 0x2e3   :  { %v7854_v31 = vld [vmem:[#allocation2 + $0x21] sm:$0xff]  ;;  %v7858_v28 = vld [vmem:[#allocation2 + $0x31] sm:$0xff]  ;;  %v7866_v39 = vld [vmem:[#allocation2 + $0x49] sm:$0xff] }
 0x2e4   :  { %2737 = vst.msk [vmem:[#allocation2 + $0xc0] sm:$0xf] %vm2517_vm5, %v2714_v32  ;;  %v7864_v27 = vld [vmem:[#allocation2 + $0x41] sm:$0xff]  ;;  %8589 = vst [vmem:[#allocation24_spill] sm:$0xff] %v7866_v39  ;;  %v7868_v32 = vld [vmem:[#allocation2 + $0x51] sm:$0xff] }
 0x2e5   :  { %5991 = vmatmul.mubr.msk.bf16.gmra.mrb[8].mxu1 %vm309_vm1, %v2802_v19  ;;  %8590 = vst [vmem:[#allocation28_spill] sm:$0xff] %v7868_v32  ;;  %v7882_v13 = vld [vmem:[#allocation2 + $0x61] sm:$0xff]  ;;  %v7884_v14 = vld [vmem:[#allocation2 + $0x69] sm:$0xff]  ;;  %v7886_v59 = vld [vmem:[#allocation2 + $0x71] sm:$0xff] }
 0x2e6   :  { %5994 = vmatprep.mubr.msk.bf16.mxu1 %vm309_vm1, %v2803_v46  ;;  %8592 = vst [vmem:[#allocation30_spill] sm:$0xff] %v7882_v13  ;;  %8593 = vst [vmem:[#allocation31_spill] sm:$0xff] %v7884_v14  ;;  %v7889_v19 = vld [vmem:[#allocation2 + $0x79] sm:$0xff]  ;;  %v7891_v12 = vld [vmem:[#allocation2 + $0x81] sm:$0xff]  ;;  %v2806_v14 = vpack.c.bf16 %v7810_v41, %v7808_v44 }
 0x2e7   :  { %8594 = vst [vmem:[#allocation32_spill] sm:$0xff] %v7886_v59  ;;  %8595 = vst [vmem:[#allocation33_spill] sm:$0xff] %v7889_v19  ;;  %v7893_v9 = vld [vmem:[#allocation2 + $0x89] sm:$0xff]  ;;  %v7900_v7 = vld [vmem:[#allocation2 + $0x91] sm:$0xff]  ;;  %v3220_v19 = vsel %vm2847_vm4, %v7707_v55, 0 }
 0x2e8   :  { %8596 = vst [vmem:[#allocation34_spill] sm:$0xff] %v7891_v12  ;;  %8597 = vst [vmem:[#allocation35_spill] sm:$0xff] %v7893_v9  ;;  %v7902_v11 = vld [vmem:[#allocation2 + $0x99] sm:$0xff]  ;;  %v7904_v45 = vld [vmem:[#allocation2 + $0xa1] sm:$0xff] }
 0x2e9   :  { %8598 = vst [vmem:[#allocation36_spill] sm:$0xff] %v7900_v7  ;;  %8599 = vst [vmem:[#allocation37_spill] sm:$0xff] %v7902_v11  ;;  %v7908_v8 = vld [vmem:[#allocation2 + $0xa9] sm:$0xff]  ;;  %v7910_v32 = vld [vmem:[#allocation2 + $0xb1] sm:$0xff] }
 0x2ea   :  { %8600 = vst [vmem:[#allocation38_spill] sm:$0xff] %v7904_v45  ;;  %8601 = vst [vmem:[#allocation39_spill] sm:$0xff] %v7908_v8  ;;  %v7918_v59 = vld [vmem:[#allocation2 + $0xaf] sm:$0xff]  ;;  %v2796_v12 = vld [vmem:[#allocation2 + $0xb7] sm:$0xf] }
 0x2eb   :  { %8602 = vst [vmem:[#allocation40_spill] sm:$0xff] %v7910_v32  ;;  %v2738_v46 = vld [vmem:[#allocation2 + $0x6] sm:$0xff]  ;;  %v2739_v7 = vld [vmem:[#allocation2 + $0xe] sm:$0xff]  ;;  %v2808_v9 = vpack.c.bf16 %v2796_v12, %v2796_v12  ;;  %v2741_v32 = vld [vmem:[#allocation2 + $0x1e] sm:$0xff] }
 0x2ec   :  { %v2761_v37 = vpack.c.bf16 %v2739_v7, %v2738_v46  ;;  %v2742_v8 = vld [vmem:[#allocation2 + $0x26] sm:$0xff]  ;;  %v2743_v45 = vld [vmem:[#allocation2 + $0x2e] sm:$0xff]  ;;  %v2744_v7 = vld [vmem:[#allocation2 + $0x36] sm:$0xff] }
 0x2ed   :  { %5995 = vmatmul.mubr.msk.bf16.gmra.mrb[12].mxu1 %vm309_vm1, %v2804_v30  ;;  %v2807_v30 = vpack.c.bf16 %v7918_v59, %v7812_v5  ;;  %v2746_v12 = vld [vmem:[#allocation2 + $0x46] sm:$0xff]  ;;  %v2753_v13 = vld [vmem:[#allocation2 + $0x7e] sm:$0xff]  ;;  %v2755_v39 = vld [vmem:[#allocation2 + $0x8e] sm:$0xff] }
 0x2ee   :  { %5998 = vmatprep.mubr.msk.bf16.mxu1 %vm309_vm1, %v2805_v35  ;;  %v2740_v35 = vld [vmem:[#allocation2 + $0x16] sm:$0xff]  ;;  %v2750_v55 = vld [vmem:[#allocation2 + $0x66] sm:$0xff] }
 0x2ef   :  { %v2762_v11 = vpack.c.bf16 %v2741_v32, %v2740_v35  ;;  %v2751_v35 = vld [vmem:[#allocation2 + $0x6e] sm:$0xff]  ;;  %v2754_v24 = vld [vmem:[#allocation2 + $0x86] sm:$0xff] }
 0x2f5   :  { %5999 = vmatmul.mubr.msk.bf16.gmra.mrb[16].mxu1 %vm309_vm1, %v2806_v14  ;;  %v2763_v14 = vpack.c.bf16 %v2743_v45, %v2742_v8  ;;  %v2748_v45 = vld [vmem:[#allocation2 + $0x56] sm:$0xff]  ;;  %v2749_v8 = vld [vmem:[#allocation2 + $0x5e] sm:$0xff] }
 0x2f6   :  { %6002 = vmatprep.mubr.msk.bf16.mxu1 %vm309_vm1, %v2807_v30  ;;  %v5225_v30 = vld [vmem:[%s8490_s3 + $0xc] sm:$0xf] }
 0x2fd   :  { %6003 = vmatmul.mubr.msk.bf16.gmra.mrb[20].mxu1 %vm309_vm1, %v2808_v9  ;;  %v2745_v9 = vld [vmem:[#allocation2 + $0x3e] sm:$0xff] }
 0x2fe   :  { %6008 = vmatprep.mubr.msk.bf16.mxu1 %vm309_vm1, %v2761_v37  ;;  %v2747_v37 = vld [vmem:[#allocation2 + $0x4e] sm:$0xff]  ;;  %v2764_v32 = vpack.c.bf16 %v2745_v9, %v2744_v7  ;;  %v2769_v9 = vpack.c.bf16 %v2755_v39, %v2754_v24  ;;  %v7949_v24 = vpack.c.bf16 %v7749_v61, %v7742_v58  ;;  %v3447_v39 = vsel %vm2847_vm4, %v5225_v30, 0 }
 0x2ff   :  { %v2765_v46 = vpack.c.bf16 %v2747_v37, %v2746_v12  ;;  %v2756_v12 = vld [vmem:[#allocation2 + $0x96] sm:$0xff]  ;;  %v2757_v37 = vld [vmem:[#allocation2 + $0x9e] sm:$0xff] }
 0x305   :  { %6009 = vmatmul.mubr.msk.bf16.vlgmr.msra.gmra.mrb[0].mxu1 %vm309_vm1, %v2762_v11  ;;  %v2766_v11 = vpack.c.bf16 %v2749_v8, %v2748_v45  ;;  %v2770_v45 = vpack.c.bf16 %v2757_v37, %v2756_v12  ;;  %v7982_v12 = vpack.c.bf16 %v7823_v48, %v7795_v18  ;;  %v7990_v37 = vpack.c.bf16 %v7829_v1, %v7827_v25 }
 0x306   :  { %6033 = vmatpush3.bf16.msra.mxu1 %v3220_v19  ;;  %6012 = vmatprep.mubr.msk.bf16.mxu1 %vm309_vm1, %v2763_v14  ;;  %v2767_v19 = vpack.c.bf16 %v2751_v35, %v2750_v55  ;;  %v2752_v14 = vld [vmem:[#allocation2 + $0x76] sm:$0xff]  ;;  %v3146_v35 = vld [vmem:[#allocation2 + $0x8] sm:$0xff] }
 0x307   :  { %6610 = vmatprep.subr.msk.bf16.mxu1 %vm2847_vm4, %v5225_v30  ;;  %v2768_v7 = vpack.c.bf16 %v2753_v13, %v2752_v14  ;;  %v2760_v55 = vld [vmem:[#allocation2 + $0xb6] sm:$0xf]  ;;  %v3169_v13 = vpack.c.bf16 %v7740_v16, %v3146_v35  ;;  %v5238_v14 = vld [vmem:[%s8490_s3 + $0x10] sm:$0xf]  ;;  %v7966_v30 = vpack.c.bf16 %v7780_v43, %v7771_v15 }
 0x30d   :  { %6013 = vmatmul.mubr.msk.bf16.gmra.mrb[4].mxu1 %vm309_vm1, %v2764_v32  ;;  %v2758_v32 = vld [vmem:[#allocation2 + $0xa6] sm:$0xff] }
 0x30e   :  { %6016 = vmatprep.mubr.msk.bf16.mxu1 %vm309_vm1, %v2765_v46  ;;  %v2759_v46 = vld [vmem:[#allocation2 + $0xae] sm:$0xff] }
 0x30f   :  { %v2771_v8 = vpack.c.bf16 %v2759_v46, %v2758_v32  ;;  %v7994_v32 = vpack.c.bf16 %v7835_v53, %v7831_v38  ;;  %v3167_v46 = vld [vmem:[#allocation2 + $0xb0] sm:$0xff] }
 0x315   :  { %6017 = vmatmul.mubr.msk.bf16.gmra.mrb[8].mxu1 %vm309_vm1, %v2766_v11  ;;  %v2772_v11 = vpack.c.bf16 %v2760_v55, %v2760_v55  ;;  %v3168_v55 = vld [vmem:[#allocation2 + $0xb8] sm:$0xf] }
 0x316   :  { %6020 = vmatprep.mubr.msk.bf16.mxu1 %vm309_vm1, %v2767_v19  ;;  %v7954_v19 = vpack.c.bf16 %v7769_v34, %v7751_v4  ;;  %v3180_v35 = vpack.c.bf16 %v3168_v55, %v3168_v55  ;;  %v8606_v55 = vpack.c.bf16 %v7711_v51, %v7689_v3  ;;  %v8611_v3 = vpack.c.bf16 %v7800_v10, %v7767_v63  ;;  %v3621_v10 = vld [vmem:[#allocation2 + $0xb8] sm:$0xff] }
 0x317   :  { %v8612_v51 = vpack.c.bf16 %v7808_v44, %v7802_v62  ;;  %v8622_v62 = vpack.c.bf16 %v7837_v23, %v7835_v53  ;;  %v3633_v63 = vpack.c.bf16 %v3621_v10, %v3167_v46  ;;  %v3851_v53 = vpack.c.bf16 %v7856_v56, %v7854_v31  ;;  %v8625_v44 = vld [vmem:[#allocation28_spill] sm:$0xff] }
 0x31d   :  { %6021 = vmatmul.mubr.msk.bf16.gmra.mrb[12].mxu1 %vm309_vm1, %v2768_v7  ;;  %v7970_v7 = vpack.c.bf16 %v7784_v17, %v7782_v60 }
 0x31e   :  { %6024 = vmatprep.mubr.msk.bf16.mxu1 %vm309_vm1, %v2769_v9  ;;  %v7978_v9 = vpack.c.bf16 %v7793_v2, %v7791_v52 }
 0x325   :  { %6025 = vmatmul.mubr.msk.bf16.gmra.mrb[16].mxu1 %vm309_vm1, %v2770_v45  ;;  %v8002_v45 = vpack.c.bf16 %v7839_v33, %v7837_v23 }
 0x326   :  { %6028 = vmatprep.mubr.msk.bf16.mxu1 %vm309_vm1, %v2771_v8  ;;  %v8005_v8 = vpack.c.bf16 %v3167_v46, %v7846_v42  ;;  %v8630_v46 = vld [vmem:[#allocation33_spill] sm:$0xff] }
 0x327   :  { %8603 = vst [vmem:[#allocation41_spill] sm:$0xff] %v8002_v45 }
 0x32d   :  { %6029 = vmatmul.mubr.msk.bf16.gmra.mrb[20].mxu1 %vm309_vm1, %v2772_v11  ;;  %v8604_v11 = vpack.c.bf16 %v7672_v40, %v7670_v47  ;;  %v8607_v47 = vpack.c.bf16 %v7717_v6, %v7715_v57  ;;  %v8608_v40 = vpack.c.bf16 %v7726_v36, %v7719_v22  ;;  %v3394_v57 = vld [vmem:[#allocation2 + $0xb7] sm:$0xff]  ;;  %v8613_v22 = vpack.c.bf16 %v7812_v5, %v7810_v41  ;;  %v3395_v36 = vld [vmem:[#allocation2 + $0xbf] sm:$0xf] }
 0x32e   :  { %6034 = vmatprep.mubr.msk.bf16.mxu1 %vm309_vm1, %v3169_v13  ;;  %v3674_v13 = vsel %vm2847_vm4, %v5238_v14, 0  ;;  %v3406_v6 = vpack.c.bf16 %v3394_v57, %v7918_v59  ;;  %v5264_v59 = vld [vmem:[%s8490_s3 + $0x18] sm:$0xf]  ;;  %v8616_v5 = vpack.c.bf16 %v7771_v15, %v7769_v34  ;;  %v8621_v41 = vpack.c.bf16 %v7831_v38, %v7829_v1  ;;  %v8627_v1 = vld [vmem:[#allocation30_spill] sm:$0xff] }
 0x32f   :  { %v8623_v34 = vpack.c.bf16 %v7846_v42, %v7839_v33  ;;  %v3852_v42 = vpack.c.bf16 %v7860_v20, %v7858_v28  ;;  %v5277_v33 = vld [vmem:[%s8490_s3 + $0x1c] sm:$0xf] }
 0x330   :  { %v8628_v38 = vld [vmem:[#allocation31_spill] sm:$0xff] }
 0x331   :  { %v3855_v23 = vpack.c.bf16 %v8628_v38, %v8627_v1 }
 0x335   :  { %6035 = vmatmul.mubr.msk.bf16.vlgmr.msra.gmra.mrb[0].mxu1 %vm309_vm1, %v7949_v24 }
 0x336   :  { %6059 = vmatpush3.bf16.msra.mxu1 %v3447_v39  ;;  %6038 = vmatprep.mubr.msk.bf16.mxu1 %vm309_vm1, %v7954_v19  ;;  %v5251_v39 = vld [vmem:[%s8490_s3 + $0x14] sm:$0xf] }
 0x337   :  { %6611 = vmatprep.subr.msk.bf16.mxu1 %vm2847_vm4, %v5238_v14  ;;  %v8629_v14 = vld [vmem:[#allocation32_spill] sm:$0xff] }
 0x33d   :  { %6039 = vmatmul.mubr.msk.bf16.gmra.mrb[4].mxu1 %vm309_vm1, %v7966_v30 }
 0x33e   :  { %6042 = vmatprep.mubr.msk.bf16.mxu1 %vm309_vm1, %v7970_v7 }
 0x345   :  { %6043 = vmatmul.mubr.msk.bf16.gmra.mrb[8].mxu1 %vm309_vm1, %v7978_v9 }
 0x346   :  { %6046 = vmatprep.mubr.msk.bf16.mxu1 %vm309_vm1, %v7982_v12 }
 0x34d   :  { %6047 = vmatmul.mubr.msk.bf16.gmra.mrb[12].mxu1 %vm309_vm1, %v7990_v37 }
 0x34e   :  { %6050 = vmatprep.mubr.msk.bf16.mxu1 %vm309_vm1, %v7994_v32 }
 0x355   :  { %6051 = vmatmul.mubr.msk.bf16.gmra.mrb[16].mxu1 %vm309_vm1, %v8002_v45  ;;  %v8605_v45 = vpack.c.bf16 %v7687_v0, %v7674_v49  ;;  %v8609_v49 = vpack.c.bf16 %v7730_v21, %v7728_v29  ;;  %v8610_v0 = vpack.c.bf16 %v7746_v54, %v7735_v50  ;;  %v3407_v29 = vpack.c.bf16 %v3395_v36, %v3395_v36 }
 0x356   :  { %6054 = vmatprep.mubr.msk.bf16.mxu1 %vm309_vm1, %v8005_v8  ;;  %v8614_v21 = vpack.c.bf16 %v7742_v58, %v7740_v16  ;;  %v3901_v50 = vsel %vm2847_vm4, %v5251_v39, 0  ;;  %v8615_v54 = vpack.c.bf16 %v7751_v4, %v7749_v61  ;;  %v8617_v16 = vpack.c.bf16 %v7782_v60, %v7780_v43  ;;  %v8624_v60 = vld [vmem:[#allocation24_spill] sm:$0xff] }
 0x357   :  { %v8618_v58 = vpack.c.bf16 %v7791_v52, %v7784_v17  ;;  %v8619_v61 = vpack.c.bf16 %v7795_v18, %v7793_v2  ;;  %v8620_v4 = vpack.c.bf16 %v7827_v25, %v7823_v48  ;;  %v3622_v48 = vld [vmem:[#allocation2 + $0xc0] sm:$0xf]  ;;  %v3827_v25 = vld [vmem:[#allocation2 + $0x11] sm:$0xff]  ;;  %v4128_v43 = vsel %vm2847_vm4, %v5264_v59, 0  ;;  %v8626_v52 = vld [vmem:[#allocation29_spill] sm:$0xff] }
 0x358   :  { %v3634_v15 = vpack.c.bf16 %v3622_v48, %v3622_v48  ;;  %v3850_v18 = vpack.c.bf16 %v7852_v26, %v3827_v25  ;;  %v3853_v17 = vpack.c.bf16 %v8624_v60, %v7864_v27  ;;  %v3854_v2 = vpack.c.bf16 %v8626_v52, %v8625_v44  ;;  %v4514_v48 = vld [vmem:[#allocation2 + $0x4a] sm:$0xff]  ;;  %v4515_v25 = vld [vmem:[#allocation2 + $0x52] sm:$0xff] }
 0x359   :  { %v4355_v36 = vsel %vm2847_vm4, %v5277_v33, 0 }
 0x35d   :  { %6055 = vmatmul.mubr.msk.bf16.gmra.mrb[20].mxu1 %vm309_vm1, %v3180_v35  ;;  %v8631_v35 = vld [vmem:[#allocation34_spill] sm:$0xff] }
 0x35e   :  { %6060 = vmatprep.mubr.msk.bf16.mxu1 %vm309_vm1, %v8604_v11  ;;  %v8632_v11 = vld [vmem:[#allocation35_spill] sm:$0xff] }
 0x365   :  { %6061 = vmatmul.mubr.msk.bf16.vlgmr.msra.gmra.mrb[0].mxu1 %vm309_vm1, %v8605_v45  ;;  %v3856_v45 = vpack.c.bf16 %v8630_v46, %v8629_v14 }
 0x366   :  { %6085 = vmatpush3.bf16.msra.mxu1 %v3674_v13  ;;  %6064 = vmatprep.mubr.msk.bf16.mxu1 %vm309_vm1, %v8606_v55  ;;  %v3857_v13 = vpack.c.bf16 %v8632_v11, %v8631_v35  ;;  %v8634_v55 = vld [vmem:[#allocation37_spill] sm:$0xff] }
 0x367   :  { %6612 = vmatprep.subr.msk.bf16.mxu1 %vm2847_vm4, %v5251_v39  ;;  %v8633_v39 = vld [vmem:[#allocation36_spill] sm:$0xff] }
 0x36d   :  { %6065 = vmatmul.mubr.msk.bf16.gmra.mrb[4].mxu1 %vm309_vm1, %v8607_v47  ;;  %v3858_v47 = vpack.c.bf16 %v8634_v55, %v8633_v39 }
 0x36e   :  { %6068 = vmatprep.mubr.msk.bf16.mxu1 %vm309_vm1, %v8608_v40  ;;  %v3848_v40 = vld [vmem:[#allocation2 + $0xb9] sm:$0xff] }
 0x375   :  { %6069 = vmatmul.mubr.msk.bf16.gmra.mrb[8].mxu1 %vm309_vm1, %v8609_v49  ;;  %v8635_v49 = vld [vmem:[#allocation38_spill] sm:$0xff] }
 0x376   :  { %6072 = vmatprep.mubr.msk.bf16.mxu1 %vm309_vm1, %v8610_v0  ;;  %v8636_v0 = vld [vmem:[#allocation39_spill] sm:$0xff] }
 0x37d   :  { %6073 = vmatmul.mubr.msk.bf16.gmra.mrb[12].mxu1 %vm309_vm1, %v8611_v3  ;;  %v3859_v3 = vpack.c.bf16 %v8636_v0, %v8635_v49 }
 0x37e   :  { %6076 = vmatprep.mubr.msk.bf16.mxu1 %vm309_vm1, %v8612_v51  ;;  %v8637_v51 = vld [vmem:[#allocation40_spill] sm:$0xff] }
 0x37f   :  { %v3860_v57 = vpack.c.bf16 %v3848_v40, %v8637_v51 }
 0x385   :  { %6077 = vmatmul.mubr.msk.bf16.gmra.mrb[16].mxu1 %vm309_vm1, %v8613_v22 }
 0x386   :  { %6080 = vmatprep.mubr.msk.bf16.mxu1 %vm309_vm1, %v3406_v6  ;;  %v3849_v6 = vld [vmem:[#allocation2 + $0xc1] sm:$0xf] }
 0x387   :  { %v3861_v22 = vpack.c.bf16 %v3849_v6, %v3849_v6 }
 0x38d   :  { %6081 = vmatmul.mubr.msk.bf16.gmra.mrb[20].mxu1 %vm309_vm1, %v3407_v29  ;;  %v5290_v29 = vld [vmem:[%s8490_s3 + $0x20] sm:$0xf] }
 0x38e   :  { %6086 = vmatprep.mubr.msk.bf16.mxu1 %vm309_vm1, %v8614_v21  ;;  %v8642_v21 = vpack.c.bf16 %v8625_v44, %v8624_v60  ;;  %v4520_v60 = vld [vmem:[#allocation2 + $0x7a] sm:$0xff] }
 0x395   :  { %6087 = vmatmul.mubr.msk.bf16.vlgmr.msra.gmra.mrb[0].mxu1 %vm309_vm1, %v8615_v54  ;;  %v4303_v54 = vld [vmem:[#allocation2 + $0xc9] sm:$0xf] }
 0x396   :  { %6111 = vmatpush3.bf16.msra.mxu1 %v3901_v50  ;;  %6090 = vmatprep.mubr.msk.bf16.mxu1 %vm309_vm1, %v8616_v5  ;;  %v4315_v5 = vpack.c.bf16 %v4303_v54, %v4303_v54 }
 0x397   :  { %6613 = vmatprep.subr.msk.bf16.mxu1 %vm2847_vm4, %v5264_v59  ;;  %v8648_v59 = vpack.c.bf16 %v8637_v51, %v8636_v0 }
 0x39d   :  { %6091 = vmatmul.mubr.msk.bf16.gmra.mrb[4].mxu1 %vm309_vm1, %v8617_v16  ;;  %v4508_v16 = vld [vmem:[#allocation2 + $0x1a] sm:$0xff] }
 0x39e   :  { %6094 = vmatprep.mubr.msk.bf16.mxu1 %vm309_vm1, %v8618_v58  ;;  %v4509_v58 = vld [vmem:[#allocation2 + $0x22] sm:$0xff] }
 0x3a5   :  { %6095 = vmatmul.mubr.msk.bf16.gmra.mrb[8].mxu1 %vm309_vm1, %v8619_v61  ;;  %v4531_v61 = vpack.c.bf16 %v4509_v58, %v4508_v16 }
 0x3a6   :  { %6098 = vmatprep.mubr.msk.bf16.mxu1 %vm309_vm1, %v8620_v4  ;;  %v4510_v4 = vld [vmem:[#allocation2 + $0x2a] sm:$0xff] }
 0x3ad   :  { %6099 = vmatmul.mubr.msk.bf16.gmra.mrb[12].mxu1 %vm309_vm1, %v8621_v41  ;;  %v4511_v41 = vld [vmem:[#allocation2 + $0x32] sm:$0xff] }
 0x3ae   :  { %6102 = vmatprep.mubr.msk.bf16.mxu1 %vm309_vm1, %v8622_v62  ;;  %v4512_v62 = vld [vmem:[#allocation2 + $0x3a] sm:$0xff] }
 0x3b5   :  { %6103 = vmatmul.mubr.msk.bf16.gmra.mrb[16].mxu1 %vm309_vm1, %v8623_v34 }
 0x3b6   :  { %6106 = vmatprep.mubr.msk.bf16.mxu1 %vm309_vm1, %v3633_v63  ;;  %v4532_v63 = vpack.c.bf16 %v4511_v41, %v4510_v4  ;;  %v8654_v4 = vld [vmem:[#allocation8_spill] sm:$0xff] }
 0x3bd   :  { %6107 = vmatmul.mubr.msk.bf16.gmra.mrb[20].mxu1 %vm309_vm1, %v3634_v15  ;;  %v4516_v15 = vld [vmem:[#allocation2 + $0x5a] sm:$0xff] }
 0x3be   :  { %6112 = vmatprep.mubr.msk.bf16.mxu1 %vm309_vm1, %v3850_v18  ;;  %v4517_v18 = vld [vmem:[#allocation2 + $0x62] sm:$0xff] }
 0x3c5   :  { %6113 = vmatmul.mubr.msk.bf16.vlgmr.msra.gmra.mrb[0].mxu1 %vm309_vm1, %v3851_v53  ;;  %v4534_v53 = vpack.c.bf16 %v4515_v25, %v4514_v48  ;;  %v8655_v25 = vld [vmem:[#allocation9_spill] sm:$0xff] }
 0x3c6   :  { %6137 = vmatpush3.bf16.msra.mxu1 %v4128_v43  ;;  %6116 = vmatprep.mubr.msk.bf16.mxu1 %vm309_vm1, %v3852_v42  ;;  %v4535_v43 = vpack.c.bf16 %v4517_v18, %v4516_v15  ;;  %v4518_v42 = vld [vmem:[#allocation2 + $0x6a] sm:$0xff] }
 0x3c7   :  { %6614 = vmatprep.subr.msk.bf16.mxu1 %vm2847_vm4, %v5277_v33  ;;  %v4519_v33 = vld [vmem:[#allocation2 + $0x72] sm:$0xff] }
 0x3c8   :  { %v4536_v44 = vpack.c.bf16 %v4519_v33, %v4518_v42 }
 0x3cd   :  { %6117 = vmatmul.mubr.msk.bf16.gmra.mrb[4].mxu1 %vm309_vm1, %v3853_v17  ;;  %v4521_v17 = vld [vmem:[#allocation2 + $0x82] sm:$0xff] }
 0x3ce   :  { %6120 = vmatprep.mubr.msk.bf16.mxu1 %vm309_vm1, %v3854_v2  ;;  %v4522_v2 = vld [vmem:[#allocation2 + $0x8a] sm:$0xff] }
 0x3d5   :  { %6121 = vmatmul.mubr.msk.bf16.gmra.mrb[8].mxu1 %vm309_vm1, %v3855_v23  ;;  %v4525_v23 = vld [vmem:[#allocation2 + $0xa2] sm:$0xff] }
 0x3d6   :  { %6124 = vmatprep.mubr.msk.bf16.mxu1 %vm309_vm1, %v3856_v45  ;;  %v4526_v45 = vld [vmem:[#allocation2 + $0xaa] sm:$0xff] }
 0x3dd   :  { %6125 = vmatmul.mubr.msk.bf16.gmra.mrb[12].mxu1 %vm309_vm1, %v3857_v13  ;;  %v4529_v13 = vld [vmem:[#allocation2 + $0xc2] sm:$0xff] }
 0x3de   :  { %6128 = vmatprep.mubr.msk.bf16.mxu1 %vm309_vm1, %v3858_v47  ;;  %v4530_v47 = vld [vmem:[#allocation2 + $0xca] sm:$0xf] }
 0x3e5   :  { %6129 = vmatmul.mubr.msk.bf16.gmra.mrb[16].mxu1 %vm309_vm1, %v3859_v3  ;;  %v8649_v3 = vld [vmem:[#allocation5_spill] sm:$0xff] }
 0x3e6   :  { %6132 = vmatprep.mubr.msk.bf16.mxu1 %vm309_vm1, %v3860_v57  ;;  %v8650_v57 = vld [vmem:[#allocation3_spill] sm:$0xff] }
 0x3ed   :  { %6133 = vmatmul.mubr.msk.bf16.gmra.mrb[20].mxu1 %vm309_vm1, %v3861_v22 }
 0x3ee   :  { %6138 = vmatprep.mubr.msk.bf16.mxu1 %vm309_vm1, %v7949_v24  ;;  %v8638_v24 = vld [vmem:[#allocation41_spill] sm:$0xff] }
 0x3f5   :  { %6139 = vmatmul.mubr.msk.bf16.vlgmr.msra.gmra.mrb[0].mxu1 %vm309_vm1, %v7954_v19  ;;  %v4075_v19 = vld [vmem:[#allocation2 + $0xc0] sm:$0xff] }
 0x3f6   :  { %6163 = vmatpush3.bf16.msra.mxu1 %v4355_v36  ;;  %6142 = vmatprep.mubr.msk.bf16.mxu1 %vm309_vm1, %v7966_v30  ;;  %v4087_v30 = vpack.c.bf16 %v4075_v19, %v3621_v10  ;;  %v4513_v10 = vld [vmem:[#allocation2 + $0x42] sm:$0xff] }
 0x3f7   :  { %6615 = vmatprep.subr.msk.bf16.mxu1 %vm2847_vm4, %v5290_v29  ;;  %v4533_v34 = vpack.c.bf16 %v4513_v10, %v4512_v62 }
 0x3fd   :  { %6143 = vmatmul.mubr.msk.bf16.gmra.mrb[4].mxu1 %vm309_vm1, %v7970_v7  ;;  %v4076_v7 = vld [vmem:[#allocation2 + $0xc8] sm:$0xf] }
 0x3fe   :  { %6146 = vmatprep.mubr.msk.bf16.mxu1 %vm309_vm1, %v7978_v9  ;;  %v4088_v9 = vpack.c.bf16 %v4076_v7, %v4076_v7 }
 0x405   :  { %6147 = vmatmul.mubr.msk.bf16.gmra.mrb[8].mxu1 %vm309_vm1, %v7982_v12  ;;  %v8639_v12 = vpack.c.bf16 %v7854_v31, %v7852_v26  ;;  %v8643_v31 = vpack.c.bf16 %v8627_v1, %v8626_v52  ;;  %v8646_v26 = vpack.c.bf16 %v8633_v39, %v8632_v11  ;;  %v4537_v52 = vpack.c.bf16 %v4521_v17, %v4520_v60  ;;  %v4523_v1 = vld [vmem:[#allocation2 + $0x92] sm:$0xff]  ;;  %v4528_v11 = vld [vmem:[#allocation2 + $0xba] sm:$0xff] }
 0x406   :  { %6150 = vmatprep.mubr.msk.bf16.mxu1 %vm309_vm1, %v7990_v37  ;;  %v4582_v37 = vsel %vm2847_vm4, %v5290_v29, 0 }
 0x40d   :  { %6151 = vmatmul.mubr.msk.bf16.gmra.mrb[12].mxu1 %vm309_vm1, %v7994_v32  ;;  %v8640_v32 = vpack.c.bf16 %v7858_v28, %v7856_v56  ;;  %v8644_v56 = vpack.c.bf16 %v8629_v14, %v8628_v38  ;;  %v4302_v28 = vld [vmem:[#allocation2 + $0xc1] sm:$0xff]  ;;  %v4538_v14 = vpack.c.bf16 %v4523_v1, %v4522_v2 }
 0x40e   :  { %6154 = vmatprep.mubr.msk.bf16.mxu1 %vm309_vm1, %v8638_v24  ;;  %v4314_v50 = vpack.c.bf16 %v4302_v28, %v3848_v40  ;;  %v4524_v38 = vld [vmem:[#allocation2 + $0x9a] sm:$0xff]  ;;  %v4542_v40 = vpack.c.bf16 %v4530_v47, %v4530_v47 }
 0x40f   :  { %v8651_v24 = vld [vmem:[#allocation7_spill] sm:$0xff] }
 0x415   :  { %6155 = vmatmul.mubr.msk.bf16.gmra.mrb[16].mxu1 %vm309_vm1, %v8005_v8  ;;  %v8641_v8 = vpack.c.bf16 %v7864_v27, %v7860_v20  ;;  %v8645_v20 = vpack.c.bf16 %v8631_v35, %v8630_v46  ;;  %v8647_v27 = vpack.c.bf16 %v8635_v49, %v8634_v55  ;;  %v4539_v46 = vpack.c.bf16 %v4525_v23, %v4524_v38  ;;  %v4527_v35 = vld [vmem:[#allocation2 + $0xb2] sm:$0xff] }
 0x416   :  { %6158 = vmatprep.mubr.msk.bf16.mxu1 %vm309_vm1, %v4087_v30  ;;  %v4540_v39 = vpack.c.bf16 %v4527_v35, %v4526_v45  ;;  %v4541_v55 = vpack.c.bf16 %v4529_v13, %v4528_v11  ;;  %v8652_v30 = vld [vmem:[#allocation4_spill] sm:$0xff]  ;;  %v8657_v13 = vld [vmem:[#allocation10_spill] sm:$0xff] }
 0x41d   :  { %6159 = vmatmul.mubr.msk.bf16.gmra.mrb[20].mxu1 %vm309_vm1, %v4088_v9 }
 0x41e   :  { %6164 = vmatprep.mubr.msk.bf16.mxu1 %vm309_vm1, %v8639_v12 }
 0x425   :  { %6165 = vmatmul.mubr.msk.bf16.vlgmr.msra.gmra.mrb[0].mxu1 %vm309_vm1, %v8640_v32 }
 0x426   :  { %6189 = vmatpush3.bf16.msra.mxu1 %v4582_v37  ;;  %6168 = vmatprep.mubr.msk.bf16.mxu1 %vm309_vm1, %v8641_v8 }
 0x42d   :  { %6169 = vmatmul.mubr.msk.bf16.gmra.mrb[4].mxu1 %vm309_vm1, %v8642_v21 }
 0x42e   :  { %6172 = vmatprep.mubr.msk.bf16.mxu1 %vm309_vm1, %v8643_v31 }
 0x435   :  { %6173 = vmatmul.mubr.msk.bf16.gmra.mrb[8].mxu1 %vm309_vm1, %v8644_v56 }
 0x436   :  { %6176 = vmatprep.mubr.msk.bf16.mxu1 %vm309_vm1, %v8645_v20 }
 0x43d   :  { %6177 = vmatmul.mubr.msk.bf16.gmra.mrb[12].mxu1 %vm309_vm1, %v8646_v26 }
 0x43e   :  { %6180 = vmatprep.mubr.msk.bf16.mxu1 %vm309_vm1, %v8647_v27 }
 0x445   :  { %6181 = vmatmul.mubr.msk.bf16.gmra.mrb[16].mxu1 %vm309_vm1, %v8648_v59 }
 0x446   :  { %6184 = vmatprep.mubr.msk.bf16.mxu1 %vm309_vm1, %v4314_v50 }
 0x44d   :  { %6185 = vmatmul.mubr.msk.bf16.gmra.mrb[20].mxu1 %vm309_vm1, %v4315_v5  ;;  %v8653_v5 = vld [vmem:[#allocation6_spill] sm:$0xff] }
 0x44e   :  { %6190 = vmatprep.mubr.msk.bf16.mxu1 %vm309_vm1, %v4531_v61 }
 0x455   :  { %6191 = vmatmul.mubr.msk.bf16.vlgmr.msra.gmra.mrb[0].mxu1 %vm309_vm1, %v4532_v63 }
 0x456   :  { %6194 = vmatprep.mubr.msk.bf16.mxu1 %vm309_vm1, %v4533_v34 }
 0x45d   :  { %6195 = vmatmul.mubr.msk.bf16.gmra.mrb[4].mxu1 %vm309_vm1, %v4534_v53 }
 0x45e   :  { %6198 = vmatprep.mubr.msk.bf16.mxu1 %vm309_vm1, %v4535_v43  ;;  %v8656_v43 = vld [vmem:[#allocation11_spill] sm:$0xff] }
 0x465   :  { %6199 = vmatmul.mubr.msk.bf16.gmra.mrb[8].mxu1 %vm309_vm1, %v4536_v44 }
 0x466   :  { %6202 = vmatprep.mubr.msk.bf16.mxu1 %vm309_vm1, %v4537_v52 }
 0x46d   :  { %6203 = vmatmul.mubr.msk.bf16.gmra.mrb[12].mxu1 %vm309_vm1, %v4538_v14 }
 0x46e   :  { %6206 = vmatprep.mubr.msk.bf16.mxu1 %vm309_vm1, %v4539_v46 }
 0x475   :  { %6207 = vmatmul.mubr.msk.bf16.gmra.mrb[16].mxu1 %vm309_vm1, %v4540_v39 }
 0x476   :  { %6210 = vmatprep.mubr.msk.bf16.mxu1 %vm309_vm1, %v4541_v55 }
 0x47d   :  { %6211 = vmatmul.mubr.msk.bf16.gmra.mrb[20].mxu1 %vm309_vm1, %v4542_v40  ;;  %v8658_v40 = vld [vmem:[#allocation12_spill] sm:$0xff] }
 0x528   :  { %v8226_v49 = vpop.f32.mrb[0].mxu1 }
 0x529   :  { %v8228_v0 = vpop.f32.mrb[1].mxu1  ;;  %v4737_v51 = vmul.f32 %v8226_v49, %v8649_v3 }
 0x52a   :  { %v4735_v6 = vmul.f32 %v8228_v0, %v8650_v57  ;;  %v8234_v22 = vpop.f32.mrb[2].mxu1 }
 0x52b   :  { %v8236_v36 = vpop.f32.mrb[3].mxu1  ;;  %v4738_v19 = vmul.f32 %v8234_v22, %v8651_v24  ;;  %v4812_v9 = vmul.f32 %v4737_v51, %v4737_v51  ;;  %v4761_v21 = vsel %vm309_vm1, %v4737_v51, 0.0 }
 0x52c   :  { %v4810_v29 = vmul.f32 %v4735_v6, %v4735_v6  ;;  %v4736_v7 = vmul.f32 %v8236_v36, %v8652_v30  ;;  %v4758_v12 = vsel %vm309_vm1, %v4735_v6, 0.0 }
 0x52d   :  { %v4813_v56 = vmul.f32 %v4738_v19, %v4738_v19  ;;  %v4836_v59 = vsel %vm309_vm1, %v4812_v9, 0.0  ;;  %v4763_v54 = vsel %vm309_vm1, %v4738_v19, 0.0  ;;  %v8659_v19 = vld [vmem:[#allocation13_spill] sm:$0xff] }
 0x52e   :  { %v4759_v37 = vsel %vm309_vm1, %v4736_v7, 0.0  ;;  %v4811_v32 = vmul.f32 %v4736_v7, %v4736_v7  ;;  %v4833_v31 = vsel %vm309_vm1, %v4810_v29, 0.0 }
 0x52f   :  { %v4760_v8 = vadd.f32 %v4759_v37, %v4758_v12  ;;  %v4838_v63 = vsel %vm309_vm1, %v4813_v56, 0.0  ;;  %v8660_v12 = vld [vmem:[#allocation15_spill] sm:$0xff] }
 0x530   :  { %v4834_v20 = vsel %vm309_vm1, %v4811_v32, 0.0  ;;  %v8247_v26 = vpop.f32.mrb[4].mxu1 }
 0x531   :  { %v4762_v27 = vadd.f32 %v4761_v21, %v4760_v8  ;;  %v4835_v28 = vadd.f32 %v4834_v20, %v4833_v31  ;;  %v8249_v50 = vpop.f32.mrb[5].mxu1  ;;  %v4741_v41 = vmul.f32 %v8247_v26, %v8654_v4 }
 0x532   :  { %v4739_v16 = vmul.f32 %v8249_v50, %v8653_v5  ;;  %v8255_v58 = vpop.f32.mrb[6].mxu1 }
 0x533   :  { %v4837_v61 = vadd.f32 %v4836_v59, %v4835_v28  ;;  %v4764_v62 = vadd.f32 %v4763_v54, %v4762_v27  ;;  %v8259_v10 = vpop.f32.mrb[7].mxu1  ;;  %v4742_v42 = vmul.f32 %v8255_v58, %v8656_v43  ;;  %v4816_v17 = vmul.f32 %v4741_v41, %v4741_v41 }
 0x534   :  { %v4765_v34 = vsel %vm309_vm1, %v4739_v16, 0.0  ;;  %v4814_v48 = vmul.f32 %v4739_v16, %v4739_v16  ;;  %v4740_v15 = vmul.f32 %v8259_v10, %v8655_v25  ;;  %v4769_v1 = vsel %vm309_vm1, %v4741_v41, 0.0  ;;  %v8662_v25 = vld [vmem:[#allocation16_spill] sm:$0xff] }
 0x535   :  { %v4766_v18 = vadd.f32 %v4765_v34, %v4764_v62  ;;  %v4839_v53 = vadd.f32 %v4838_v63, %v4837_v61  ;;  %v4817_v23 = vmul.f32 %v4742_v42, %v4742_v42  ;;  %v4771_v35 = vsel %vm309_vm1, %v4742_v42, 0.0  ;;  %v8661_v62 = vld [vmem:[#allocation14_spill] sm:$0xff] }
 0x536   :  { %v4840_v33 = vsel %vm309_vm1, %v4814_v48, 0.0  ;;  %v4767_v60 = vsel %vm309_vm1, %v4740_v15, 0.0  ;;  %v4815_v2 = vmul.f32 %v4740_v15, %v4740_v15  ;;  %v4844_v47 = vsel %vm309_vm1, %v4816_v17, 0.0 }
 0x537   :  { %v4841_v44 = vadd.f32 %v4840_v33, %v4839_v53  ;;  %v4768_v52 = vadd.f32 %v4767_v60, %v4766_v18  ;;  %v4846_v7 = vsel %vm309_vm1, %v4817_v23, 0.0  ;;  %v8663_v60 = vld [vmem:[#allocation17_spill] sm:$0xff] }
 0x538   :  { %v8270_v38 = vpop.f32.mrb[8].mxu1  ;;  %v4842_v46 = vsel %vm309_vm1, %v4815_v2, 0.0  ;;  %v8664_v2 = vld [vmem:[#allocation19_spill] sm:$0xff] }
 0x539   :  { %v4770_v14 = vadd.f32 %v4769_v1, %v4768_v52  ;;  %v8273_v45 = vpop.f32.mrb[9].mxu1  ;;  %v4843_v11 = vadd.f32 %v4842_v46, %v4841_v44  ;;  %v4745_v3 = vmul.f32 %v8270_v38, %v8658_v40 }
 0x53a   :  { %v4743_v39 = vmul.f32 %v8273_v45, %v8657_v13  ;;  %v8278_v55 = vpop.f32.mrb[10].mxu1 }
 0x53b   :  { %v4772_v51 = vadd.f32 %v4771_v35, %v4770_v14  ;;  %v8283_v57 = vpop.f32.mrb[11].mxu1  ;;  %v4845_v6 = vadd.f32 %v4844_v47, %v4843_v11  ;;  %v4746_v37 = vmul.f32 %v8278_v55, %v8660_v12  ;;  %v4820_v56 = vmul.f32 %v4745_v3, %v4745_v3 }
 0x53c   :  { %v4773_v29 = vsel %vm309_vm1, %v4743_v39, 0.0  ;;  %v4818_v24 = vmul.f32 %v4743_v39, %v4743_v39  ;;  %v4744_v30 = vmul.f32 %v8283_v57, %v8659_v19  ;;  %v4777_v27 = vsel %vm309_vm1, %v4745_v3, 0.0 }
 0x53d   :  { %v4774_v9 = vadd.f32 %v4773_v29, %v4772_v51  ;;  %v4847_v32 = vadd.f32 %v4846_v7, %v4845_v6  ;;  %v4821_v5 = vmul.f32 %v4746_v37, %v4746_v37  ;;  %v4779_v4 = vsel %vm309_vm1, %v4746_v37, 0.0  ;;  %v8666_v37 = vld [vmem:[#allocation20_spill] sm:$0xff] }
 0x53e   :  { %v4848_v8 = vsel %vm309_vm1, %v4818_v24, 0.0  ;;  %v4775_v21 = vsel %vm309_vm1, %v4744_v30, 0.0  ;;  %v4819_v31 = vmul.f32 %v4744_v30, %v4744_v30  ;;  %v4852_v48 = vsel %vm309_vm1, %v4820_v56, 0.0  ;;  %v8665_v30 = vld [vmem:[#allocation18_spill] sm:$0xff] }
 0x53f   :  { %v4776_v20 = vadd.f32 %v4775_v21, %v4774_v9  ;;  %v4849_v28 = vadd.f32 %v4848_v8, %v4847_v32  ;;  %v4854_v44 = vsel %vm309_vm1, %v4821_v5, 0.0 }
 0x540   :  { %v4850_v59 = vsel %vm309_vm1, %v4819_v31, 0.0  ;;  %v8295_v54 = vpop.f32.mrb[12].mxu1 }
 0x541   :  { %v4778_v16 = vadd.f32 %v4777_v27, %v4776_v20  ;;  %v8297_v61 = vpop.f32.mrb[13].mxu1  ;;  %v4851_v41 = vadd.f32 %v4850_v59, %v4849_v28  ;;  %v4749_v15 = vmul.f32 %v8295_v54, %v8662_v25  ;;  %v8667_v27 = vld [vmem:[#allocation21_spill] sm:$0xff] }
 0x542   :  { %v4747_v63 = vmul.f32 %v8297_v61, %v8661_v62  ;;  %v8302_v34 = vpop.f32.mrb[14].mxu1 }
 0x543   :  { %v4780_v18 = vadd.f32 %v4779_v4, %v4778_v16  ;;  %v8307_v53 = vpop.f32.mrb[15].mxu1  ;;  %v4853_v43 = vadd.f32 %v4852_v48, %v4851_v41  ;;  %v4750_v1 = vmul.f32 %v8302_v34, %v8664_v2  ;;  %v4824_v11 = vmul.f32 %v4749_v15, %v4749_v15  ;;  %v8668_v16 = vld [vmem:[#allocation23_spill] sm:$0xff] }
 0x544   :  { %v4781_v42 = vsel %vm309_vm1, %v4747_v63, 0.0  ;;  %v4822_v33 = vmul.f32 %v4747_v63, %v4747_v63  ;;  %v4748_v17 = vmul.f32 %v8307_v53, %v8663_v60  ;;  %v4785_v39 = vsel %vm309_vm1, %v4749_v15, 0.0 }
 0x545   :  { %v4782_v52 = vadd.f32 %v4781_v42, %v4780_v18  ;;  %v4855_v23 = vadd.f32 %v4854_v44, %v4853_v43  ;;  %v4825_v51 = vmul.f32 %v4750_v1, %v4750_v1  ;;  %v4787_v24 = vsel %vm309_vm1, %v4750_v1, 0.0  ;;  %v8669_v1 = vld [vmem:[#allocation22_spill] sm:$0xff] }
 0x546   :  { %v4856_v14 = vsel %vm309_vm1, %v4822_v33, 0.0  ;;  %v4783_v46 = vsel %vm309_vm1, %v4748_v17, 0.0  ;;  %v4823_v35 = vmul.f32 %v4748_v17, %v4748_v17  ;;  %v4860_v12 = vsel %vm309_vm1, %v4824_v11, 0.0 }
 0x547   :  { %v4784_v13 = vadd.f32 %v4783_v46, %v4782_v52  ;;  %v4857_v47 = vadd.f32 %v4856_v14, %v4855_v23  ;;  %v4862_v59 = vsel %vm309_vm1, %v4825_v51, 0.0 }
 0x548   :  { %v4858_v40 = vsel %vm309_vm1, %v4823_v35, 0.0  ;;  %v8319_v3 = vpop.f32.mrb[16].mxu1  ;;  %v8670_v35 = vld [vmem:[#allocation25_spill] sm:$0xff] }
 0x549   :  { %v4786_v6 = vadd.f32 %v4785_v39, %v4784_v13  ;;  %v8321_v29 = vpop.f32.mrb[17].mxu1  ;;  %v4859_v19 = vadd.f32 %v4858_v40, %v4857_v47  ;;  %v4753_v32 = vmul.f32 %v8319_v3, %v8666_v37 }
 0x54a   :  { %v4751_v7 = vmul.f32 %v8321_v29, %v8665_v30  ;;  %v8326_v9 = vpop.f32.mrb[18].mxu1 }
 0x54b   :  { %v4788_v8 = vadd.f32 %v4787_v24, %v4786_v6  ;;  %v8331_v21 = vpop.f32.mrb[19].mxu1  ;;  %v4861_v31 = vadd.f32 %v4860_v12, %v4859_v19  ;;  %v4754_v4 = vmul.f32 %v8326_v9, %v8668_v16  ;;  %v4828_v25 = vmul.f32 %v4753_v32, %v4753_v32  ;;  %v8671_v6 = vld [vmem:[#allocation26_spill] sm:$0xff] }
 0x54c   :  { %v4789_v56 = vsel %vm309_vm1, %v4751_v7, 0.0  ;;  %v4826_v20 = vmul.f32 %v4751_v7, %v4751_v7  ;;  %v4752_v28 = vmul.f32 %v8331_v21, %v8667_v27  ;;  %v4793_v18 = vsel %vm309_vm1, %v4753_v32, 0.0 }
 0x54d   :  { %v4790_v5 = vadd.f32 %v4789_v56, %v4788_v8  ;;  %v4863_v41 = vadd.f32 %v4862_v59, %v4861_v31  ;;  %v4829_v60 = vmul.f32 %v4754_v4, %v4754_v4  ;;  %v4795_v52 = vsel %vm309_vm1, %v4754_v4, 0.0 }
 0x54e   :  { %v4864_v62 = vsel %vm309_vm1, %v4826_v20, 0.0  ;;  %v4791_v63 = vsel %vm309_vm1, %v4752_v28, 0.0  ;;  %v4827_v48 = vmul.f32 %v4752_v28, %v4752_v28  ;;  %v4868_v46 = vsel %vm309_vm1, %v4828_v25, 0.0 }
 0x54f   :  { %v4792_v15 = vadd.f32 %v4791_v63, %v4790_v5  ;;  %v4865_v43 = vadd.f32 %v4864_v62, %v4863_v41  ;;  %v4870_v19 = vsel %vm309_vm1, %v4829_v60, 0.0 }
 0x550   :  { %v4866_v42 = vsel %vm309_vm1, %v4827_v48, 0.0  ;;  %v8343_v33 = vpop.f32.mrb[20].mxu1 }
 0x551   :  { %v4794_v17 = vadd.f32 %v4793_v18, %v4792_v15  ;;  %v8345_v44 = vpop.f32.mrb[21].mxu1  ;;  %v4867_v2 = vadd.f32 %v4866_v42, %v4865_v43  ;;  %v4757_v11 = vmul.f32 %v8343_v33, %v8670_v35 }
 0x552   :  { %v4755_v23 = vmul.f32 %v8345_v44, %v8669_v1  ;;  %v6213_v14 = vpop.f32.mrb[22].mxu1 }
 0x553   :  { %v4796_v13 = vadd.f32 %v4795_v52, %v4794_v17  ;;  %v8353_v39 = vpop.f32.mrb[23].mxu1  ;;  %v4869_v47 = vadd.f32 %v4868_v46, %v4867_v2  ;;  %v4832_v8 = vmul.f32 %v4757_v11, %v4757_v11  ;;  %v4801_v56 = vsel %vm2517_vm5, %v4757_v11, 0.0  ;;  %v4887_v46 = vld [vmem:[%s8493_s6] sm:$0x1] }
 0x554   :  { %v4797_v40 = vsel %vm309_vm1, %v4755_v23, 0.0  ;;  %v4830_v51 = vmul.f32 %v4755_v23, %v4755_v23  ;;  %v4756_v24 = vmul.f32 %v8353_v39, %v8671_v6 }
 0x555   :  { %v4798_v30 = vadd.f32 %v4797_v40, %v4796_v13  ;;  %v4871_v7 = vadd.f32 %v4870_v19, %v4869_v47  ;;  %v4876_v5 = vsel %vm2517_vm5, %v4832_v8, 0.0  ;;  %v4891_v13 = vld [vmem:[%s8494_s7] sm:$0x1]  ;;  %v8672_v40 = vld [vmem:[#allocation27_spill] sm:$0xff] }
 0x556   :  { %v4872_v12 = vsel %vm309_vm1, %v4830_v51, 0.0  ;;  %v4799_v37 = vsel %vm309_vm1, %v4756_v24, 0.0  ;;  %v4831_v32 = vmul.f32 %v4756_v24, %v4756_v24 }
 0x557   :  { %v4800_v31 = vadd.f32 %v4799_v37, %v4798_v30  ;;  %v4873_v20 = vadd.f32 %v4872_v12, %v4871_v7 }
 0x558   :  { %v4874_v27 = vsel %vm309_vm1, %v4831_v32, 0.0 }
 0x559   :  { %v4802_v28 = vadd.f32 %v4801_v56, %v4800_v31  ;;  %v4875_v59 = vadd.f32 %v4874_v27, %v4873_v20 }
 0x55b   :  { %v4803_v16 = vrot.slane %v4802_v28, 4  ;;  %v4877_v4 = vadd.f32 %v4876_v5, %v4875_v59 }
 0x55d   :  { %v4804_v41 = vadd.f32 %v4803_v16, %v4802_v28  ;;  %v4878_v62 = vrot.slane %v4877_v4, 4 }
 0x55f   :  { %v4805_v63 = vrot.slane %v4804_v41, 2  ;;  %v4879_v48 = vadd.f32 %v4878_v62, %v4877_v4 }
 0x561   :  { %v4806_v25 = vadd.f32 %v4805_v63, %v4804_v41  ;;  %v4880_v15 = vrot.slane %v4879_v48, 2 }
 0x563   :  { %v4807_v18 = vrot.slane %v4806_v25, 1  ;;  %v4881_v43 = vadd.f32 %v4880_v15, %v4879_v48 }
 0x565   :  { %v4808_v42 = vadd.f32 %v4807_v18, %v4806_v25  ;;  %v4882_v60 = vrot.slane %v4881_v43, 1 }
 0x567   :  { %v4809_v17 = vmul.f32 0.0078125, %v4808_v42  ;;  %v4883_v52 = vadd.f32 %v4882_v60, %v4881_v43 }
 0x569   :  { %v4885_v2 = vmul.f32 %v4809_v17, %v4809_v17  ;;  %v4884_v1 = vmul.f32 0.0078125, %v4883_v52 }
 0x56b   :  { %v4886_v23 = vsub.f32 %v4884_v1, %v4885_v2 }
 0x56d   :  { %v4888_v14 = vadd.f32 1e-05, %v4886_v23 }
 0x56f   :  { %6622 = vrsqrt.f32 %v4888_v14 }
 0x579   :  { %v6623_v35 = vpop.eup %6622 }
 0x57a   :  { %v4890_v11 = vmul.f32 %v6623_v35, %v4887_v46 }
 0x57c   :  { %v4892_v47 = vmul.f32 %v4890_v11, %v4809_v17  ;;  %v4898_v51 = vrot.slane %v4890_v11, %v8672_v40 }
 0x57e   :  { %v4893_v6 = vsub.f32 %v4891_v13, %v4892_v47  ;;  %v4900_v24 = vmul.f32 %v4898_v51, %v8228_v0  ;;  %v4901_v19 = vmul.f32 %v4898_v51, %v8236_v36  ;;  %v4902_v30 = vmul.f32 %v8226_v49, %v4898_v51 }
 0x57f   :  { %v4903_v7 = vmul.f32 %v8234_v22, %v4898_v51  ;;  %v4904_v12 = vmul.f32 %v4898_v51, %v8249_v50  ;;  %v4905_v37 = vmul.f32 %v4898_v51, %v8259_v10  ;;  %v4906_v32 = vmul.f32 %v8247_v26, %v4898_v51 }
 0x580   :  { %v4907_v8 = vmul.f32 %v8255_v58, %v4898_v51  ;;  %v4908_v31 = vmul.f32 %v4898_v51, %v8273_v45  ;;  %v4909_v56 = vmul.f32 %v4898_v51, %v8283_v57  ;;  %v4910_v0 = vmul.f32 %v8270_v38, %v4898_v51 }
 0x581   :  { %v4911_v36 = vmul.f32 %v8278_v55, %v4898_v51  ;;  %v4912_v49 = vmul.f32 %v4898_v51, %v8297_v61  ;;  %v4913_v22 = vmul.f32 %v4898_v51, %v8307_v53  ;;  %v4914_v50 = vmul.f32 %v8295_v54, %v4898_v51 }
 0x582   :  { %v4915_v10 = vmul.f32 %v8302_v34, %v4898_v51  ;;  %v4916_v26 = vmul.f32 %v4898_v51, %v8321_v29  ;;  %v4917_v58 = vmul.f32 %v4898_v51, %v8331_v21  ;;  %v4918_v45 = vmul.f32 %v8319_v3, %v4898_v51 }
 0x583   :  { %v4919_v57 = vmul.f32 %v8326_v9, %v4898_v51  ;;  %v4920_v38 = vmul.f32 %v4898_v51, %v8345_v44  ;;  %v4921_v55 = vmul.f32 %v4898_v51, %v8353_v39  ;;  %v4922_v61 = vmul.f32 %v8343_v33, %v4898_v51 }
 0x584   :  { %v4927_v53 = vrot.slane %v4893_v6, %v8672_v40 }
 0x586   :  { %v4929_v20 = vadd.f32 %v4927_v53, %v4900_v24  ;;  %v4930_v54 = vadd.f32 %v4927_v53, %v4901_v19  ;;  %v4931_v27 = vadd.f32 %v4927_v53, %v4902_v30  ;;  %v4932_v34 = vadd.f32 %v4927_v53, %v4903_v7 }
 0x587   :  { %v4933_v28 = vadd.f32 %v4927_v53, %v4904_v12  ;;  %v4934_v29 = vadd.f32 %v4927_v53, %v4905_v37  ;;  %v4935_v59 = vadd.f32 %v4927_v53, %v4906_v32  ;;  %v4936_v21 = vadd.f32 %v4927_v53, %v4907_v8 }
 0x588   :  { %v4937_v5 = vadd.f32 %v4927_v53, %v4908_v31  ;;  %v4938_v3 = vadd.f32 %v4927_v53, %v4909_v56  ;;  %v4939_v16 = vadd.f32 %v4927_v53, %v4910_v0  ;;  %v4940_v9 = vadd.f32 %v4927_v53, %v4911_v36 }
 0x589   :  { %v4941_v4 = vadd.f32 %v4927_v53, %v4912_v49  ;;  %v4942_v44 = vadd.f32 %v4927_v53, %v4913_v22  ;;  %v4943_v41 = vadd.f32 %v4927_v53, %v4914_v50  ;;  %v4944_v39 = vadd.f32 %v4927_v53, %v4915_v10 }
 0x58a   :  { %v4945_v62 = vadd.f32 %v4927_v53, %v4916_v26  ;;  %v4946_v33 = vadd.f32 %v4927_v53, %v4917_v58  ;;  %v4947_v63 = vadd.f32 %v4927_v53, %v4918_v45  ;;  %v4948_v48 = vadd.f32 %v4927_v53, %v4919_v57 }
 0x58b   :  { %v4949_v25 = vadd.f32 %v4927_v53, %v4920_v38  ;;  %v4950_v15 = vadd.f32 %v4927_v53, %v4921_v55  ;;  %v4951_v18 = vadd.f32 %v4927_v53, %v4922_v61  ;;  %v4952_v43 = vmax.f32 %v4929_v20, 0.0 }
 0x58c   :  { %v4953_v42 = vmax.f32 %v4930_v54, 0.0  ;;  %v4954_v60 = vmax.f32 %v4931_v27, 0.0  ;;  %v4955_v17 = vmax.f32 %v4932_v34, 0.0  ;;  %v4956_v52 = vmax.f32 %v4933_v28, 0.0 }
 0x58d   :  { %v4957_v2 = vmax.f32 %v4934_v29, 0.0  ;;  %v4958_v1 = vmax.f32 %v4935_v59, 0.0  ;;  %v4959_v23 = vmax.f32 %v4936_v21, 0.0  ;;  %v4960_v14 = vmax.f32 %v4937_v5, 0.0  ;;  %4975 = vst.msk [vmem:[%s8495_s8] sm:$0xff] %vm309_vm1, %v4952_v43 }
 0x58e   :  { %v4961_v46 = vmax.f32 %v4938_v3, 0.0  ;;  %v4962_v35 = vmax.f32 %v4939_v16, 0.0  ;;  %v4963_v11 = vmax.f32 %v4940_v9, 0.0  ;;  %v4964_v13 = vmax.f32 %v4941_v4, 0.0  ;;  %4976 = vst.msk [vmem:[%s8495_s8 + $0x8] sm:$0xff] %vm309_vm1, %v4953_v42  ;;  %4977 = vst.msk [vmem:[%s8495_s8 + $0x10] sm:$0xff] %vm309_vm1, %v4954_v60 }
 0x58f   :  { %4978 = vst.msk [vmem:[%s8495_s8 + $0x18] sm:$0xff] %vm309_vm1, %v4955_v17  ;;  %4979 = vst.msk [vmem:[%s8495_s8 + $0x20] sm:$0xff] %vm309_vm1, %v4956_v52  ;;  %v4965_v47 = vmax.f32 %v4942_v44, 0.0  ;;  %v4966_v40 = vmax.f32 %v4943_v41, 0.0  ;;  %v4967_v51 = vmax.f32 %v4944_v39, 0.0  ;;  %v4968_v6 = vmax.f32 %v4945_v62, 0.0 }
 0x590   :  { %4980 = vst.msk [vmem:[%s8495_s8 + $0x28] sm:$0xff] %vm309_vm1, %v4957_v2  ;;  %4981 = vst.msk [vmem:[%s8495_s8 + $0x30] sm:$0xff] %vm309_vm1, %v4958_v1  ;;  %v4969_v24 = vmax.f32 %v4946_v33, 0.0  ;;  %v4970_v19 = vmax.f32 %v4947_v63, 0.0  ;;  %v4971_v30 = vmax.f32 %v4948_v48, 0.0  ;;  %v4972_v7 = vmax.f32 %v4949_v25, 0.0 }
 0x591   :  { %4982 = vst.msk [vmem:[%s8495_s8 + $0x38] sm:$0xff] %vm309_vm1, %v4959_v23  ;;  %4983 = vst.msk [vmem:[%s8495_s8 + $0x40] sm:$0xff] %vm309_vm1, %v4960_v14  ;;  %v4973_v12 = vmax.f32 %v4950_v15, 0.0  ;;  %v4974_v37 = vmax.f32 %v4951_v18, 0.0 }
 0x592   :  { %4984 = vst.msk [vmem:[%s8495_s8 + $0x48] sm:$0xff] %vm309_vm1, %v4961_v46  ;;  %4985 = vst.msk [vmem:[%s8495_s8 + $0x50] sm:$0xff] %vm309_vm1, %v4962_v35 }
 0x593   :  { %4986 = vst.msk [vmem:[%s8495_s8 + $0x58] sm:$0xff] %vm309_vm1, %v4963_v11  ;;  %4987 = vst.msk [vmem:[%s8495_s8 + $0x60] sm:$0xff] %vm309_vm1, %v4964_v13 }
 0x594   :  { %4988 = vst.msk [vmem:[%s8495_s8 + $0x68] sm:$0xff] %vm309_vm1, %v4965_v47  ;;  %4989 = vst.msk [vmem:[%s8495_s8 + $0x70] sm:$0xff] %vm309_vm1, %v4966_v40 }
 0x595   :  { %4990 = vst.msk [vmem:[%s8495_s8 + $0x78] sm:$0xff] %vm309_vm1, %v4967_v51  ;;  %4991 = vst.msk [vmem:[%s8495_s8 + $0x80] sm:$0xff] %vm309_vm1, %v4968_v6 }
 0x596   :  { %4992 = vst.msk [vmem:[%s8495_s8 + $0x88] sm:$0xff] %vm309_vm1, %v4969_v24  ;;  %4993 = vst.msk [vmem:[%s8495_s8 + $0x90] sm:$0xff] %vm309_vm1, %v4970_v19 }
 0x597   :  { %4994 = vst.msk [vmem:[%s8495_s8 + $0x98] sm:$0xff] %vm309_vm1, %v4971_v30  ;;  %4995 = vst.msk [vmem:[%s8495_s8 + $0xa0] sm:$0xff] %vm309_vm1, %v4972_v7 }
 0x598   :  { %4996 = vst.msk [vmem:[%s8495_s8 + $0xa8] sm:$0xff] %vm309_vm1, %v4973_v12 }
 0x599   :  { %4997 = vst.msk [vmem:[%s8495_s8 + $0xb0] sm:$0xf] %vm2517_vm5, %v4974_v37 }

</bundles_post_ra>
